<compile_context>
chip_gen: v5e
topology: v5e:2x2
jax: 0.10.0
libtpu: 0.0.40
codegen_flags: <defaults>
</compile_context>

<pallas_src>
import math
import functools

import jax
import jax.numpy as jnp
from jax.experimental import pallas as pl
from jax.experimental.pallas import tpu as pltpu

LN_EPS = 6.1e-05


def _round_up(x, m):
    return (x + m - 1) // m * m


@functools.lru_cache(maxsize=None)
def _has_bf16_vpu():
    """True on TPU generations with bf16 VPU/EUP lanes (v6e, v7x, ...)."""
    try:
        kind = jax.devices()[0].device_kind.lower()
    except Exception:
        return False
    return not any(tag in kind for tag in ("v2", "v3", "v4", "v5"))


def _vmem_capacity_bytes():
    """Physical per-TensorCore VMEM; conservative fallback if unqueryable."""
    try:
        return int(pltpu.get_tpu_info().vmem_capacity_bytes)
    except Exception:
        return 64 * 1024 * 1024   # v7x per-core size: safe everywhere


def _choose_row_tile(M, tm):
    """Row tile over the flattened (B*T) axis (always a multiple of 8)."""
    m_rows = _round_up(M, 8)
    tm = max(8, _round_up(tm, 8))
    if m_rows <= tm:
        # Whole problem fits one tile.  If it's big enough, split in two so
        # ("parallel",) can shard the grid across v7x's 2 TensorCores.
        if m_rows >= 512:
            return _round_up((m_rows + 1) // 2, 256)
        return m_rows
    # Multiple tiles: align the caller tile to MXU-friendly granularity.
    if tm >= 256:
        return _round_up(tm, 256)
    if tm >= 128:
        return _round_up(tm, 128)
    return tm


# ----------------------------------------------------------------------------
# Kernel
# ----------------------------------------------------------------------------
def _ffn_kernel(x_ref, w1_ref, b1_ref, w2_ref, b2_ref, o_ref, *,
                d_real, approx_gelu, gelu_dtype):
    # ---- LayerNorm (biased variance, matches torch.nn.LayerNorm), f32 ----
    # The affine (gamma, beta) is folded into W1/b1 at prep time.
    x = x_ref[...].astype(jnp.float32)                       # (tm, Dp)
    d_pad = x.shape[-1]
    inv_d = 1.0 / d_real
    mean = jnp.sum(x, axis=-1, keepdims=True) * inv_d        # pad cols are zero
    cent = x - mean
    if d_pad != d_real:
        lane = jax.lax.broadcasted_iota(jnp.int32, (1, d_pad), 1)
        cent = jnp.where(lane < d_real, cent, 0.0)           # keep pad lanes 0
    var = jnp.sum(cent * cent, axis=-1, keepdims=True) * inv_d
    xn = cent * jax.lax.rsqrt(var + LN_EPS)                  # (tm, Dp)

    # ---- Linear1 (Dp -> Hp): MXU operands in weight dtype, f32 accumulate ----
    h = jnp.dot(xn.astype(w1_ref.dtype), w1_ref[...],
                preferred_element_type=jnp.float32)          # (tm, Hp)

    # ---- bias + GELU, fused in gelu_dtype (bf16 on v6e/v7x, f32 on v5e) ----
    h = h.astype(gelu_dtype) + b1_ref[...].astype(gelu_dtype)
    if approx_gelu:
        # tanh-approx GELU: the transcendental goes to the (otherwise idle)
        # EUP slot instead of a ~20-30-op VALU erf polynomial per element.
        c = math.sqrt(2.0 / math.pi)
        h = 0.5 * h * (1.0 + jnp.tanh(c * (h + 0.044715 * (h * h * h))))
    else:
        # Exact erf GELU (torch.nn.GELU default), kept in f32 for parity.
        hf = h.astype(jnp.float32)
        h = 0.5 * hf * (1.0 + jax.lax.erf(hf * (1.0 / math.sqrt(2.0))))

    # Dropout: identity in inference mode.

    # ---- Linear2 (Hp -> Dp): MXU, f32 accumulate, f32 bias ----
    y = jnp.dot(h.astype(w2_ref.dtype), w2_ref[...],
                preferred_element_type=jnp.float32)
    y = y + b2_ref[...].astype(jnp.float32)                  # (tm, Dp)
    o_ref[...] = y.astype(o_ref.dtype)


# ----------------------------------------------------------------------------
# One-time parameter preprocessing (hoisted out of the per-call path)
# ----------------------------------------------------------------------------
def prepare_ffn_params(gamma, beta, w1, b1, w2, b2, *, matmul_dtype=jnp.bfloat16):
    """Fold the LayerNorm affine into Linear1, zero-pad D/H to lane-dense
    multiples of 128, and cast the MXU operands to `matmul_dtype`.

    Returns (w1p, b1p, w2p, b2p).  Call once; reuse for every forward call.
    """
    D, H = w1.shape
    Dp, Hp = _round_up(D, 128), _round_up(H, 128)
    w1f = w1.astype(jnp.float32)
    w2f = w2.astype(jnp.float32)
    # (xn*gamma + beta) @ W1 + b1  ==  xn @ (gamma*W1) + (beta @ W1 + b1)
    w1_fold = gamma.astype(jnp.float32)[:, None] * w1f
    b1_fold = b1.astype(jnp.float32) + beta.astype(jnp.float32) @ w1f
    w1p = jnp.pad(w1_fold, ((0, Dp - D), (0, Hp - H))).astype(matmul_dtype)
    w2p = jnp.pad(w2f, ((0, Hp - H), (0, Dp - D))).astype(matmul_dtype)
    b1p = jnp.pad(b1_fold.reshape(1, H), ((0, 0), (0, Hp - H)))
    b2p = jnp.pad(b2.astype(jnp.float32).reshape(1, D), ((0, 0), (0, Dp - D)))
    return w1p, b1p, w2p, b2p


# ----------------------------------------------------------------------------
# pallas_call wrapper
# ----------------------------------------------------------------------------
@functools.partial(
    jax.jit,
    static_argnames=("tm", "approx_gelu", "gelu_dtype", "single_buffer_weights"))
def _ffn_impl(x, w1, b1, w2, b2, *, tm, approx_gelu, gelu_dtype,
              single_buffer_weights):
    B, T, D = x.shape
    Dp, Hp = w1.shape
    if Dp != _round_up(D, 128):
        raise ValueError("params were prepared for a different embed_dim")
    M = B * T

    tm_eff = _choose_row_tile(M, tm)
    Mp = _round_up(_round_up(M, 8), tm_eff)

    x2 = x.reshape(M, D)
    if Mp != M or Dp != D:
        # Zero padding: safe through LN (padded lanes masked, rsqrt(eps) finite)
        # and matmuls (padded weight rows/cols are zero); sliced off below.
        x2 = jnp.pad(x2, ((0, Mp - M), (0, Dp - D)))

    grid = (Mp // tm_eff,)

    # Grid-invariant weights are fetched once (constant index_map); single
    # buffering halves their VMEM footprint.
    if single_buffer_weights:
        def w_spec(shape):
            return pl.BlockSpec(shape, lambda i: (0, 0),
                                pipeline_mode=pl.Buffered(1))
    else:
        def w_spec(shape):
            return pl.BlockSpec(shape, lambda i: (0, 0))

    kernel = functools.partial(_ffn_kernel, d_real=D, approx_gelu=approx_gelu,
                               gelu_dtype=gelu_dtype)

    x_bytes = x.dtype.itemsize
    w_bytes = w1.dtype.itemsize
    g_bytes = jnp.dtype(gelu_dtype).itemsize

    # Advisory cost estimate so XLA can schedule/overlap around the call.
    cost = pl.CostEstimate(
        flops=2 * Mp * (Dp * Hp + Hp * Dp),
        transcendentals=Mp * Hp if approx_gelu else 0,
        bytes_accessed=2 * Mp * Dp * x_bytes + (Dp * Hp + Hp * Dp) * w_bytes,
    )

    # Scoped VMEM: actual footprint with margin, capped generation-aware at
    # ~80% of physical per-core VMEM (v7x 64 MiB, v5e/v6e 128 MiB).
    wbuf = 1 if single_buffer_weights else 2
    vmem_needed = (
        2 * 2 * tm_eff * Dp * x_bytes              # x + out blocks, double-buffered
        + wbuf * (Dp * Hp + Hp * Dp) * w_bytes     # W1 + W2
        + 2 * 2 * (Hp + Dp) * 4                    # b1 + b2 (f32)
        + tm_eff * Hp * (4 + g_bytes)              # h f32 acc + gelu-dtype h
        + 2 * tm_eff * Dp * 4                      # xn / y f32 intermediates
    )
    vmem_cap = int(0.8 * _vmem_capacity_bytes())
    vmem_limit = int(min(max(int(1.5 * vmem_needed), 32 * 1024 * 1024), vmem_cap))

    out2 = pl.pallas_call(
        kernel,
        out_shape=jax.ShapeDtypeStruct((Mp, Dp), x.dtype),
        grid_spec=pltpu.PrefetchScalarGridSpec(
            num_scalar_prefetch=0,
            grid=grid,
            in_specs=[
                pl.BlockSpec((tm_eff, Dp), lambda i: (i, 0)),  # x rows
                w_spec((Dp, Hp)),                              # W1 (LN-folded)
                pl.BlockSpec((1, Hp), lambda i: (0, 0)),       # b1 (LN-folded)
                w_spec((Hp, Dp)),                              # W2
                pl.BlockSpec((1, Dp), lambda i: (0, 0)),       # b2
            ],
            out_specs=pl.BlockSpec((tm_eff, Dp), lambda i: (i, 0)),
        ),
        compiler_params=pltpu.CompilerParams(
            dimension_semantics=("parallel",),
            vmem_limit_bytes=vmem_limit),
        cost_estimate=cost,
    )(x2, w1, b1, w2, b2)

    return out2[:M, :D].reshape(B, T, D)


_SINGLE_BUFFER_WEIGHTS = None   # lazily probed: pl.Buffered(1) support


def feed_forward_block(x, params, *, tm=512, approx_gelu=True):
    """FeedForwardBlock forward.  x: (B, T, D); params from prepare_ffn_params.

    tm:          row tile over the flattened (B*T) axis; rounded to MXU-friendly
                 granularity, clamped for tiny inputs, split so large inputs
                 give >= 2 grid steps (v7x second TensorCore).
    approx_gelu: True  -> tanh-approx GELU on the EUP (~1e-3 deviation from
                          torch's exact erf; subdominant to bf16 rounding).
                 False -> exact erf GELU in f32 (bit-parity path).
    """
    global _SINGLE_BUFFER_WEIGHTS
    w1, b1, w2, b2 = params
    use_bf16_gelu = (approx_gelu and w1.dtype == jnp.bfloat16 and _has_bf16_vpu())
    gelu_dtype = jnp.bfloat16 if use_bf16_gelu else jnp.float32
    kw = dict(tm=tm, approx_gelu=approx_gelu, gelu_dtype=gelu_dtype)

    if _SINGLE_BUFFER_WEIGHTS is None:
        try:
            out = jax.block_until_ready(
                _ffn_impl(x, w1, b1, w2, b2, single_buffer_weights=True, **kw))
            _SINGLE_BUFFER_WEIGHTS = True
            return out
        except Exception:
            # pipeline_mode=pl.Buffered(1) not supported on this jax/libtpu;
            # fall back to default double-buffering of the weight blocks.
            _SINGLE_BUFFER_WEIGHTS = False
    return _ffn_impl(x, w1, b1, w2, b2,
                     single_buffer_weights=_SINGLE_BUFFER_WEIGHTS, **kw)


# ----------------------------------------------------------------------------
# Pure-JAX reference (unfused, exact erf) for validation
# ----------------------------------------------------------------------------
def _reference(x, gamma, beta, w1, b1, w2, b2):
    xf = x.astype(jnp.float32)
    mean = jnp.mean(xf, axis=-1, keepdims=True)
    var = jnp.mean((xf - mean) ** 2, axis=-1, keepdims=True)
    xn = (xf - mean) / jnp.sqrt(var + LN_EPS) * gamma + beta
    h = xn @ w1 + b1
    h = 0.5 * h * (1.0 + jax.lax.erf(h / math.sqrt(2.0)))
    y = h @ w2 + b2
    return y.astype(x.dtype)


if __name__ == "__main__":
    # Module defaults: embed_dim=144, expansion=4 (exercises the D=144 -> 256 /
    # H=576 -> 640 lane-dense padding path).  T=9 makes B*T=18 ragged rows.
    B, T, D, EXP = 2, 9, 144, 4
    H = D * EXP

    key = jax.random.PRNGKey(0)
    kx, kg, kb, kw1, kb1, kw2, kb2 = jax.random.split(key, 7)

    x = jax.random.normal(kx, (B, T, D), dtype=jnp.float32)

    # Deterministic synthetic parameters (shapes per nn.LayerNorm / nn.Linear).
    gamma = 1.0 + 0.1 * jax.random.normal(kg, (D,), dtype=jnp.float32)
    beta = 0.1 * jax.random.normal(kb, (D,), dtype=jnp.float32)
    w1 = jax.random.normal(kw1, (D, H), dtype=jnp.float32) * (1.0 / math.sqrt(D))
    b1 = 0.1 * jax.random.normal(kb1, (H,), dtype=jnp.float32)
    w2 = jax.random.normal(kw2, (H, D), dtype=jnp.float32) * (1.0 / math.sqrt(H))
    b2 = 0.1 * jax.random.normal(kb2, (D,), dtype=jnp.float32)

    ref = _reference(x, gamma, beta, w1, b1, w2, b2)

    # 1) Strict path: f32 MXU operands + exact erf GELU, small tile so the
    #    grid has 3 steps and both row padding and D/H padding are exercised.
    params_f32 = prepare_ffn_params(gamma, beta, w1, b1, w2, b2,
                                    matmul_dtype=jnp.float32)
    out_f32 = jax.block_until_ready(
        feed_forward_block(x, params_f32, tm=8, approx_gelu=False))
    assert out_f32.shape == (B, T, D)
    err_f32 = float(jnp.max(jnp.abs(out_f32 - ref)))
    assert err_f32 < 5e-4, f"f32 path mismatch vs reference: {err_f32}"

    # 2) Default perf path: bf16 MXU operands, tanh-approx GELU (EUP), large
    #    (clamped) row tile, single-buffered resident weights.
    params_bf16 = prepare_ffn_params(gamma, beta, w1, b1, w2, b2)
    out = jax.block_until_ready(feed_forward_block(x, params_bf16))
    assert out.shape == (B, T, D)
    err_bf16 = float(jnp.max(jnp.abs(out - ref)))
    assert err_bf16 < 8e-2, f"bf16 path mismatch vs reference: {err_bf16}"

    print("KERNEL_OK")
</pallas_src>

<mosaic_0001>
module attributes {stable_mosaic.version = 11 : i64} {
  func.func @_ffn_kernel(%arg0: i32, %arg1: memref<8x256xf32, #tpu.memory_space<vmem>>, %arg2: memref<256x640xf32, #tpu.memory_space<vmem>>, %arg3: memref<1x640xf32, #tpu.memory_space<vmem>>, %arg4: memref<640x256xf32, #tpu.memory_space<vmem>>, %arg5: memref<1x256xf32, #tpu.memory_space<vmem>>, %arg6: memref<8x256xf32, #tpu.memory_space<vmem>>) attributes {dimension_semantics = [#tpu.dimension_semantics<parallel>], iteration_bounds = array<i64: 3>, scalar_prefetch = 0 : i64, scratch_operands = 0 : i64, tpu.core_type = #tpu.core_type<tc>, window_params = [{transform_indices = @transform_0, window_bounds = array<i64: 8, 256>}, {pipeline_mode = #tpu.pipeline_mode<synchronous>, transform_indices = @transform_1, window_bounds = array<i64: 256, 640>}, {pipeline_mode = #tpu.pipeline_mode<synchronous>, transform_indices = @transform_2, window_bounds = array<i64: 1, 640>}, {pipeline_mode = #tpu.pipeline_mode<synchronous>, transform_indices = @transform_3, window_bounds = array<i64: 640, 256>}, {pipeline_mode = #tpu.pipeline_mode<synchronous>, transform_indices = @transform_4, window_bounds = array<i64: 1, 256>}, {transform_indices = @transform_5, window_bounds = array<i64: 8, 256>}]} {
    %c0 = arith.constant 0 : index
    %c0_0 = arith.constant 0 : index
    %0 = vector.load %arg1[%c0, %c0_0] : memref<8x256xf32, #tpu.memory_space<vmem>>, vector<8x256xf32>
    %cst = arith.constant dense<0.000000e+00> : vector<8xf32>
    %1 = vector.multi_reduction <add>, %0, %cst [1] : vector<8x256xf32> to vector<8xf32>
    %2 = vector.shape_cast %1 : vector<8xf32> to vector<8x1xf32>
    %cst_1 = arith.constant 0.0069444445 : f32
    %3 = vector.broadcast %cst_1 : f32 to vector<8x1xf32>
    %4 = arith.mulf %2, %3 : vector<8x1xf32>
    %5 = vector.broadcast %4 : vector<8x1xf32> to vector<8x256xf32>
    %6 = arith.subf %0, %5 : vector<8x256xf32>
    %7 = tpu.iota {dimensions = array<i32: 1>} : vector<1x256xi32>
    %c144_i32 = arith.constant 144 : i32
    %8 = vector.broadcast %c144_i32 : i32 to vector<1x256xi32>
    %9 = arith.cmpi slt, %7, %8 : vector<1x256xi32>
    %cst_2 = arith.constant 0.000000e+00 : f32
    %10 = vector.shape_cast %9 : vector<1x256xi1> to vector<1x256xi1>
    %11 = vector.broadcast %10 : vector<1x256xi1> to vector<8x256xi1>
    %12 = vector.broadcast %cst_2 : f32 to vector<8x256xf32>
    %13 = arith.select %11, %6, %12 : vector<8x256xi1>, vector<8x256xf32>
    %14 = arith.mulf %13, %13 : vector<8x256xf32>
    %cst_3 = arith.constant dense<0.000000e+00> : vector<8xf32>
    %15 = vector.multi_reduction <add>, %14, %cst_3 [1] : vector<8x256xf32> to vector<8xf32>
    %16 = vector.shape_cast %15 : vector<8xf32> to vector<8x1xf32>
    %cst_4 = arith.constant 0.0069444445 : f32
    %17 = vector.broadcast %cst_4 : f32 to vector<8x1xf32>
    %18 = arith.mulf %16, %17 : vector<8x1xf32>
    %cst_5 = arith.constant 6.100000e-05 : f32
    %19 = vector.broadcast %cst_5 : f32 to vector<8x1xf32>
    %20 = arith.addf %18, %19 : vector<8x1xf32>
    %21 = math.rsqrt %20 : vector<8x1xf32>
    %22 = vector.broadcast %21 : vector<8x1xf32> to vector<8x256xf32>
    %23 = arith.mulf %13, %22 : vector<8x256xf32>
    %c0_6 = arith.constant 0 : index
    %c0_7 = arith.constant 0 : index
    %24 = vector.load %arg2[%c0_6, %c0_7] : memref<256x640xf32, #tpu.memory_space<vmem>>, vector<256x640xf32>
    %cst_8 = arith.constant dense<0.000000e+00> : vector<8x640xf32>
    %25 = tpu.matmul %23, %24, %cst_8 {dimension_numbers = #tpu.dot_dimension_numbers<[1], [0], [0], [1], [0, 0, 1, 1], [], []>} : vector<8x256xf32>, vector<256x640xf32>, vector<8x640xf32> -> vector<8x640xf32>
    %c0_9 = arith.constant 0 : index
    %c0_10 = arith.constant 0 : index
    %26 = vector.load %arg3[%c0_9, %c0_10] : memref<1x640xf32, #tpu.memory_space<vmem>>, vector<1x640xf32>
    %27 = vector.broadcast %26 : vector<1x640xf32> to vector<8x640xf32>
    %28 = arith.addf %25, %27 : vector<8x640xf32>
    %cst_11 = arith.constant 5.000000e-01 : f32
    %29 = vector.broadcast %cst_11 : f32 to vector<8x640xf32>
    %30 = arith.mulf %29, %28 : vector<8x640xf32>
    %cst_12 = arith.constant 0.707106769 : f32
    %31 = vector.broadcast %cst_12 : f32 to vector<8x640xf32>
    %32 = arith.mulf %28, %31 : vector<8x640xf32>
    %33 = math.erf %32 : vector<8x640xf32>
    %cst_13 = arith.constant 1.000000e+00 : f32
    %34 = vector.broadcast %cst_13 : f32 to vector<8x640xf32>
    %35 = arith.addf %34, %33 : vector<8x640xf32>
    %36 = arith.mulf %30, %35 : vector<8x640xf32>
    %c0_14 = arith.constant 0 : index
    %c0_15 = arith.constant 0 : index
    %37 = vector.load %arg4[%c0_14, %c0_15] : memref<640x256xf32, #tpu.memory_space<vmem>>, vector<640x256xf32>
    %cst_16 = arith.constant dense<0.000000e+00> : vector<8x256xf32>
    %38 = tpu.matmul %36, %37, %cst_16 {dimension_numbers = #tpu.dot_dimension_numbers<[1], [0], [0], [1], [0, 0, 1, 1], [], []>} : vector<8x640xf32>, vector<640x256xf32>, vector<8x256xf32> -> vector<8x256xf32>
    %c0_17 = arith.constant 0 : index
    %c0_18 = arith.constant 0 : index
    %39 = vector.load %arg5[%c0_17, %c0_18] : memref<1x256xf32, #tpu.memory_space<vmem>>, vector<1x256xf32>
    %40 = vector.broadcast %39 : vector<1x256xf32> to vector<8x256xf32>
    %41 = arith.addf %38, %40 : vector<8x256xf32>
    %c0_19 = arith.constant 0 : index
    %c0_20 = arith.constant 0 : index
    %42 = vector.load %arg6[%c0_19, %c0_20] : memref<8x256xf32, #tpu.memory_space<vmem>>, vector<8x256xf32>
    tpu.vector_store %arg6[%c0_19, %c0_20], %41 {strides = array<i32>} : memref<8x256xf32, #tpu.memory_space<vmem>>, vector<8x256xf32>,
    return
  }
  func.func @transform_0(%arg0: i32) -> (i32, i32) {
    %c0_i32 = arith.constant 0 : i32
    %c0_i32_0 = arith.constant 0 : i32
    return %arg0, %c0_i32 : i32, i32
  }
  func.func @transform_1(%arg0: i32) -> (i32, i32) {
    %c0_i32 = arith.constant 0 : i32
    %c0_i32_0 = arith.constant 0 : i32
    %c0_i32_1 = arith.constant 0 : i32
    return %c0_i32, %c0_i32_0 : i32, i32
  }
  func.func @transform_2(%arg0: i32) -> (i32, i32) {
    %c0_i32 = arith.constant 0 : i32
    %c0_i32_0 = arith.constant 0 : i32
    %c0_i32_1 = arith.constant 0 : i32
    return %c0_i32, %c0_i32_0 : i32, i32
  }
  func.func @transform_3(%arg0: i32) -> (i32, i32) {
    %c0_i32 = arith.constant 0 : i32
    %c0_i32_0 = arith.constant 0 : i32
    %c0_i32_1 = arith.constant 0 : i32
    return %c0_i32, %c0_i32_0 : i32, i32
  }
  func.func @transform_4(%arg0: i32) -> (i32, i32) {
    %c0_i32 = arith.constant 0 : i32
    %c0_i32_0 = arith.constant 0 : i32
    %c0_i32_1 = arith.constant 0 : i32
    return %c0_i32, %c0_i32_0 : i32, i32
  }
  func.func @transform_5(%arg0: i32) -> (i32, i32) {
    %c0_i32 = arith.constant 0 : i32
    %c0_i32_0 = arith.constant 0 : i32
    return %arg0, %c0_i32 : i32, i32
  }
}

module attributes {stable_mosaic.version = 11 : i64} {
  func.func @_ffn_kernel(%arg0: i32, %arg1: memref<8x256xf32, #tpu.memory_space<vmem>>, %arg2: memref<256x640xf32, #tpu.memory_space<vmem>>, %arg3: memref<1x640xf32, #tpu.memory_space<vmem>>, %arg4: memref<640x256xf32, #tpu.memory_space<vmem>>, %arg5: memref<1x256xf32, #tpu.memory_space<vmem>>, %arg6: memref<8x256xf32, #tpu.memory_space<vmem>>) attributes {dimension_semantics = [#tpu.dimension_semantics<parallel>], iteration_bounds = array<i64: 3>, scalar_prefetch = 0 : i64, scratch_operands = 0 : i64, tpu.core_type = #tpu.core_type<tc>, window_params = [{transform_indices = @transform_0, window_bounds = array<i64: 8, 256>}, {pipeline_mode = #tpu.pipeline_mode<synchronous>, transform_indices = @transform_1, window_bounds = array<i64: 256, 640>}, {pipeline_mode = #tpu.pipeline_mode<synchronous>, transform_indices = @transform_2, window_bounds = array<i64: 1, 640>}, {pipeline_mode = #tpu.pipeline_mode<synchronous>, transform_indices = @transform_3, window_bounds = array<i64: 640, 256>}, {pipeline_mode = #tpu.pipeline_mode<synchronous>, transform_indices = @transform_4, window_bounds = array<i64: 1, 256>}, {transform_indices = @transform_5, window_bounds = array<i64: 8, 256>}]} {
    %c0 = arith.constant 0 : index
    %c0_0 = arith.constant 0 : index
    %0 = vector.load %arg1[%c0, %c0_0] : memref<8x256xf32, #tpu.memory_space<vmem>>, vector<8x256xf32>
    %cst = arith.constant dense<0.000000e+00> : vector<8xf32>
    %1 = vector.multi_reduction <add>, %0, %cst [1] : vector<8x256xf32> to vector<8xf32>
    %2 = vector.shape_cast %1 : vector<8xf32> to vector<8x1xf32>
    %cst_1 = arith.constant 0.0069444445 : f32
    %3 = vector.broadcast %cst_1 : f32 to vector<8x1xf32>
    %4 = arith.mulf %2, %3 : vector<8x1xf32>
    %5 = vector.broadcast %4 : vector<8x1xf32> to vector<8x256xf32>
    %6 = arith.subf %0, %5 : vector<8x256xf32>
    %7 = tpu.iota {dimensions = array<i32: 1>} : vector<1x256xi32>
    %c144_i32 = arith.constant 144 : i32
    %8 = vector.broadcast %c144_i32 : i32 to vector<1x256xi32>
    %9 = arith.cmpi slt, %7, %8 : vector<1x256xi32>
    %cst_2 = arith.constant 0.000000e+00 : f32
    %10 = vector.shape_cast %9 : vector<1x256xi1> to vector<1x256xi1>
    %11 = vector.broadcast %10 : vector<1x256xi1> to vector<8x256xi1>
    %12 = vector.broadcast %cst_2 : f32 to vector<8x256xf32>
    %13 = arith.select %11, %6, %12 : vector<8x256xi1>, vector<8x256xf32>
    %14 = arith.mulf %13, %13 : vector<8x256xf32>
    %cst_3 = arith.constant dense<0.000000e+00> : vector<8xf32>
    %15 = vector.multi_reduction <add>, %14, %cst_3 [1] : vector<8x256xf32> to vector<8xf32>
    %16 = vector.shape_cast %15 : vector<8xf32> to vector<8x1xf32>
    %cst_4 = arith.constant 0.0069444445 : f32
    %17 = vector.broadcast %cst_4 : f32 to vector<8x1xf32>
    %18 = arith.mulf %16, %17 : vector<8x1xf32>
    %cst_5 = arith.constant 6.100000e-05 : f32
    %19 = vector.broadcast %cst_5 : f32 to vector<8x1xf32>
    %20 = arith.addf %18, %19 : vector<8x1xf32>
    %21 = math.rsqrt %20 : vector<8x1xf32>
    %22 = vector.broadcast %21 : vector<8x1xf32> to vector<8x256xf32>
    %23 = arith.mulf %13, %22 : vector<8x256xf32>
    %c0_6 = arith.constant 0 : index
    %c0_7 = arith.constant 0 : index
    %24 = vector.load %arg2[%c0_6, %c0_7] : memref<256x640xf32, #tpu.memory_space<vmem>>, vector<256x640xf32>
    %cst_8 = arith.constant dense<0.000000e+00> : vector<8x640xf32>
    %25 = tpu.matmul %23, %24, %cst_8 {dimension_numbers = #tpu.dot_dimension_numbers<[1], [0], [0], [1], [0, 0, 1, 1], [], []>} : vector<8x256xf32>, vector<256x640xf32>, vector<8x640xf32> -> vector<8x640xf32>
    %c0_9 = arith.constant 0 : index
    %c0_10 = arith.constant 0 : index
    %26 = vector.load %arg3[%c0_9, %c0_10] : memref<1x640xf32, #tpu.memory_space<vmem>>, vector<1x640xf32>
    %27 = vector.broadcast %26 : vector<1x640xf32> to vector<8x640xf32>
    %28 = arith.addf %25, %27 : vector<8x640xf32>
    %cst_11 = arith.constant 5.000000e-01 : f32
    %29 = vector.broadcast %cst_11 : f32 to vector<8x640xf32>
    %30 = arith.mulf %29, %28 : vector<8x640xf32>
    %cst_12 = arith.constant 0.707106769 : f32
    %31 = vector.broadcast %cst_12 : f32 to vector<8x640xf32>
    %32 = arith.mulf %28, %31 : vector<8x640xf32>
    %33 = math.erf %32 : vector<8x640xf32>
    %cst_13 = arith.constant 1.000000e+00 : f32
    %34 = vector.broadcast %cst_13 : f32 to vector<8x640xf32>
    %35 = arith.addf %34, %33 : vector<8x640xf32>
    %36 = arith.mulf %30, %35 : vector<8x640xf32>
    %c0_14 = arith.constant 0 : index
    %c0_15 = arith.constant 0 : index
    %37 = vector.load %arg4[%c0_14, %c0_15] : memref<640x256xf32, #tpu.memory_space<vmem>>, vector<640x256xf32>
    %cst_16 = arith.constant dense<0.000000e+00> : vector<8x256xf32>
    %38 = tpu.matmul %36, %37, %cst_16 {dimension_numbers = #tpu.dot_dimension_numbers<[1], [0], [0], [1], [0, 0, 1, 1], [], []>} : vector<8x640xf32>, vector<640x256xf32>, vector<8x256xf32> -> vector<8x256xf32>
    %c0_17 = arith.constant 0 : index
    %c0_18 = arith.constant 0 : index
    %39 = vector.load %arg5[%c0_17, %c0_18] : memref<1x256xf32, #tpu.memory_space<vmem>>, vector<1x256xf32>
    %40 = vector.broadcast %39 : vector<1x256xf32> to vector<8x256xf32>
    %41 = arith.addf %38, %40 : vector<8x256xf32>
    %c0_19 = arith.constant 0 : index
    %c0_20 = arith.constant 0 : index
    %42 = vector.load %arg6[%c0_19, %c0_20] : memref<8x256xf32, #tpu.memory_space<vmem>>, vector<8x256xf32>
    tpu.vector_store %arg6[%c0_19, %c0_20], %41 {strides = array<i32>} : memref<8x256xf32, #tpu.memory_space<vmem>>, vector<8x256xf32>,
    return
  }
  func.func @transform_0(%arg0: i32) -> (i32, i32) {
    %c0_i32 = arith.constant 0 : i32
    %c0_i32_0 = arith.constant 0 : i32
    return %arg0, %c0_i32 : i32, i32
  }
  func.func @transform_1(%arg0: i32) -> (i32, i32) {
    %c0_i32 = arith.constant 0 : i32
    %c0_i32_0 = arith.constant 0 : i32
    %c0_i32_1 = arith.constant 0 : i32
    return %c0_i32, %c0_i32_0 : i32, i32
  }
  func.func @transform_2(%arg0: i32) -> (i32, i32) {
    %c0_i32 = arith.constant 0 : i32
    %c0_i32_0 = arith.constant 0 : i32
    %c0_i32_1 = arith.constant 0 : i32
    return %c0_i32, %c0_i32_0 : i32, i32
  }
  func.func @transform_3(%arg0: i32) -> (i32, i32) {
    %c0_i32 = arith.constant 0 : i32
    %c0_i32_0 = arith.constant 0 : i32
    %c0_i32_1 = arith.constant 0 : i32
    return %c0_i32, %c0_i32_0 : i32, i32
  }
  func.func @transform_4(%arg0: i32) -> (i32, i32) {
    %c0_i32 = arith.constant 0 : i32
    %c0_i32_0 = arith.constant 0 : i32
    %c0_i32_1 = arith.constant 0 : i32
    return %c0_i32, %c0_i32_0 : i32, i32
  }
  func.func @transform_5(%arg0: i32) -> (i32, i32) {
    %c0_i32 = arith.constant 0 : i32
    %c0_i32_0 = arith.constant 0 : i32
    return %arg0, %c0_i32 : i32, i32
  }
}

</mosaic_0001>

<bundles_post_ra>
// kernel: _ffn_impl.1
= control target key start
LH: loop header
LB: loop body
LE: loop exit
PB: predicated region body
PF: predicated region fallthrough
CT: control target
= control target key end

     0   :  { %10 = vsyncpa [#allocation3], 0  ;;  %s1774_s0 = inlined_call_operand.vmem [shape: f32[24,256], index: 0, kind: input, shape index: {}]   ;;  %s1775_s1 = inlined_call_operand.hbm [shape: f32[256,640], index: 1, kind: input, shape index: {}]   ;;  %s1776_s2 = inlined_call_operand.vmem [shape: f32[1,640], index: 2, kind: input, shape index: {}]   ;;  %s1777_s3 = inlined_call_operand.hbm [shape: f32[640,256], index: 3, kind: input, shape index: {}]   ;;  %s1778_s4 = inlined_call_operand.vmem [shape: f32[1,256], index: 4, kind: input, shape index: {}]   ;;  %s1779_s5 = inlined_call_operand.vmem [shape: f32[24,256], index: 5, kind: output, shape index: {}]  }
   0x1   :  { %11 = vsyncpa [#allocation5], 0  ;;  %s1513_s18 = smov 0  }
   0x2 LB: > { %s169_s21 = sshll.u32 %s1775_s1, 4  ;;  %s1334_s22 = sadd.s32 4294967295, %s1475_s18   ;;  %s1475_s18 = sphi %s1513_s18, %s17_s18   ;;  %s170_s21 = int_to_ptr.hbm [resolvable:$true] %s169_s21 }
   0x3   : > { %p1336_p0 = scmp.ge.s32.totalorder %s1475_s18, 1  ;;  %p158_p1 = scmp.lt.s32.totalorder %s1475_s18, 4 }
   0x4   : > { %p1371_p2 = scmp.eq.s32.totalorder %s1334_s22, 0  ;;  %s1477_s24 = smov [#allocation2]  }
   0x5   : > { %p1524_p3 = pnand %p1336_p0, %p158_p1  ;;  %s171_s25 = sshll.u32 %s1477_s24, 4  ;;  %s172_s25 = int_to_ptr.vmem [resolvable:$true] %s171_s25 }
   0x6   : > { %s186_s28 = sshll.u32 %s1777_s3, 4  ;;  %s1478_s29 = smov [#allocation4]   ;;  %s187_s28 = int_to_ptr.hbm [resolvable:$true] %s186_s28 }
   0x7   : > { %p1364_p4 = pneg %p1524_p3  ;;  %s188_s30 = sshll.u32 %s1478_s29, 4  ;;  %s189_s30 = int_to_ptr.vmem [resolvable:$true] %s188_s30 }
   0x8   : > { %s1479_s6 = smov 640   ;;  %s1480_s7 = smov 40  }
   0x9   : > { %p1365_p5 = pnand %p1371_p2, %p1364_p4  ;;  %s1481_s8 = smov 256  }
   0xa   : > { %s1482_s9 = smov 16   ;;  %215 = sbr.rel (%p1524_p3) target bundleno = 653 (0x28d), region = 40 }
   0xb   : > { %1367 = dma.hbm_to_vmem [thread:$0]  (!%p1365_p5), %s170_s21, 20480, %s172_s25, [#allocation3], %s1479_s6, %s1479_s6, %s1480_s7  }
   0xc   : > { %1370 = dma.hbm_to_vmem [thread:$0]  (!%p1365_p5), %s187_s28, 20480, %s189_s30, [#allocation5], %s1481_s8, %s1481_s8, %s1482_s9  }
   0xf   : > { %1466 = dma.done.wait (%p1371_p2), [#allocation3], 20480  }
  0x10   : > { %1468 = vsyncadd (%p1371_p2), [#allocation3], 4294946816 }
  0x11   : > { %1470 = dma.done.wait (%p1371_p2), [#allocation5], 20480  }
  0x12   : > { %1472 = vsyncadd (%p1371_p2), [#allocation5], 4294946816  ;;  %p249_p6 = scmp.lt.s32.totalorder %s1334_s22, 2  ;;  %v372_v3 = vld [vmem:[#allocation2 + $0x258] sm:$0xff]  ;;  %v367_v5 = vld [vmem:[#allocation2 + $0x230] sm:$0xff]  ;;  %v267_v29 = vlaneseq }
  0x13   : > { %v452_v4 = vld [vmem:[#allocation2 + $0x4d8] sm:$0xff]  ;;  %469 = vmatpush.msra.mxu0 %v372_v3  ;;  %v447_v6 = vld [vmem:[#allocation2 + $0x4b0] sm:$0xff]  ;;  %v362_v7 = vld [vmem:[#allocation2 + $0x208] sm:$0xff] }
  0x14   : > { %s1784_s22 = smov (!%p249_p6, %s1334_s22), 2  ;;  %489 = vmatpush.msra.mxu1 %v452_v4  ;;  %v442_v8 = vld [vmem:[#allocation2 + $0x488] sm:$0xff]  ;;  %v373_v9 = vld [vmem:[#allocation2 + $0x260] sm:$0xff]  ;;  %v368_v13 = vld [vmem:[#allocation2 + $0x238] sm:$0xff]  ;;  %v268_v38 = vand.u32 127, %v267_v29 }
  0x15   : > { %s1354_s10 = sshll.u32 %s1784_s22, 4  ;;  %470 = vmatpush.msra.mxu0 %v367_v5  ;;  %v453_v10 = vld [vmem:[#allocation2 + $0x4e0] sm:$0xff]  ;;  %509 = vmatpush.msra.mxu2 %v373_v9  ;;  %v352_v14 = vld [vmem:[#allocation2 + $0x1b8] sm:$0xff]  ;;  %v363_v17 = vld [vmem:[#allocation2 + $0x210] sm:$0xff] }
  0x16   : > { %s253_s13 = scalar_lea.vmem %s1774_s0, %s1354_s10  ;;  %490 = vmatpush.msra.mxu1 %v447_v6  ;;  %v357_v11 = vld [vmem:[#allocation2 + $0x1e0] sm:$0xff]  ;;  %529 = vmatpush.msra.mxu3 %v453_v10  ;;  %v448_v15 = vld [vmem:[#allocation2 + $0x4b8] sm:$0xff]  ;;  %v443_v18 = vld [vmem:[#allocation2 + $0x490] sm:$0xff]  ;;  %v269_v47 = vadd.s32 128, %v268_v38  ;;  %s258_s21 = scalar_lea.vmem %s1779_s5, %s1354_s10 }
  0x17   : > { %v1548_v0 = vld [vmem:[%s253_s13] sm:$0xff]  ;;  %v1550_v1 = vld [vmem:[%s253_s13 + $0x8] sm:$0xff]  ;;  %471 = vmatpush.msra.mxu0 %v362_v7  ;;  %v432_v16 = vld [vmem:[#allocation2 + $0x438] sm:$0xff]  ;;  %510 = vmatpush.msra.mxu2 %v368_v13 }
  0x18   : > { %v261_v2 = vadd.f32 %v1550_v1, %v1548_v0  ;;  %v437_v12 = vld [vmem:[#allocation2 + $0x460] sm:$0xff]  ;;  %491 = vmatpush.msra.mxu1 %v442_v8  ;;  %530 = vmatpush.msra.mxu3 %v448_v15  ;;  %v358_v19 = vld [vmem:[#allocation2 + $0x1e8] sm:$0xff]  ;;  %v347_v21 = vld [vmem:[#allocation2 + $0x190] sm:$0xff]  ;;  %vm271_vm0 = vcmp.lt.s32.totalorder %v269_v47, 144 }
  0x19   : > { %472 = vmatpush.msra.mxu0 %v357_v11  ;;  %v438_v20 = vld [vmem:[#allocation2 + $0x468] sm:$0xff]  ;;  %v427_v22 = vld [vmem:[#allocation2 + $0x410] sm:$0xff]  ;;  %511 = vmatpush.msra.mxu2 %v363_v17  ;;  %v353_v23 = vld [vmem:[#allocation2 + $0x1c0] sm:$0xff] }
  0x1a   : > { %262 = vadd.xlane.f32.xlu0 %v261_v2  ;;  %492 = vmatpush.msra.mxu1 %v437_v12  ;;  %v433_v24 = vld [vmem:[#allocation2 + $0x440] sm:$0xff]  ;;  %v342_v25 = vld [vmem:[#allocation2 + $0x168] sm:$0xff]  ;;  %v348_v27 = vld [vmem:[#allocation2 + $0x198] sm:$0xff] }
  0x1b   : > { %531 = vmatpush.msra.mxu3 %v443_v18  ;;  %473 = vmatpush.msra.mxu0 %v352_v14  ;;  %v422_v26 = vld [vmem:[#allocation2 + $0x3e8] sm:$0xff]  ;;  %v428_v28 = vld [vmem:[#allocation2 + $0x418] sm:$0xff]  ;;  %v337_v30 = vld [vmem:[#allocation2 + $0x140] sm:$0xff] }
  0x1c   : > { %493 = vmatpush.msra.mxu1 %v432_v16  ;;  %512 = vmatpush.msra.mxu2 %v358_v19  ;;  %v417_v31 = vld [vmem:[#allocation2 + $0x3c0] sm:$0xff]  ;;  %v343_v32 = vld [vmem:[#allocation2 + $0x170] sm:$0xff]  ;;  %v332_v34 = vld [vmem:[#allocation2 + $0x118] sm:$0xff] }
  0x1d   : > { %532 = vmatpush.msra.mxu3 %v438_v20  ;;  %474 = vmatpush.msra.mxu0 %v347_v21  ;;  %v423_v33 = vld [vmem:[#allocation2 + $0x3f0] sm:$0xff]  ;;  %v412_v35 = vld [vmem:[#allocation2 + $0x398] sm:$0xff]  ;;  %v338_v36 = vld [vmem:[#allocation2 + $0x148] sm:$0xff] }
  0x1e   : > { %494 = vmatpush.msra.mxu1 %v427_v22  ;;  %513 = vmatpush.msra.mxu2 %v353_v23  ;;  %v418_v37 = vld [vmem:[#allocation2 + $0x3c8] sm:$0xff]  ;;  %v327_v39 = vld [vmem:[#allocation2 + $0xf0] sm:$0xff]  ;;  %v333_v41 = vld [vmem:[#allocation2 + $0x120] sm:$0xff] }
  0x1f   : > { %533 = vmatpush.msra.mxu3 %v433_v24  ;;  %475 = vmatpush.msra.mxu0 %v342_v25  ;;  %v407_v40 = vld [vmem:[#allocation2 + $0x370] sm:$0xff]  ;;  %v413_v42 = vld [vmem:[#allocation2 + $0x3a0] sm:$0xff]  ;;  %v322_v43 = vld [vmem:[#allocation2 + $0xc8] sm:$0xff] }
  0x20   : > { %495 = vmatpush.msra.mxu1 %v422_v26  ;;  %514 = vmatpush.msra.mxu2 %v348_v27  ;;  %v402_v44 = vld [vmem:[#allocation2 + $0x348] sm:$0xff]  ;;  %v328_v45 = vld [vmem:[#allocation2 + $0xf8] sm:$0xff]  ;;  %v317_v48 = vld [vmem:[#allocation2 + $0xa0] sm:$0xff] }
  0x21   : > { %534 = vmatpush.msra.mxu3 %v428_v28  ;;  %476 = vmatpush.msra.mxu0 %v337_v30  ;;  %v408_v46 = vld [vmem:[#allocation2 + $0x378] sm:$0xff]  ;;  %v397_v49 = vld [vmem:[#allocation2 + $0x320] sm:$0xff]  ;;  %v323_v50 = vld [vmem:[#allocation2 + $0xd0] sm:$0xff] }
  0x22   : > { %496 = vmatpush.msra.mxu1 %v417_v31  ;;  %515 = vmatpush.msra.mxu2 %v343_v32  ;;  %v403_v51 = vld [vmem:[#allocation2 + $0x350] sm:$0xff]  ;;  %v312_v53 = vld [vmem:[#allocation2 + $0x78] sm:$0xff]  ;;  %v318_v56 = vld [vmem:[#allocation2 + $0xa8] sm:$0xff] }
  0x23   : > { %535 = vmatpush.msra.mxu3 %v423_v33  ;;  %477 = vmatpush.msra.mxu0 %v332_v34  ;;  %v392_v54 = vld [vmem:[#allocation2 + $0x2f8] sm:$0xff]  ;;  %v398_v57 = vld [vmem:[#allocation2 + $0x328] sm:$0xff]  ;;  %v307_v58 = vld [vmem:[#allocation2 + $0x50] sm:$0xff] }
  0x24   : > { %497 = vmatpush.msra.mxu1 %v412_v35  ;;  %516 = vmatpush.msra.mxu2 %v338_v36  ;;  %v387_v59 = vld [vmem:[#allocation2 + $0x2d0] sm:$0xff]  ;;  %v313_v62 = vld [vmem:[#allocation2 + $0x80] sm:$0xff]  ;;  %v302_v2 = vld [vmem:[#allocation2 + $0x28] sm:$0xff] }
  0x25   : > { %536 = vmatpush.msra.mxu3 %v418_v37  ;;  %478 = vmatpush.msra.mxu0 %v327_v39  ;;  %v393_v63 = vld [vmem:[#allocation2 + $0x300] sm:$0xff]  ;;  %v382_v3 = vld [vmem:[#allocation2 + $0x2a8] sm:$0xff]  ;;  %v308_v6 = vld [vmem:[#allocation2 + $0x58] sm:$0xff] }
  0x26   : > { %498 = vmatpush.msra.mxu1 %v407_v40  ;;  %517 = vmatpush.msra.mxu2 %v333_v41  ;;  %v297_v7 = vld [vmem:[#allocation2] sm:$0xff]  ;;  %v374_v9 = vld [vmem:[#allocation2 + $0x268] sm:$0xff]  ;;  %v303_v12 = vld [vmem:[#allocation2 + $0x30] sm:$0xff] }
  0x27   : > { %537 = vmatpush.msra.mxu3 %v413_v42  ;;  %479 = vmatpush.msra.mxu0 %v322_v43  ;;  %v377_v8 = vld [vmem:[#allocation2 + $0x280] sm:$0xff]  ;;  %v454_v11 = vld [vmem:[#allocation2 + $0x4e8] sm:$0xff]  ;;  %v383_v14 = vld [vmem:[#allocation2 + $0x2b0] sm:$0xff] }
  0x28   : > { %499 = vmatpush.msra.mxu1 %v402_v44  ;;  %518 = vmatpush.msra.mxu2 %v328_v45  ;;  %v369_v13 = vld [vmem:[#allocation2 + $0x240] sm:$0xff]  ;;  %v364_v16 = vld [vmem:[#allocation2 + $0x218] sm:$0xff]  ;;  %v359_v18 = vld [vmem:[#allocation2 + $0x1f0] sm:$0xff] }
  0x29   : > { %538 = vmatpush.msra.mxu3 %v408_v46  ;;  %480 = vmatpush.msra.mxu0 %v317_v48  ;;  %v449_v15 = vld [vmem:[#allocation2 + $0x4c0] sm:$0xff]  ;;  %v444_v17 = vld [vmem:[#allocation2 + $0x498] sm:$0xff]  ;;  %v439_v19 = vld [vmem:[#allocation2 + $0x470] sm:$0xff] }
  0x2a   : > { %500 = vmatpush.msra.mxu1 %v397_v49  ;;  %519 = vmatpush.msra.mxu2 %v323_v50  ;;  %v298_v20 = vld [vmem:[#allocation2 + $0x8] sm:$0xff]  ;;  %v375_v24 = vld [vmem:[#allocation2 + $0x270] sm:$0xff]  ;;  %v349_v26 = vld [vmem:[#allocation2 + $0x1a0] sm:$0xff] }
  0x2b   : > { %539 = vmatpush.msra.mxu3 %v403_v51  ;;  %481 = vmatpush.msra.mxu0 %v312_v53  ;;  %v378_v21 = vld [vmem:[#allocation2 + $0x288] sm:$0xff]  ;;  %v455_v25 = vld [vmem:[#allocation2 + $0x4f0] sm:$0xff]  ;;  %v429_v27 = vld [vmem:[#allocation2 + $0x420] sm:$0xff] }
  0x2c   : > { %501 = vmatpush.msra.mxu1 %v392_v54  ;;  %520 = vmatpush.msra.mxu2 %v318_v56  ;;  %v354_v22 = vld [vmem:[#allocation2 + $0x1c8] sm:$0xff]  ;;  %v344_v30 = vld [vmem:[#allocation2 + $0x178] sm:$0xff]  ;;  %v365_v32 = vld [vmem:[#allocation2 + $0x220] sm:$0xff] }
  0x2d   : > { %540 = vmatpush.msra.mxu3 %v398_v57  ;;  %482 = vmatpush.msra.mxu0 %v307_v58  ;;  %v434_v23 = vld [vmem:[#allocation2 + $0x448] sm:$0xff]  ;;  %v424_v31 = vld [vmem:[#allocation2 + $0x3f8] sm:$0xff]  ;;  %v445_v33 = vld [vmem:[#allocation2 + $0x4a0] sm:$0xff] }
  0x2e   : > { %502 = vmatpush.msra.mxu1 %v387_v59  ;;  %521 = vmatpush.msra.mxu2 %v313_v62  ;;  %v370_v28 = vld [vmem:[#allocation2 + $0x248] sm:$0xff]  ;;  %v339_v34 = vld [vmem:[#allocation2 + $0x150] sm:$0xff]  ;;  %v360_v36 = vld [vmem:[#allocation2 + $0x1f8] sm:$0xff] }
  0x2f   : > { %541 = vmatpush.msra.mxu3 %v393_v63  ;;  %483 = vmatpush.msra.mxu0 %v302_v2  ;;  %v450_v29 = vld [vmem:[#allocation2 + $0x4c8] sm:$0xff]  ;;  %v419_v35 = vld [vmem:[#allocation2 + $0x3d0] sm:$0xff]  ;;  %v440_v37 = vld [vmem:[#allocation2 + $0x478] sm:$0xff] }
  0x30   : > { %503 = vmatpush.msra.mxu1 %v382_v3  ;;  %522 = vmatpush.msra.mxu2 %v308_v6  ;;  %v334_v38 = vld [vmem:[#allocation2 + $0x128] sm:$0xff]  ;;  %v355_v40 = vld [vmem:[#allocation2 + $0x1d0] sm:$0xff]  ;;  %v329_v42 = vld [vmem:[#allocation2 + $0x100] sm:$0xff] }
  0x31   : > { %484 = vmatpush.msra.mxu0 %v297_v7  ;;  %v414_v39 = vld [vmem:[#allocation2 + $0x3a8] sm:$0xff]  ;;  %v435_v41 = vld [vmem:[#allocation2 + $0x450] sm:$0xff]  ;;  %v409_v43 = vld [vmem:[#allocation2 + $0x380] sm:$0xff] }
  0x32   : > { %504 = vmatpush.msra.mxu1 %v377_v8  ;;  %523 = vmatpush.msra.mxu2 %v303_v12  ;;  %v350_v44 = vld [vmem:[#allocation2 + $0x1a8] sm:$0xff]  ;;  %v324_v46 = vld [vmem:[#allocation2 + $0xd8] sm:$0xff]  ;;  %v345_v48 = vld [vmem:[#allocation2 + $0x180] sm:$0xff] }
  0x33   : > { %549 = vmatpush.msrb.mxu0 %v374_v9  ;;  %v430_v45 = vld [vmem:[#allocation2 + $0x428] sm:$0xff]  ;;  %v404_v47 = vld [vmem:[#allocation2 + $0x358] sm:$0xff]  ;;  %v425_v49 = vld [vmem:[#allocation2 + $0x400] sm:$0xff] }
  0x34   : > { %569 = vmatpush.msrb.mxu1 %v454_v11  ;;  %524 = vmatpush.msra.mxu2 %v298_v20  ;;  %v319_v50 = vld [vmem:[#allocation2 + $0xb0] sm:$0xff]  ;;  %v420_v53 = vld [vmem:[#allocation2 + $0x3d8] sm:$0xff]  ;;  %v314_v54 = vld [vmem:[#allocation2 + $0x88] sm:$0xff] }
  0x35   : > { %550 = vmatpush.msrb.mxu0 %v369_v13  ;;  %v399_v51 = vld [vmem:[#allocation2 + $0x330] sm:$0xff]  ;;  %v309_v58 = vld [vmem:[#allocation2 + $0x60] sm:$0xff]  ;;  %v410_v62 = vld [vmem:[#allocation2 + $0x388] sm:$0xff] }
  0x36   : > { %570 = vmatpush.msrb.mxu1 %v449_v15  ;;  %589 = vmatpush.msrb.mxu2 %v375_v24  ;;  %v335_v56 = vld [vmem:[#allocation2 + $0x130] sm:$0xff]  ;;  %v389_v59 = vld [vmem:[#allocation2 + $0x2e0] sm:$0xff]  ;;  %v304_v63 = vld [vmem:[#allocation2 + $0x38] sm:$0xff] }
  0x37   : > { %551 = vmatpush.msrb.mxu0 %v364_v16  ;;  %v415_v57 = vld [vmem:[#allocation2 + $0x3b0] sm:$0xff]  ;;  %v384_v2 = vld [vmem:[#allocation2 + $0x2b8] sm:$0xff]  ;;  %v325_v3 = vld [vmem:[#allocation2 + $0xe0] sm:$0xff] }
  0x38   : > { %571 = vmatpush.msrb.mxu1 %v444_v17  ;;  %590 = vmatpush.msrb.mxu2 %v370_v28  ;;  %v299_v6 = vld [vmem:[#allocation2 + $0x10] sm:$0xff]  ;;  %v400_v7 = vld [vmem:[#allocation2 + $0x338] sm:$0xff]  ;;  %v390_v11 = vld [vmem:[#allocation2 + $0x2e8] sm:$0xff] }
  0x39   : > { %552 = vmatpush.msrb.mxu0 %v359_v18  ;;  %v315_v8 = vld [vmem:[#allocation2 + $0x90] sm:$0xff]  ;;  %v305_v12 = vld [vmem:[#allocation2 + $0x40] sm:$0xff]  ;;  %v300_v16 = vld [vmem:[#allocation2 + $0x18] sm:$0xff] }
  0x3a   : > { %572 = vmatpush.msrb.mxu1 %v439_v19  ;;  %591 = vmatpush.msrb.mxu2 %v365_v32  ;;  %v395_v9 = vld [vmem:[#allocation2 + $0x310] sm:$0xff]  ;;  %v385_v13 = vld [vmem:[#allocation2 + $0x2c0] sm:$0xff]  ;;  %v380_v17 = vld [vmem:[#allocation2 + $0x298] sm:$0xff] }
  0x3b   : > { %553 = vmatpush.msrb.mxu0 %v354_v22  ;;  %v376_v28 = vld [vmem:[#allocation2 + $0x278] sm:$0xff]  ;;  %v366_v32 = vld [vmem:[#allocation2 + $0x228] sm:$0xff] }
  0x3c   : > { %573 = vmatpush.msrb.mxu1 %v434_v23  ;;  %592 = vmatpush.msrb.mxu2 %v360_v36  ;;  %v351_v36 = vld [vmem:[#allocation2 + $0x1b0] sm:$0xff] }
  0x3d   : > { %554 = vmatpush.msrb.mxu0 %v349_v26 }
  0x3e   : > { %574 = vmatpush.msrb.mxu1 %v429_v27  ;;  %593 = vmatpush.msrb.mxu2 %v355_v40  ;;  %v341_v40 = vld [vmem:[#allocation2 + $0x160] sm:$0xff] }
  0x3f   : > { %555 = vmatpush.msrb.mxu0 %v344_v30  ;;  %v371_v30 = vld [vmem:[#allocation2 + $0x250] sm:$0xff] }
  0x40   : > { %575 = vmatpush.msrb.mxu1 %v424_v31  ;;  %594 = vmatpush.msrb.mxu2 %v350_v44  ;;  %v451_v31 = vld [vmem:[#allocation2 + $0x4d0] sm:$0xff] }
  0x41   : > { %556 = vmatpush.msrb.mxu0 %v339_v34  ;;  %v356_v34 = vld [vmem:[#allocation2 + $0x1d8] sm:$0xff]  ;;  %v331_v44 = vld [vmem:[#allocation2 + $0x110] sm:$0xff] }
  0x42   : > { %576 = vmatpush.msrb.mxu1 %v419_v35  ;;  %595 = vmatpush.msrb.mxu2 %v345_v48  ;;  %v436_v35 = vld [vmem:[#allocation2 + $0x458] sm:$0xff]  ;;  %v321_v48 = vld [vmem:[#allocation2 + $0xc0] sm:$0xff] }
  0x43   : > { %557 = vmatpush.msrb.mxu0 %v334_v38  ;;  %v346_v38 = vld [vmem:[#allocation2 + $0x188] sm:$0xff] }
  0x44   : > { %577 = vmatpush.msrb.mxu1 %v414_v39  ;;  %v426_v39 = vld [vmem:[#allocation2 + $0x408] sm:$0xff] }
  0x45   : > { %558 = vmatpush.msrb.mxu0 %v329_v42  ;;  %v336_v42 = vld [vmem:[#allocation2 + $0x138] sm:$0xff] }
  0x46   : > { %578 = vmatpush.msrb.mxu1 %v409_v43  ;;  %v416_v43 = vld [vmem:[#allocation2 + $0x3b8] sm:$0xff] }
  0x47   : > { %559 = vmatpush.msrb.mxu0 %v324_v46  ;;  %v326_v46 = vld [vmem:[#allocation2 + $0xe8] sm:$0xff] }
  0x48   : > { %579 = vmatpush.msrb.mxu1 %v404_v47  ;;  %v406_v47 = vld [vmem:[#allocation2 + $0x368] sm:$0xff] }
  0x49   : > { %560 = vmatpush.msrb.mxu0 %v319_v50  ;;  %v316_v50 = vld [vmem:[#allocation2 + $0x98] sm:$0xff] }
  0x4a   : > { %580 = vmatpush.msrb.mxu1 %v399_v51  ;;  %v396_v51 = vld [vmem:[#allocation2 + $0x318] sm:$0xff] }
  0x4b   : > { %561 = vmatpush.msrb.mxu0 %v314_v54  ;;  %v306_v54 = vld [vmem:[#allocation2 + $0x48] sm:$0xff] }
  0x4d   : > { %562 = vmatpush.msrb.mxu0 %v309_v58  ;;  %v951_v58 = vld [vmem:[#allocation4 + $0x1f0] sm:$0xff] }
  0x4f   : > { %563 = vmatpush.msrb.mxu0 %v304_v63  ;;  %v947_v63 = vld [vmem:[#allocation4 + $0x1d0] sm:$0xff] }
  0x51   : > { %564 = vmatpush.msrb.mxu0 %v299_v6  ;;  %v943_v6 = vld [vmem:[#allocation4 + $0x1b0] sm:$0xff] }
  0x8d   : > { %v263_v52 = vpop.xlane.xlu0 %262 }
  0x8e   : > { %v264_v55 = vmul.f32 0.0069444445, %v263_v52  ;;  %v340_v52 = vld [vmem:[#allocation2 + $0x158] sm:$0xff] }
  0x8f   : > { %596 = vmatpush.msrb.mxu2 %v340_v52  ;;  %v311_v52 = vld [vmem:[#allocation2 + $0x70] sm:$0xff] }
  0x90   : > { %v1555_v60 = vsub.f32 %v1548_v0, %v264_v55  ;;  %v266_v61 = vsub.f32 %v1550_v1, %v264_v55  ;;  %v388_v0 = vld [vmem:[#allocation2 + $0x2d8] sm:$0xff]  ;;  %v394_v55 = vld [vmem:[#allocation2 + $0x308] sm:$0xff] }
  0x91   : > { %542 = vmatpush.msra.mxu3 %v388_v0  ;;  %581 = vmatpush.msrb.mxu1 %v394_v55  ;;  %v379_v0 = vld [vmem:[#allocation2 + $0x290] sm:$0xff]  ;;  %v386_v55 = vld [vmem:[#allocation2 + $0x2c8] sm:$0xff] }
  0x92   : > { %v1558_v4 = vsel %vm271_vm0, %v266_v61, 0.0  ;;  %v278_v5 = vmul.f32 %v1555_v60, %v1555_v60  ;;  %597 = vmatpush.msrb.mxu2 %v335_v56  ;;  %v330_v61 = vld [vmem:[#allocation2 + $0x108] sm:$0xff]  ;;  %v301_v56 = vld [vmem:[#allocation2 + $0x20] sm:$0xff] }
  0x93   : > { %v279_v1 = vmul.f32 %v1558_v4, %v1558_v4  ;;  %543 = vmatpush.msra.mxu3 %v383_v14  ;;  %582 = vmatpush.msrb.mxu1 %v389_v59  ;;  %v919_v59 = vld [vmem:[#allocation4 + $0xf0] sm:$0xff] }
  0x94   : > { %598 = vmatpush.msrb.mxu2 %v330_v61  ;;  %v949_v61 = vld [vmem:[#allocation4 + $0x1e0] sm:$0xff] }
  0x95   : > { %v280_v10 = vadd.f32 %v279_v1, %v278_v5  ;;  %544 = vmatpush.msra.mxu3 %v378_v21  ;;  %583 = vmatpush.msrb.mxu1 %v384_v2  ;;  %v405_v5 = vld [vmem:[#allocation2 + $0x360] sm:$0xff]  ;;  %v320_v1 = vld [vmem:[#allocation2 + $0xb8] sm:$0xff]  ;;  %v915_v2 = vld [vmem:[#allocation4 + $0xd0] sm:$0xff] }
  0x96   : > { %599 = vmatpush.msrb.mxu2 %v325_v3  ;;  %v945_v3 = vld [vmem:[#allocation4 + $0x1c0] sm:$0xff] }
  0x97   : > { %281 = vadd.xlane.f32.xlu0 %v280_v10  ;;  %609 = vmatpush.msrb.mxu3 %v455_v25  ;;  %v310_v10 = vld [vmem:[#allocation2 + $0x68] sm:$0xff] }
  0x98   : > { %584 = vmatpush.msrb.mxu1 %v379_v0  ;;  %600 = vmatpush.msrb.mxu2 %v320_v1  ;;  %v911_v0 = vld [vmem:[#allocation4 + $0xb0] sm:$0xff]  ;;  %v941_v1 = vld [vmem:[#allocation4 + $0x1a0] sm:$0xff] }
  0x99   : > { %610 = vmatpush.msrb.mxu3 %v450_v29  ;;  %v456_v29 = vld [vmem:[#allocation2 + $0x4f8] sm:$0xff] }
  0x9a   : > { %601 = vmatpush.msrb.mxu2 %v315_v8  ;;  %v909_v8 = vld [vmem:[#allocation4 + $0xa0] sm:$0xff] }
  0x9b   : > { %611 = vmatpush.msrb.mxu3 %v445_v33  ;;  %v441_v33 = vld [vmem:[#allocation2 + $0x480] sm:$0xff] }
  0x9c   : > { %602 = vmatpush.msrb.mxu2 %v310_v10  ;;  %v981_v10 = vld [vmem:[#allocation4 + $0x2e0] sm:$0xff] }
  0x9d   : > { %612 = vmatpush.msrb.mxu3 %v440_v37  ;;  %v431_v37 = vld [vmem:[#allocation2 + $0x430] sm:$0xff] }
  0x9e   : > { %603 = vmatpush.msrb.mxu2 %v305_v12  ;;  %v937_v12 = vld [vmem:[#allocation4 + $0x180] sm:$0xff] }
  0x9f   : > { %613 = vmatpush.msrb.mxu3 %v435_v41  ;;  %v421_v41 = vld [vmem:[#allocation2 + $0x3e0] sm:$0xff] }
  0xa0   : > { %604 = vmatpush.msrb.mxu2 %v300_v16  ;;  %v935_v16 = vld [vmem:[#allocation4 + $0x170] sm:$0xff] }
  0xa1   : > { %614 = vmatpush.msrb.mxu3 %v430_v45  ;;  %v411_v45 = vld [vmem:[#allocation2 + $0x390] sm:$0xff] }
  0xa3   : > { %615 = vmatpush.msrb.mxu3 %v425_v49  ;;  %v401_v49 = vld [vmem:[#allocation2 + $0x340] sm:$0xff] }
  0xa5   : > { %616 = vmatpush.msrb.mxu3 %v420_v53  ;;  %v391_v53 = vld [vmem:[#allocation2 + $0x2f0] sm:$0xff] }
  0xa7   : > { %617 = vmatpush.msrb.mxu3 %v415_v57  ;;  %v381_v57 = vld [vmem:[#allocation2 + $0x2a0] sm:$0xff] }
  0xa9   : > { %618 = vmatpush.msrb.mxu3 %v410_v62  ;;  %v917_v62 = vld [vmem:[#allocation4 + $0xe0] sm:$0xff] }
  0xab   : > { %619 = vmatpush.msrb.mxu3 %v405_v5  ;;  %v913_v5 = vld [vmem:[#allocation4 + $0xc0] sm:$0xff] }
  0xad   : > { %620 = vmatpush.msrb.mxu3 %v400_v7  ;;  %v983_v7 = vld [vmem:[#allocation4 + $0x2f0] sm:$0xff] }
  0xaf   : > { %621 = vmatpush.msrb.mxu3 %v395_v9  ;;  %v939_v9 = vld [vmem:[#allocation4 + $0x190] sm:$0xff] }
  0xb1   : > { %622 = vmatpush.msrb.mxu3 %v390_v11  ;;  %v907_v11 = vld [vmem:[#allocation4 + $0x90] sm:$0xff] }
  0xb3   : > { %623 = vmatpush.msrb.mxu3 %v385_v13  ;;  %v979_v13 = vld [vmem:[#allocation4 + $0x2d0] sm:$0xff] }
  0xb5   : > { %624 = vmatpush.msrb.mxu3 %v380_v17  ;;  %v977_v17 = vld [vmem:[#allocation4 + $0x2c0] sm:$0xff] }
 0x10a   : > { %v282_v14 = vpop.xlane.xlu0 %281 }
 0x10b   : > { %v283_v15 = vmul.f32 0.0069444445, %v282_v14  ;;  %v1583_v14 = vld [vmem:[%s1776_s2] sm:$0x1f] }
 0x10d   : > { %v284_v18 = vadd.f32 6.1e-05, %v283_v15  ;;  %v905_v15 = vld [vmem:[#allocation4 + $0x80] sm:$0xff] }
 0x10f   : > { %1389 = vrsqrt.f32 %v284_v18  ;;  %vm291_vm2 = vweird.f32 %v284_v18 }
 0x115   : > { %v1390_v19 = vpop.eup %1389 }
 0x116   : > { %v286_v20 = vmul.f32 %v1390_v19, %v284_v18  ;;  %vm292_vm1 = vweird.f32 %v1390_v19  ;;  %v1015_v18 = vld [vmem:[#allocation4 + $0x3f0] sm:$0xff] }
 0x117   : > { %vm293_vm3 = vmor %vm291_vm2, %vm292_vm1 }
 0x118   : > { %v287_v21 = vmul.f32 %v1390_v19, %v286_v20  ;;  %v933_v20 = vld [vmem:[#allocation4 + $0x160] sm:$0xff] }
 0x11a   : > { %v288_v22 = vmul.f32 0.5, %v287_v21  ;;  %v975_v21 = vld [vmem:[#allocation4 + $0x2b0] sm:$0xff] }
 0x11c   : > { %v289_v23 = vsub.f32 1.5, %v288_v22  ;;  %v459_v22 = vperm.slane %v1583_v14, 0 }
 0x11e   : > { %v290_v24 = vmul.f32 %v1390_v19, %v289_v23  ;;  %v1013_v23 = vld [vmem:[#allocation4 + $0x3e0] sm:$0xff] }
 0x120   : > { %v294_v25 = vsel %vm293_vm3, %v1390_v19, %v290_v24  ;;  %v903_v19 = vld [vmem:[#allocation4 + $0x70] sm:$0xff]  ;;  %v901_v24 = vld [vmem:[#allocation4 + $0x60] sm:$0xff] }
 0x121   : > { %v1565_v26 = vmul.f32 %v294_v25, %v1555_v60  ;;  %v1568_v27 = vmul.f32 %v294_v25, %v1558_v4  ;;  %v446_v60 = vld [vmem:[#allocation2 + $0x4a8] sm:$0xff]  ;;  %v361_v4 = vld [vmem:[#allocation2 + $0x200] sm:$0xff]  ;;  %v931_v25 = vld [vmem:[#allocation4 + $0x150] sm:$0xff] }
 0x123   : > { %485 = vmatmul.f32.vlgmr.msra.gmra.mxu0 %v1565_v26  ;;  %505 = vmatmul.f32.vlgmr.msra.gmra.mxu1 %v1568_v27 }
 0x124   : > { %525 = vmatmul.f32.vlgmr.msra.gmra.mxu2 %v1565_v26  ;;  %545 = vmatmul.f32.vlgmr.msra.gmra.mxu3 %v1568_v27 }
 0x125   : > { %629 = vmatpush.msra.mxu0 %v376_v28  ;;  %649 = vmatpush.msra.mxu1 %v456_v29  ;;  %v899_v29 = vld [vmem:[#allocation4 + $0x50] sm:$0xff] }
 0x126   : > { %1075 = vmatpush.msra.mxu3 %v951_v58  ;;  %1055 = vmatpush.msra.mxu2 %v919_v59  ;;  %v1001_v58 = vld [vmem:[#allocation4 + $0x380] sm:$0xff] }
 0x127   : > { %630 = vmatpush.msra.mxu0 %v371_v30  ;;  %650 = vmatpush.msra.mxu1 %v451_v31  ;;  %v929_v30 = vld [vmem:[#allocation4 + $0x140] sm:$0xff]  ;;  %v971_v31 = vld [vmem:[#allocation4 + $0x290] sm:$0xff] }
 0x128   : > { %1076 = vmatpush.msra.mxu3 %v949_v61  ;;  %1056 = vmatpush.msra.mxu2 %v917_v62  ;;  %v920_v62 = vld [vmem:[#allocation4 + $0xf8] sm:$0xff] }
 0x129   : > { %631 = vmatpush.msra.mxu0 %v366_v32  ;;  %651 = vmatpush.msra.mxu1 %v446_v60 }
 0x12a   : > { %1077 = vmatpush.msra.mxu3 %v947_v63  ;;  %1057 = vmatpush.msra.mxu2 %v915_v2 }
 0x12b   : > { %632 = vmatpush.msra.mxu0 %v361_v4  ;;  %652 = vmatpush.msra.mxu1 %v441_v33  ;;  %v1009_v4 = vld [vmem:[#allocation4 + $0x3c0] sm:$0xff] }
 0x12c   : > { %565 = vmatmul.f32.vlgmr.msrb.gmra.mxu0 %v1565_v26  ;;  %585 = vmatmul.f32.vlgmr.msrb.gmra.mxu1 %v1568_v27  ;;  %v897_v33 = vld [vmem:[#allocation4 + $0x40] sm:$0xff] }
 0x12d   : > { %605 = vmatmul.f32.vlgmr.msrb.gmra.mxu2 %v1565_v26  ;;  %625 = vmatmul.f32.vlgmr.msrb.gmra.mxu3 %v1568_v27 }
 0x12e   : > { %633 = vmatpush.msra.mxu0 %v356_v34  ;;  %653 = vmatpush.msra.mxu1 %v436_v35  ;;  %v927_v34 = vld [vmem:[#allocation4 + $0x130] sm:$0xff]  ;;  %v969_v35 = vld [vmem:[#allocation4 + $0x280] sm:$0xff] }
 0x12f   : > { %1078 = vmatpush.msra.mxu3 %v945_v3  ;;  %1058 = vmatpush.msra.mxu2 %v913_v5  ;;  %v889_v5 = vld [vmem:[#allocation4] sm:$0xff] }
 0x130   : > { %634 = vmatpush.msra.mxu0 %v351_v36  ;;  %654 = vmatpush.msra.mxu1 %v431_v37  ;;  %v1007_v37 = vld [vmem:[#allocation4 + $0x3b0] sm:$0xff] }
 0x131   : > { %1079 = vmatpush.msra.mxu3 %v943_v6  ;;  %1059 = vmatpush.msra.mxu2 %v911_v0  ;;  %v961_v6 = vld [vmem:[#allocation4 + $0x240] sm:$0xff] }
 0x132   : > { %635 = vmatpush.msra.mxu0 %v346_v38  ;;  %655 = vmatpush.msra.mxu1 %v426_v39  ;;  %v460_v38 = vperm.slane %v1583_v14, 1  ;;  %v895_v39 = vld [vmem:[#allocation4 + $0x30] sm:$0xff] }
 0x133   : > { %1080 = vmatpush.msra.mxu3 %v941_v1  ;;  %1060 = vmatpush.msra.mxu2 %v909_v8  ;;  %v999_v8 = vld [vmem:[#allocation4 + $0x370] sm:$0xff] }
 0x134   : > { %636 = vmatpush.msra.mxu0 %v341_v40  ;;  %656 = vmatpush.msra.mxu1 %v421_v41  ;;  %v925_v40 = vld [vmem:[#allocation4 + $0x120] sm:$0xff]  ;;  %v967_v41 = vld [vmem:[#allocation4 + $0x270] sm:$0xff] }
 0x135   : > { %1081 = vmatpush.msra.mxu3 %v939_v9  ;;  %1061 = vmatpush.msra.mxu2 %v907_v11  ;;  %v1047_v9 = vld [vmem:[#allocation4 + $0x4f0] sm:$0xff] }
 0x136   : > { %637 = vmatpush.msra.mxu0 %v336_v42  ;;  %657 = vmatpush.msra.mxu1 %v416_v43  ;;  %v1005_v43 = vld [vmem:[#allocation4 + $0x3a0] sm:$0xff] }
 0x137   : > { %1082 = vmatpush.msra.mxu3 %v937_v12  ;;  %1062 = vmatpush.msra.mxu2 %v905_v15  ;;  %v997_v15 = vld [vmem:[#allocation4 + $0x360] sm:$0xff] }
 0x138   : > { %638 = vmatpush.msra.mxu0 %v331_v44  ;;  %658 = vmatpush.msra.mxu1 %v411_v45  ;;  %v461_v44 = vperm.slane %v1583_v14, 2  ;;  %v893_v45 = vld [vmem:[#allocation4 + $0x20] sm:$0xff] }
 0x139   : > { %1083 = vmatpush.msra.mxu3 %v935_v16  ;;  %1063 = vmatpush.msra.mxu2 %v903_v19  ;;  %v916_v19 = vld [vmem:[#allocation4 + $0xd8] sm:$0xff] }
 0x13a   : > { %639 = vmatpush.msra.mxu0 %v326_v46  ;;  %659 = vmatpush.msra.mxu1 %v406_v47  ;;  %v923_v46 = vld [vmem:[#allocation4 + $0x110] sm:$0xff]  ;;  %v965_v47 = vld [vmem:[#allocation4 + $0x260] sm:$0xff] }
 0x13b   : > { %1084 = vmatpush.msra.mxu3 %v933_v20  ;;  %1064 = vmatpush.msra.mxu2 %v901_v24 }
 0x13c   : > { %640 = vmatpush.msra.mxu0 %v321_v48  ;;  %660 = vmatpush.msra.mxu1 %v401_v49 }
 0x13d   : > { %1085 = vmatpush.msra.mxu3 %v931_v25  ;;  %1065 = vmatpush.msra.mxu2 %v899_v29 }
 0x13e   : > { %641 = vmatpush.msra.mxu0 %v316_v50  ;;  %661 = vmatpush.msra.mxu1 %v396_v51  ;;  %v1003_v50 = vld [vmem:[#allocation4 + $0x390] sm:$0xff] }
 0x13f   : > { %1086 = vmatpush.msra.mxu3 %v929_v30  ;;  %1066 = vmatpush.msra.mxu2 %v897_v33 }
 0x140   : > { %642 = vmatpush.msra.mxu0 %v311_v52  ;;  %662 = vmatpush.msra.mxu1 %v391_v53  ;;  %v891_v53 = vld [vmem:[#allocation4 + $0x10] sm:$0xff] }
 0x141   : > { %1087 = vmatpush.msra.mxu3 %v927_v34  ;;  %1067 = vmatpush.msra.mxu2 %v895_v39 }
 0x142   : > { %643 = vmatpush.msra.mxu0 %v306_v54  ;;  %663 = vmatpush.msra.mxu1 %v386_v55  ;;  %v921_v54 = vld [vmem:[#allocation4 + $0x100] sm:$0xff]  ;;  %v963_v55 = vld [vmem:[#allocation4 + $0x250] sm:$0xff] }
 0x143   : > { %1088 = vmatpush.msra.mxu3 %v925_v40  ;;  %1068 = vmatpush.msra.mxu2 %v893_v45 }
 0x144   : > { %644 = vmatpush.msra.mxu0 %v301_v56  ;;  %664 = vmatpush.msra.mxu1 %v381_v57 }
 0x145   : > { %645 = vmatmul.f32.vlgmr.msra.gmra.mxu0 %v1565_v26  ;;  %665 = vmatmul.f32.vlgmr.msra.gmra.mxu1 %v1568_v27  ;;  %v973_v26 = vld [vmem:[#allocation4 + $0x2a0] sm:$0xff]  ;;  %v1011_v27 = vld [vmem:[#allocation4 + $0x3d0] sm:$0xff] }
 0x146   : > { %1095 = vmatpush.msrb.mxu0 %v983_v7  ;;  %1115 = vmatpush.msrb.mxu1 %v1015_v18  ;;  %v462_v7 = vperm.slane %v1583_v14, 3  ;;  %v1045_v18 = vld [vmem:[#allocation4 + $0x4e0] sm:$0xff] }
 0x147   : > { %1089 = vmatpush.msra.mxu3 %v923_v46  ;;  %1069 = vmatpush.msra.mxu2 %v891_v53 }
 0x148   : > { %1096 = vmatpush.msrb.mxu0 %v981_v10  ;;  %1116 = vmatpush.msrb.mxu1 %v1013_v23  ;;  %v918_v10 = vld [vmem:[#allocation4 + $0xe8] sm:$0xff]  ;;  %v995_v23 = vld [vmem:[#allocation4 + $0x350] sm:$0xff] }
 0x149   : > { %1090 = vmatpush.msra.mxu3 %v921_v54  ;;  %1070 = vmatpush.msra.mxu2 %v889_v5  ;;  %v1039_v54 = vld [vmem:[#allocation4 + $0x4b0] sm:$0xff] }
 0x14a   : > { %1097 = vmatpush.msrb.mxu0 %v979_v13  ;;  %1117 = vmatpush.msrb.mxu1 %v1011_v27  ;;  %v959_v13 = vld [vmem:[#allocation4 + $0x230] sm:$0xff] }
 0x14b   : > { %1155 = vmatpush.msrb.mxu3 %v920_v62  ;;  %1135 = vmatpush.msrb.mxu2 %v1047_v9  ;;  %v1043_v27 = vld [vmem:[#allocation4 + $0x4d0] sm:$0xff] }
 0x14c   : > { %1098 = vmatpush.msrb.mxu0 %v977_v17  ;;  %1118 = vmatpush.msrb.mxu1 %v1009_v4 }
 0x14d   : > { %1156 = vmatpush.msrb.mxu3 %v918_v10  ;;  %1136 = vmatpush.msrb.mxu2 %v1045_v18 }
 0x14e   : > { %1099 = vmatpush.msrb.mxu0 %v975_v21  ;;  %1119 = vmatpush.msrb.mxu1 %v1007_v37  ;;  %v1041_v37 = vld [vmem:[#allocation4 + $0x4c0] sm:$0xff] }
 0x14f   : > { %1157 = vmatpush.msrb.mxu3 %v916_v19  ;;  %1137 = vmatpush.msrb.mxu2 %v1043_v27  ;;  %v1033_v27 = vld [vmem:[#allocation4 + $0x480] sm:$0xff] }
 0x150   : > { %1100 = vmatpush.msrb.mxu0 %v973_v26  ;;  %1120 = vmatpush.msrb.mxu1 %v1005_v43  ;;  %v953_v43 = vld [vmem:[#allocation4 + $0x200] sm:$0xff] }
 0x151   : > { %1138 = vmatpush.msrb.mxu2 %v1041_v37 }
 0x152   : > { %1101 = vmatpush.msrb.mxu0 %v971_v31  ;;  %1121 = vmatpush.msrb.mxu1 %v1003_v50 }
 0x153   : > { %1139 = vmatpush.msrb.mxu2 %v1039_v54 }
 0x154   : > { %1102 = vmatpush.msrb.mxu0 %v969_v35  ;;  %1122 = vmatpush.msrb.mxu1 %v1001_v58 }
 0x156   : > { %1103 = vmatpush.msrb.mxu0 %v967_v41  ;;  %1123 = vmatpush.msrb.mxu1 %v999_v8  ;;  %v912_v41 = vld [vmem:[#allocation4 + $0xb8] sm:$0xff]  ;;  %v950_v8 = vld [vmem:[#allocation4 + $0x1e8] sm:$0xff] }
 0x158   : > { %1104 = vmatpush.msrb.mxu0 %v965_v47  ;;  %1124 = vmatpush.msrb.mxu1 %v997_v15 }
 0x15a   : > { %1105 = vmatpush.msrb.mxu0 %v963_v55  ;;  %1125 = vmatpush.msrb.mxu1 %v995_v23  ;;  %v910_v55 = vld [vmem:[#allocation4 + $0xa8] sm:$0xff] }
 0x15c   : > { %1106 = vmatpush.msrb.mxu0 %v961_v6 }
 0x15e   : > { %1107 = vmatpush.msrb.mxu0 %v959_v13  ;;  %v1035_v13 = vld [vmem:[#allocation4 + $0x490] sm:$0xff] }
 0x1a0   : > { %v486_v28 = vpop.f32.mrf.mxu0  ;;  %v506_v60 = vpop.f32.mrf.mxu1 }
 0x1a1   : > { %v487_v32 = vadd.f32 %v486_v28, %v459_v22  ;;  %v957_v22 = vld [vmem:[#allocation4 + $0x220] sm:$0xff]  ;;  %v914_v28 = vld [vmem:[#allocation4 + $0xc8] sm:$0xff] }
 0x1a2   : > { %1108 = vmatpush.msrb.mxu0 %v957_v22  ;;  %1158 = vmatpush.msrb.mxu3 %v914_v28  ;;  %v985_v22 = vld [vmem:[#allocation4 + $0x300] sm:$0xff]  ;;  %v904_v28 = vld [vmem:[#allocation4 + $0x78] sm:$0xff] }
 0x1a3   : > { %v1586_v36 = vadd.f32 %v506_v60, %v487_v32  ;;  %v955_v32 = vld [vmem:[#allocation4 + $0x210] sm:$0xff]  ;;  %v993_v60 = vld [vmem:[#allocation4 + $0x340] sm:$0xff] }
 0x1a4   : > { %1109 = vmatpush.msrb.mxu0 %v955_v32  ;;  %1126 = vmatpush.msrb.mxu1 %v993_v60  ;;  %v984_v60 = vld [vmem:[#allocation4 + $0x2f8] sm:$0xff] }
 0x1a5   : > { %v1590_v42 = vmul.f32 0.70710677, %v1586_v36  ;;  %1159 = vmatpush.msrb.mxu3 %v912_v41 }
 0x1a6   : > { %1110 = vmatpush.msrb.mxu0 %v953_v43  ;;  %v944_v43 = vld [vmem:[#allocation4 + $0x1b8] sm:$0xff] }
 0x1a7   : > { %v679_v48 = vmul.f32 %v1590_v42, %v1590_v42  ;;  %v526_v49 = vpop.f32.mrf.mxu2  ;;  %v546_v52 = vpop.f32.mrf.mxu3  ;;  %1160 = vmatpush.msrb.mxu3 %v910_v55 }
 0x1a8   : > { %v527_v51 = vadd.f32 %v526_v49, %v460_v38 }
 0x1a9   : > { %v1595_v56 = vmin.f32 %v679_v48, 16.0  ;;  %v566_v57 = vpop.f32.mrf.mxu0  ;;  %v586_v3 = vpop.f32.mrf.mxu1 }
 0x1aa   : > { %v1597_v59 = vadd.f32 %v546_v52, %v527_v51  ;;  %v567_v61 = vadd.f32 %v566_v57, %v461_v44  ;;  %v991_v44 = vld [vmem:[#allocation4 + $0x330] sm:$0xff]  ;;  %v952_v57 = vld [vmem:[#allocation4 + $0x1f8] sm:$0xff] }
 0x1ab   : > { %v681_v63 = vmul.f32 2.1237322e-06, %v1595_v56  ;;  %v692_v2 = vmul.f32 3.8918573e-05, %v1595_v56  ;;  %1127 = vmatpush.msrb.mxu1 %v991_v44  ;;  %1175 = vmatpush.msra.mxu0 %v952_v57  ;;  %v982_v44 = vld [vmem:[#allocation4 + $0x2e8] sm:$0xff]  ;;  %v1027_v57 = vld [vmem:[#allocation4 + $0x450] sm:$0xff] }
 0x1ac   : > { %v1602_v0 = vmul.f32 0.70710677, %v1597_v59  ;;  %v1604_v1 = vadd.f32 %v586_v3, %v567_v61 }
 0x1ad   : > { %v682_v11 = vadd.f32 0.00028619796, %v681_v63  ;;  %v693_v12 = vadd.f32 0.001143296, %v692_v2  ;;  %v989_v63 = vld [vmem:[#allocation4 + $0x320] sm:$0xff]  ;;  %1176 = vmatpush.msra.mxu0 %v950_v8 }
 0x1ae   : > { %v719_v16 = vmul.f32 %v1602_v0, %v1602_v0  ;;  %v1610_v17 = vmul.f32 0.70710677, %v1604_v1  ;;  %v1037_v2 = vld [vmem:[#allocation4 + $0x4a0] sm:$0xff]  ;;  %1128 = vmatpush.msrb.mxu1 %v989_v63  ;;  %v898_v63 = vld [vmem:[#allocation4 + $0x48] sm:$0xff] }
 0x1af   : > { %v683_v20 = vmul.f32 %v682_v11, %v1595_v56  ;;  %v694_v21 = vmul.f32 %v693_v12, %v1595_v56  ;;  %1140 = vmatpush.msrb.mxu2 %v1037_v2  ;;  %v987_v12 = vld [vmem:[#allocation4 + $0x310] sm:$0xff]  ;;  %v940_v2 = vld [vmem:[#allocation4 + $0x198] sm:$0xff]  ;;  %v1025_v8 = vld [vmem:[#allocation4 + $0x440] sm:$0xff] }
 0x1b0   : > { %v1614_v24 = vmin.f32 %v719_v16, 16.0  ;;  %v759_v25 = vmul.f32 %v1610_v17, %v1610_v17  ;;  %v606_v26 = vpop.f32.mrf.mxu2  ;;  %v626_v35 = vpop.f32.mrf.mxu3  ;;  %1129 = vmatpush.msrb.mxu1 %v987_v12 }
 0x1b1   : > { %v684_v29 = vadd.f32 0.0036580483, %v683_v20  ;;  %v695_v30 = vadd.f32 0.014752088, %v694_v21  ;;  %v607_v31 = vadd.f32 %v606_v26, %v462_v7  ;;  %v908_v7 = vld [vmem:[#allocation4 + $0x98] sm:$0xff]  ;;  %v906_v20 = vld [vmem:[#allocation4 + $0x88] sm:$0xff]  ;;  %1141 = vmatpush.msrb.mxu2 %v1035_v13 }
 0x1b2   : > { %v721_v4 = vmul.f32 2.1237322e-06, %v1614_v24  ;;  %v732_v33 = vmul.f32 3.8918573e-05, %v1614_v24  ;;  %v1620_v34 = vmin.f32 %v759_v25, 16.0  ;;  %1161 = vmatpush.msrb.mxu3 %v908_v7  ;;  %v948_v21 = vld [vmem:[#allocation4 + $0x1d8] sm:$0xff]  ;;  %1130 = vmatpush.msrb.mxu1 %v985_v22 }
 0x1b3   : > { %v685_v38 = vmul.f32 %v684_v29, %v1595_v56  ;;  %v696_v39 = vmul.f32 %v695_v30, %v1595_v56  ;;  %v1624_v40 = vadd.f32 %v626_v35, %v607_v31  ;;  %v946_v29 = vld [vmem:[#allocation4 + $0x1c8] sm:$0xff]  ;;  %1177 = vmatpush.msra.mxu0 %v948_v21  ;;  %1142 = vmatpush.msrb.mxu2 %v1033_v27  ;;  %v1023_v13 = vld [vmem:[#allocation4 + $0x430] sm:$0xff]  ;;  %v936_v22 = vld [vmem:[#allocation4 + $0x178] sm:$0xff] }
 0x1b4   : > { %v722_v45 = vadd.f32 0.00028619796, %v721_v4  ;;  %v733_v46 = vadd.f32 0.001143296, %v732_v33  ;;  %v761_v47 = vmul.f32 2.1237322e-06, %v1620_v34  ;;  %1162 = vmatpush.msrb.mxu3 %v906_v20  ;;  %1195 = vmatpush.msra.mxu1 %v984_v60 }
 0x1b5   : > { %v686_v48 = vadd.f32 0.05243302, %v685_v38  ;;  %v697_v49 = vadd.f32 0.112945676, %v696_v39  ;;  %v772_v50 = vmul.f32 3.8918573e-05, %v1620_v34  ;;  %1178 = vmatpush.msra.mxu0 %v946_v29 }
 0x1b6   : > { %v723_v51 = vmul.f32 %v722_v45, %v1614_v24  ;;  %v734_v52 = vmul.f32 %v733_v46, %v1614_v24  ;;  %v762_v53 = vadd.f32 0.00028619796, %v761_v47  ;;  %v1632_v62 = vmul.f32 0.70710677, %v1624_v40  ;;  %v1031_v4 = vld [vmem:[#allocation4 + $0x470] sm:$0xff]  ;;  %1163 = vmatpush.msrb.mxu3 %v904_v28  ;;  %v902_v38 = vld [vmem:[#allocation4 + $0x68] sm:$0xff]  ;;  %1196 = vmatpush.msra.mxu1 %v982_v44 }
 0x1b7   : > { %v698_v58 = vmul.f32 %v697_v49, %v1595_v56  ;;  %v773_v61 = vadd.f32 0.001143296, %v772_v50  ;;  %v687_v15 = vmul.f32 %v686_v48, %v1595_v56  ;;  %v463_v46 = vperm.slane %v1583_v14, 4  ;;  %1143 = vmatpush.msrb.mxu2 %v1031_v4  ;;  %v1029_v47 = vld [vmem:[#allocation4 + $0x460] sm:$0xff]  ;;  %v900_v48 = vld [vmem:[#allocation4 + $0x58] sm:$0xff]  ;;  %v942_v49 = vld [vmem:[#allocation4 + $0x1a8] sm:$0xff]  ;;  %1179 = vmatpush.msra.mxu0 %v944_v43 }
 0x1b8   : > { %v724_v3 = vadd.f32 0.0036580483, %v723_v51  ;;  %v735_v5 = vadd.f32 0.014752088, %v734_v52  ;;  %v763_v6 = vmul.f32 %v762_v53, %v1620_v34  ;;  %v799_v11 = vmul.f32 %v1632_v62, %v1632_v62  ;;  %1164 = vmatpush.msrb.mxu3 %v902_v38  ;;  %v980_v53 = vld [vmem:[#allocation4 + $0x2d8] sm:$0xff]  ;;  %v1021_v29 = vld [vmem:[#allocation4 + $0x420] sm:$0xff] }
 0x1b9   : > { %v699_v9 = vadd.f32 0.4994258, %v698_v58  ;;  %v774_v10 = vmul.f32 %v773_v61, %v1620_v34  ;;  %v688_v39 = vadd.f32 0.18741608, %v687_v15  ;;  %1144 = vmatpush.msrb.mxu2 %v1029_v47  ;;  %1180 = vmatpush.msra.mxu0 %v942_v49  ;;  %v894_v15 = vld [vmem:[#allocation4 + $0x28] sm:$0xff]  ;;  %v1019_v43 = vld [vmem:[#allocation4 + $0x410] sm:$0xff] }
 0x1ba   : > { %v725_v16 = vmul.f32 %v724_v3, %v1614_v24  ;;  %v736_v18 = vmul.f32 %v735_v5, %v1614_v24  ;;  %v764_v19 = vadd.f32 0.0036580483, %v763_v6  ;;  %v1642_v26 = vmin.f32 %v799_v11, 16.0  ;;  %1165 = vmatpush.msrb.mxu3 %v900_v48  ;;  %1197 = vmatpush.msra.mxu1 %v980_v53  ;;  %v978_v3 = vld [vmem:[#allocation4 + $0x2c8] sm:$0xff]  ;;  %v932_v47 = vld [vmem:[#allocation4 + $0x158] sm:$0xff] }
 0x1bb   : > { %v700_v23 = vmul.f32 %v699_v9, %v1595_v56  ;;  %v775_v25 = vadd.f32 0.014752088, %v774_v10  ;;  %v689_v58 = vmul.f32 %v688_v39, %v1595_v56  ;;  %1145 = vmatpush.msrb.mxu2 %v1027_v57  ;;  %v896_v9 = vld [vmem:[#allocation4 + $0x38] sm:$0xff]  ;;  %v938_v10 = vld [vmem:[#allocation4 + $0x188] sm:$0xff]  ;;  %1181 = vmatpush.msra.mxu0 %v940_v2 }
 0x1bc   : > { %v726_v30 = vadd.f32 0.05243302, %v725_v16  ;;  %v737_v31 = vadd.f32 0.112945676, %v736_v18  ;;  %v765_v32 = vmul.f32 %v764_v19, %v1620_v34  ;;  %v801_v37 = vmul.f32 2.1237322e-06, %v1642_v26  ;;  %1166 = vmatpush.msrb.mxu3 %v898_v63  ;;  %1198 = vmatpush.msra.mxu1 %v978_v3 }
 0x1bd   : > { %v1645_v33 = vadd.f32 1.0, %v700_v23  ;;  %v776_v35 = vmul.f32 %v775_v25, %v1620_v34  ;;  %v812_v45 = vmul.f32 3.8918573e-05, %v1642_v26  ;;  %v976_v56 = vld [vmem:[#allocation4 + $0x2b8] sm:$0xff]  ;;  %1146 = vmatpush.msrb.mxu2 %v1025_v8  ;;  %v974_v23 = vld [vmem:[#allocation4 + $0x2a8] sm:$0xff]  ;;  %1182 = vmatpush.msra.mxu0 %v938_v10 }
 0x1be   : > { %v738_v41 = vmul.f32 %v737_v31, %v1614_v24  ;;  %v727_v50 = vmul.f32 %v726_v30, %v1614_v24  ;;  %v766_v52 = vadd.f32 0.05243302, %v765_v32  ;;  %v802_v55 = vadd.f32 0.00028619796, %v801_v37  ;;  %1167 = vmatpush.msrb.mxu3 %v896_v9  ;;  %1199 = vmatpush.msra.mxu1 %v976_v56  ;;  %v892_v30 = vld [vmem:[#allocation4 + $0x18] sm:$0xff]  ;;  %v934_v4 = vld [vmem:[#allocation4 + $0x168] sm:$0xff] }
 0x1bf   : > { %1391 = vrcp.f32 %v1645_v33  ;;  %v777_v54 = vadd.f32 0.112945676, %v776_v35  ;;  %v813_v6 = vadd.f32 0.001143296, %v812_v45  ;;  %v690_v25 = vadd.f32 1.1283791, %v689_v58  ;;  %1147 = vmatpush.msrb.mxu2 %v1023_v13  ;;  %1183 = vmatpush.msra.mxu0 %v936_v22 }
 0x1c0   : > { %v739_v51 = vadd.f32 0.4994258, %v738_v41  ;;  %v728_v11 = vadd.f32 0.18741608, %v727_v50  ;;  %v767_v18 = vmul.f32 %v766_v52, %v1620_v34  ;;  %v803_v20 = vmul.f32 %v802_v55, %v1642_v26  ;;  %1168 = vmatpush.msrb.mxu3 %v894_v15  ;;  %v972_v35 = vld [vmem:[#allocation4 + $0x298] sm:$0xff]  ;;  %1200 = vmatpush.msra.mxu1 %v974_v23  ;;  %v890_v44 = vld [vmem:[#allocation4 + $0x8] sm:$0xff] }
 0x1c1   : > { %v778_v5 = vmul.f32 %v777_v54, %v1620_v34  ;;  %v814_v21 = vmul.f32 %v813_v6, %v1642_v26  ;;  %v711_v31 = vand.u32 2147483647, %v1645_v33  ;;  %v713_v32 = vand.u32 2147483648, %v1645_v33  ;;  %1148 = vmatpush.msrb.mxu2 %v1021_v29  ;;  %v970_v48 = vld [vmem:[#allocation4 + $0x288] sm:$0xff]  ;;  %1184 = vmatpush.msra.mxu0 %v934_v4  ;;  %v968_v57 = vld [vmem:[#allocation4 + $0x278] sm:$0xff] }
 0x1c2   : > { %v740_v14 = vmul.f32 %v739_v51, %v1614_v24  ;;  %v646_v61 = vpop.f32.mrf.mxu0  ;;  %v666_v28 = vpop.f32.mrf.mxu1  ;;  %v729_v38 = vmul.f32 %v728_v11, %v1614_v24  ;;  %v768_v45 = vadd.f32 0.18741608, %v767_v18  ;;  %1169 = vmatpush.msrb.mxu3 %v892_v30  ;;  %1201 = vmatpush.msra.mxu1 %v972_v35  ;;  %v1017_v51 = vld [vmem:[#allocation4 + $0x400] sm:$0xff]  ;;  %v1679_v52 = vmul.f32 0.5, %v1586_v36  ;;  %v930_v55 = vld [vmem:[#allocation4 + $0x148] sm:$0xff]  ;;  %v928_v3 = vld [vmem:[#allocation4 + $0x138] sm:$0xff] }
 0x1c3   : > { %v647_v7 = vadd.f32 %v646_v61, %v463_v46  ;;  %v779_v19 = vadd.f32 0.4994258, %v778_v5  ;;  %v815_v41 = vadd.f32 0.014752088, %v814_v21  ;;  %v804_v46 = vadd.f32 0.0036580483, %v803_v20  ;;  %1149 = vmatpush.msrb.mxu2 %v1019_v43  ;;  %1185 = vmatpush.msra.mxu0 %v932_v47 }
 0x1c4   : > { %v1657_v12 = vadd.f32 1.0, %v740_v14  ;;  %v691_v53 = vmul.f32 %v690_v25, %v1590_v42  ;;  %1170 = vmatpush.msrb.mxu3 %v890_v44  ;;  %vm707_vm5 = vweird.f32 %v1645_v33  ;;  %v730_v61 = vadd.f32 1.1283791, %v729_v38  ;;  %1202 = vmatpush.msra.mxu1 %v970_v48  ;;  %v966_v5 = vld [vmem:[#allocation4 + $0x268] sm:$0xff]  ;;  %v964_v56 = vld [vmem:[#allocation4 + $0x258] sm:$0xff] }
 0x1c5   : > { %v1659_v16 = vpop.eup %1391  ;;  %v1669_v60 = vadd.f32 %v666_v28, %v647_v7  ;;  %v780_v39 = vmul.f32 %v779_v19, %v1620_v34  ;;  %v816_v24 = vmul.f32 %v815_v41, %v1642_v26  ;;  %v714_v36 = vor.u32 1.1754944e-38, %v713_v32  ;;  %1150 = vmatpush.msrb.mxu2 %v1017_v51  ;;  %1186 = vmatpush.msra.mxu0 %v930_v55  ;;  %v926_v11 = vld [vmem:[#allocation4 + $0x128] sm:$0xff]  ;;  %v924_v22 = vld [vmem:[#allocation4 + $0x118] sm:$0xff] }
 0x1c6   : > { %v703_v27 = vmul.f32 %v1659_v16, %v1645_v33  ;;  %1393 = vrcp.f32 %v1657_v12  ;;  %vm708_vm4 = vweird.f32 %v1659_v16  ;;  %v769_v63 = vmul.f32 %v768_v45, %v1620_v34  ;;  %1203 = vmatpush.msra.mxu1 %v968_v57  ;;  %v962_v23 = vld [vmem:[#allocation4 + $0x248] sm:$0xff]  ;;  %v960_v35 = vld [vmem:[#allocation4 + $0x238] sm:$0xff] }
 0x1c7   : > { %v1675_v50 = vadd.f32 1.0, %v780_v39  ;;  %v1683_v54 = vmul.f32 0.70710677, %v1669_v60  ;;  %vm709_vm6 = vmor %vm707_vm5, %vm708_vm4  ;;  %v805_v2 = vmul.f32 %v804_v46, %v1642_v26  ;;  %vm712_vm7 = vcmp.eq.f32.partialorder %v711_v31, 8.507059e+37  ;;  %1187 = vmatpush.msra.mxu0 %v928_v3  ;;  %v922_v4 = vld [vmem:[#allocation4 + $0x108] sm:$0xff]  ;;  %v1016_v51 = vld [vmem:[#allocation4 + $0x3f8] sm:$0xff] }
 0x1c8   : > { %v704_v37 = vsub.f32 1.0, %v703_v27  ;;  %v817_v6 = vadd.f32 0.112945676, %v816_v24  ;;  %v751_v10 = vand.u32 2147483647, %v1657_v12  ;;  %v753_v34 = vand.u32 2147483648, %v1657_v12  ;;  %1204 = vmatpush.msra.mxu1 %v966_v5 }
 0x1c9   : > { %1395 = vrcp.f32 %v1675_v50  ;;  %v839_v7 = vmul.f32 %v1683_v54, %v1683_v54  ;;  %v731_v15 = vmul.f32 %v730_v61, %v1602_v0  ;;  %v770_v20 = vadd.f32 1.1283791, %v769_v63  ;;  %1188 = vmatpush.msra.mxu0 %v926_v11  ;;  %v958_v46 = vld [vmem:[#allocation4 + $0x228] sm:$0xff] }
 0x1ca   : > { %v705_v49 = vmul.f32 %v1659_v16, %v704_v37  ;;  %v806_v21 = vadd.f32 0.05243302, %v805_v2  ;;  %vm747_vm9 = vweird.f32 %v1657_v12  ;;  %1205 = vmatpush.msra.mxu1 %v964_v56  ;;  %vm1710_vm10 = vcmp.eq.f32.partialorder %v751_v10, 8.507059e+37  ;;  %v954_v63 = vld [vmem:[#allocation4 + $0x208] sm:$0xff]  ;;  %v1048_v56 = vld [vmem:[#allocation4 + $0x4f8] sm:$0xff] }
 0x1cb   : > { %v1703_v18 = vmin.f32 %v839_v7, 16.0  ;;  %v754_v31 = vor.u32 1.1754944e-38, %v753_v34  ;;  %1189 = vmatpush.msra.mxu0 %v924_v22  ;;  %v793_v44 = vand.u32 2147483648, %v1675_v50  ;;  %vm787_vm13 = vweird.f32 %v1675_v50  ;;  %v1010_v10 = vld [vmem:[#allocation4 + $0x3c8] sm:$0xff] }
 0x1cc   : > { %v1685_v58 = vpop.eup %1393  ;;  %v706_v14 = vadd.f32 %v1659_v16, %v705_v49  ;;  %1206 = vmatpush.msra.mxu1 %v962_v23  ;;  %v807_v49 = vmul.f32 %v806_v21, %v1642_v26  ;;  %v670_v2 = vmul.f32 0.5, %v1597_v59  ;;  %v771_v3 = vmul.f32 %v770_v20, %v1610_v17  ;;  %v1046_v21 = vld [vmem:[#allocation4 + $0x4e8] sm:$0xff] }
 0x1cd   : > { %v743_v42 = vmul.f32 %v1685_v58, %v1657_v12  ;;  %vm748_vm8 = vweird.f32 %v1685_v58  ;;  %v841_v0 = vmul.f32 2.1237322e-06, %v1703_v18  ;;  %v791_v12 = vand.u32 2147483647, %v1675_v50  ;;  %1190 = vmatpush.msra.mxu0 %v922_v4  ;;  %v1006_v23 = vld [vmem:[#allocation4 + $0x3a8] sm:$0xff] }
 0x1ce   : > { %v710_v33 = vsel %vm709_vm6, %v1659_v16, %v706_v14  ;;  %v818_v16 = vmul.f32 %v817_v6, %v1642_v26  ;;  %vm749_vm11 = vmor %vm747_vm9, %vm748_vm8  ;;  %v852_v39 = vmul.f32 3.8918573e-05, %v1703_v18  ;;  %1207 = vmatpush.msra.mxu1 %v960_v35  ;;  %v808_v5 = vadd.f32 0.18741608, %v807_v49 }
 0x1cf   : > { %v715_v8 = vsel %vm712_vm7, %v714_v36, %v710_v33  ;;  %v744_v9 = vsub.f32 1.0, %v743_v42  ;;  %v1396_v25 = vpop.eup %1395  ;;  %v842_v45 = vadd.f32 0.00028619796, %v841_v0  ;;  %v1012_v33 = vld [vmem:[#allocation4 + $0x3d8] sm:$0xff]  ;;  %vm792_vm15 = vcmp.eq.f32.partialorder %v791_v12, 8.507059e+37 }
 0x1d0   : > { %v716_v13 = vmul.f32 %v715_v8, %v691_v53  ;;  %v819_v28 = vadd.f32 0.4994258, %v818_v16  ;;  %v783_v32 = vmul.f32 %v1396_v25, %v1675_v50  ;;  %vm788_vm12 = vweird.f32 %v1396_v25  ;;  %1208 = vmatpush.msra.mxu1 %v958_v46  ;;  %v1008_v16 = vld [vmem:[#allocation4 + $0x3b8] sm:$0xff] }
 0x1d1   : > { %v745_v19 = vmul.f32 %v1685_v58, %v744_v9  ;;  %v853_v57 = vadd.f32 0.001143296, %v852_v39  ;;  %v843_v36 = vmul.f32 %v842_v45, %v1703_v18  ;;  %vm789_vm14 = vmor %vm787_vm13, %vm788_vm12  ;;  %v794_v50 = vor.u32 1.1754944e-38, %v793_v44  ;;  %v1000_v46 = vld [vmem:[#allocation4 + $0x378] sm:$0xff] }
 0x1d2   : > { %v1347_v27 = vclamps-f32 %v716_v13, 1.0  ;;  %v820_v38 = vmul.f32 %v819_v28, %v1642_v26  ;;  %v784_v43 = vsub.f32 1.0, %v783_v32  ;;  %v1004_v32 = vld [vmem:[#allocation4 + $0x398] sm:$0xff] }
 0x1d3   : > { %v746_v29 = vadd.f32 %v1685_v58, %v745_v19  ;;  %v854_v42 = vmul.f32 %v853_v57, %v1703_v18  ;;  %v844_v59 = vadd.f32 0.0036580483, %v843_v36  ;;  %v994_v36 = vld [vmem:[#allocation4 + $0x348] sm:$0xff] }
 0x1d4   : > { %v879_v37 = vadd.f32 1.0, %v1347_v27  ;;  %v1728_v24 = vadd.f32 1.0, %v820_v38  ;;  %v785_v55 = vmul.f32 %v1396_v25, %v784_v43  ;;  %v1002_v38 = vld [vmem:[#allocation4 + $0x388] sm:$0xff]  ;;  %v1040_v43 = vld [vmem:[#allocation4 + $0x4b8] sm:$0xff] }
 0x1d5   : > { %v750_v41 = vsel %vm749_vm11, %v1685_v58, %v746_v29  ;;  %v956_v58 = vld [vmem:[#allocation4 + $0x218] sm:$0xff]  ;;  %v855_v8 = vadd.f32 0.014752088, %v854_v42  ;;  %v845_v0 = vmul.f32 %v844_v59, %v1703_v18  ;;  %v986_v59 = vld [vmem:[#allocation4 + $0x308] sm:$0xff] }
 0x1d6   : > { %v1723_v47 = vmul.f32 %v879_v37, %v1679_v52  ;;  %v755_v48 = vsel %vm1710_vm10, %v754_v31, %v750_v41  ;;  %1397 = vrcp.f32 %v1728_v24  ;;  %v1014_v52 = vld [vmem:[#allocation4 + $0x3e8] sm:$0xff]  ;;  %v786_v61 = vadd.f32 %v1396_v25, %v785_v55  ;;  %1209 = vmatpush.msra.mxu1 %v956_v58  ;;  %v1044_v29 = vld [vmem:[#allocation4 + $0x4d8] sm:$0xff] }
 0x1d7   : > { %v756_v53 = vmul.f32 %v755_v48, %v731_v15  ;;  %v856_v17 = vmul.f32 %v855_v8, %v1703_v18  ;;  %v809_v15 = vmul.f32 %v808_v5, %v1642_v26  ;;  %v833_v30 = vand.u32 2147483648, %v1728_v24  ;;  %v998_v55 = vld [vmem:[#allocation4 + $0x368] sm:$0xff] }
 0x1d8   : > { %1071 = vmatmul.f32.vlgmr.msra.gmra.mxu2 %v1723_v47  ;;  %v790_v7 = vsel %vm789_vm14, %v1396_v25, %v786_v61  ;;  %1210 = vmatpush.msra.mxu1 %v954_v63  ;;  %v671_v25 = vmul.f32 0.5, %v1604_v1  ;;  %v831_v37 = vand.u32 2147483647, %v1728_v24  ;;  %v1042_v1 = vld [vmem:[#allocation4 + $0x4c8] sm:$0xff]  ;;  %vm827_vm1 = vweird.f32 %v1728_v24 }
 0x1d9   : > { %v1348_v14 = vclamps-f32 %v756_v53, 1.0  ;;  %1215 = vmatpush.msra.mxu2 %v1016_v51  ;;  %v795_v9 = vsel %vm792_vm15, %v794_v50, %v790_v7  ;;  %v857_v22 = vadd.f32 0.112945676, %v856_v17  ;;  %v810_v26 = vadd.f32 1.1283791, %v809_v15  ;;  %v1038_v51 = vld [vmem:[#allocation4 + $0x4a8] sm:$0xff] }
 0x1da   : > { %v796_v11 = vmul.f32 %v795_v9, %v771_v3  ;;  %v846_v41 = vadd.f32 0.05243302, %v845_v0  ;;  %v834_v44 = vor.u32 1.1754944e-38, %v833_v30  ;;  %vm832_vm3 = vcmp.eq.f32.partialorder %v831_v37, 8.507059e+37  ;;  %v992_v3 = vld [vmem:[#allocation4 + $0x338] sm:$0xff]  ;;  %v1030_v5 = vld [vmem:[#allocation4 + $0x468] sm:$0xff] }
 0x1db   : > { %v880_v6 = vadd.f32 1.0, %v1348_v14  ;;  %1216 = vmatpush.msra.mxu2 %v1014_v52  ;;  %v858_v31 = vmul.f32 %v857_v22, %v1703_v18  ;;  %v811_v48 = vmul.f32 %v810_v26, %v1632_v62  ;;  %v1036_v52 = vld [vmem:[#allocation4 + $0x498] sm:$0xff]  ;;  %v1034_v62 = vld [vmem:[#allocation4 + $0x488] sm:$0xff]  ;;  %v673_v0 = vmul.f32 0.5, %v1669_v60 }
 0x1dc   : > { %v1398_v13 = vpop.eup %1397  ;;  %v1349_v19 = vclamps-f32 %v796_v11, 1.0  ;;  %v847_v58 = vmul.f32 %v846_v41, %v1703_v18  ;;  %v996_v14 = vld [vmem:[#allocation4 + $0x358] sm:$0xff] }
 0x1dd   : > { %v1738_v34 = vmul.f32 %v880_v6, %v670_v2  ;;  %1217 = vmatpush.msra.mxu2 %v1012_v33  ;;  %v823_v20 = vmul.f32 %v1398_v13, %v1728_v24  ;;  %vm828_vm0 = vweird.f32 %v1398_v13  ;;  %v859_v12 = vadd.f32 0.4994258, %v858_v31  ;;  %v1032_v2 = vld [vmem:[#allocation4 + $0x478] sm:$0xff]  ;;  %v990_v6 = vld [vmem:[#allocation4 + $0x328] sm:$0xff] }
 0x1de   : > { %v881_v27 = vadd.f32 1.0, %v1349_v19  ;;  %vm829_vm2 = vmor %vm827_vm1, %vm828_vm0  ;;  %v848_v63 = vadd.f32 0.18741608, %v847_v58  ;;  %v1028_v9 = vld [vmem:[#allocation4 + $0x458] sm:$0xff] }
 0x1df   : > { %1091 = vmatmul.f32.vlgmr.msra.gmra.mxu3 %v1738_v34  ;;  %1218 = vmatpush.msra.mxu2 %v1010_v10  ;;  %v824_v28 = vsub.f32 1.0, %v823_v20  ;;  %v860_v45 = vmul.f32 %v859_v12, %v1703_v18  ;;  %v1024_v15 = vld [vmem:[#allocation4 + $0x438] sm:$0xff] }
 0x1e0   : > { %1235 = vmatpush.msra.mxu3 %v1048_v56  ;;  %v1748_v4 = vmul.f32 %v881_v27, %v671_v25  ;;  %v849_v7 = vmul.f32 %v848_v63, %v1703_v18  ;;  %v1020_v22 = vld [vmem:[#allocation4 + $0x418] sm:$0xff]  ;;  %v1018_v27 = vld [vmem:[#allocation4 + $0x408] sm:$0xff] }
 0x1e1   : > { %1219 = vmatpush.msra.mxu2 %v1008_v16  ;;  %v825_v35 = vmul.f32 %v1398_v13, %v824_v28  ;;  %v861_v53 = vadd.f32 1.0, %v860_v45  ;;  %v1022_v16 = vld [vmem:[#allocation4 + $0x428] sm:$0xff] }
 0x1e2   : > { %1236 = vmatpush.msra.mxu3 %v1046_v21  ;;  %1111 = vmatmul.f32.vlgmr.msrb.gmra.mxu0 %v1748_v4  ;;  %v850_v17 = vadd.f32 1.1283791, %v849_v7 }
 0x1e3   : > { %1220 = vmatpush.msra.mxu2 %v1006_v23  ;;  %v826_v39 = vadd.f32 %v1398_v13, %v825_v35  ;;  %1399 = vrcp.f32 %v861_v53  ;;  %v873_v11 = vand.u32 2147483648, %v861_v53  ;;  %vm867_vm5 = vweird.f32 %v861_v53 }
 0x1e4   : > { %1237 = vmatpush.msra.mxu3 %v1044_v29  ;;  %v851_v20 = vmul.f32 %v850_v17, %v1683_v54  ;;  %v1049_v54 = vld [vmem:[%s1778_s4] sm:$0x3] }
 0x1e5   : > { %1221 = vmatpush.msra.mxu2 %v1004_v32  ;;  %v830_v49 = vsel %vm829_vm2, %v1398_v13, %v826_v39  ;;  %v871_v13 = vand.u32 2147483647, %v861_v53  ;;  %v874_v19 = vor.u32 1.1754944e-38, %v873_v11  ;;  %v1051_v30 = vperm.slane %v1049_v54, 0 }
 0x1e6   : > { %1238 = vmatpush.msra.mxu3 %v1042_v1  ;;  %v835_v24 = vsel %vm832_vm3, %v834_v44, %v830_v49  ;;  %v1052_v12 = vperm.slane %v1049_v54, 1 }
 0x1e7   : > { %1171 = vmatmul.f32.vlgmr.msrb.gmra.mxu3 %v1723_v47  ;;  %1222 = vmatpush.msra.mxu2 %v1002_v38  ;;  %v836_v57 = vmul.f32 %v835_v24, %v811_v48  ;;  %v672_v47 = vmul.f32 0.5, %v1624_v40  ;;  %v988_v40 = vld [vmem:[#allocation4 + $0x318] sm:$0xff]  ;;  %vm872_vm7 = vcmp.eq.f32.partialorder %v871_v13, 8.507059e+37 }
 0x1e8   : > { %1239 = vmatpush.msra.mxu3 %v1040_v43 }
 0x1e9   : > { %1223 = vmatpush.msra.mxu2 %v1000_v46  ;;  %v1350_v61 = vclamps-f32 %v836_v57, 1.0  ;;  %v1400_v33 = vpop.eup %1399 }
 0x1ea   : > { %1240 = vmatpush.msra.mxu3 %v1038_v51  ;;  %1191 = vmatmul.f32.vlgmr.msra.gmra.mxu0 %v1738_v34  ;;  %v863_v8 = vmul.f32 %v1400_v33, %v861_v53  ;;  %v1026_v34 = vld [vmem:[#allocation4 + $0x448] sm:$0xff]  ;;  %vm868_vm4 = vweird.f32 %v1400_v33 }
 0x1eb   : > { %1224 = vmatpush.msra.mxu2 %v998_v55  ;;  %v882_v42 = vadd.f32 1.0, %v1350_v61  ;;  %vm869_vm6 = vmor %vm867_vm5, %vm868_vm4 }
 0x1ec   : > { %1241 = vmatpush.msra.mxu3 %v1036_v52  ;;  %v864_v10 = vsub.f32 1.0, %v863_v8 }
 0x1ed   : > { %1225 = vmatpush.msra.mxu2 %v996_v14  ;;  %v887_v50 = vmul.f32 %v882_v42, %v672_v47 }
 0x1ee   : > { %1242 = vmatpush.msra.mxu3 %v1034_v62  ;;  %v865_v56 = vmul.f32 %v1400_v33, %v864_v10 }
 0x1ef   : > { %1226 = vmatpush.msra.mxu2 %v994_v36  ;;  %1131 = vmatmul.f32.vlgmr.msrb.gmra.mxu1 %v887_v50 }
 0x1f0   : > { %1243 = vmatpush.msra.mxu3 %v1032_v2  ;;  %v866_v18 = vadd.f32 %v1400_v33, %v865_v56 }
 0x1f1   : > { %1227 = vmatpush.msra.mxu2 %v992_v3 }
 0x1f2   : > { %1244 = vmatpush.msra.mxu3 %v1030_v5  ;;  %v870_v21 = vsel %vm869_vm6, %v1400_v33, %v866_v18 }
 0x1f3   : > { %1228 = vmatpush.msra.mxu2 %v990_v6  ;;  %v875_v23 = vsel %vm872_vm7, %v874_v19, %v870_v21 }
 0x1f4   : > { %1245 = vmatpush.msra.mxu3 %v1028_v9  ;;  %v876_v25 = vmul.f32 %v875_v23, %v851_v20 }
 0x1f5   : > { %1229 = vmatpush.msra.mxu2 %v988_v40 }
 0x1f6   : > { %1246 = vmatpush.msra.mxu3 %v1026_v34  ;;  %v1351_v28 = vclamps-f32 %v876_v25, 1.0 }
 0x1f7   : > { %1230 = vmatpush.msra.mxu2 %v986_v59  ;;  %1211 = vmatmul.f32.vlgmr.msra.gmra.mxu1 %v1748_v4 }
 0x1f8   : > { %1247 = vmatpush.msra.mxu3 %v1024_v15  ;;  %v883_v29 = vadd.f32 1.0, %v1351_v28 }
 0x1fa   : > { %1248 = vmatpush.msra.mxu3 %v1022_v16  ;;  %v888_v26 = vmul.f32 %v883_v29, %v673_v0 }
 0x1fc   : > { %1249 = vmatpush.msra.mxu3 %v1020_v22  ;;  %1151 = vmatmul.f32.vlgmr.msrb.gmra.mxu2 %v888_v26 }
 0x1fe   : > { %1250 = vmatpush.msra.mxu3 %v1018_v27 }
 0x1ff   : > { %1251 = vmatmul.f32.vlgmr.msra.gmra.mxu3 %v888_v26 }
 0x204   : > { %1231 = vmatmul.f32.vlgmr.msra.gmra.mxu2 %v887_v50 }
 0x25b   : > { %v1072_v31 = vpop.f32.mrf.mxu2 }
 0x25c   : > { %v1073_v4 = vadd.f32 %v1072_v31, %v1051_v30 }
 0x25f   : > { %v1112_v37 = vpop.f32.mrf.mxu0 }
 0x262   : > { %v1092_v32 = vpop.f32.mrf.mxu3 }
 0x263   : > { %v1093_v35 = vadd.f32 %v1092_v32, %v1073_v4 }
 0x265   : > { %v1113_v1 = vadd.f32 %v1112_v37, %v1093_v35 }
 0x267   : > { %v1192_v45 = vpop.f32.mrf.mxu0 }
 0x26a   : > { %v1172_v60 = vpop.f32.mrf.mxu3 }
 0x26b   : > { %v1173_v41 = vadd.f32 %v1172_v60, %v1052_v12 }
 0x26c   : > { %v1132_v38 = vpop.f32.mrf.mxu1 }
 0x26d   : > { %v1133_v39 = vadd.f32 %v1132_v38, %v1113_v1  ;;  %v1193_v46 = vadd.f32 %v1192_v45, %v1173_v41 }
 0x274   : > { %v1212_v48 = vpop.f32.mrf.mxu1 }
 0x275   : > { %v1213_v49 = vadd.f32 %v1212_v48, %v1193_v46 }
 0x27f   : > { %v1152_v43 = vpop.f32.mrf.mxu2 }
 0x280   : > { %v1153_v44 = vadd.f32 %v1152_v43, %v1133_v39 }
 0x282   : > { %1255 = vst [vmem:[%s258_s21] sm:$0xff] %v1153_v44  ;;  %v1252_v53 = vpop.f32.mrf.mxu3 }
 0x287   : > { %v1232_v51 = vpop.f32.mrf.mxu2 }
 0x288   : > { %v1233_v24 = vadd.f32 %v1232_v51, %v1213_v49 }
 0x28a   : > { %v1253_v55 = vadd.f32 %v1252_v53, %v1233_v24 }
 0x28c   : > { %1256 = vst [vmem:[%s258_s21 + $0x8] sm:$0xff] %v1253_v55 }
 0x28d PF: > { %s17_s18 = sadd.s32 1, %s1475_s18  }
 0x28e   : > { %p14_p7 = scmp.ge.s32.totalorder %s17_s18, 5  }
 0x290   :  { %16 = sbr.rel (!%p14_p7) target bundleno = 2 (0x2), region = 79 }
 0x295   :  { %1278 = vsyncpa [#allocation3], 1 }
 0x296   :  { %1280 = vsyncpa [#allocation3 + $0x1], 1 }
 0x297   :  { %1281 = vsyncpa [#allocation5], 1 }

// kernel: _ffn_impl.1
= control target key start
LH: loop header
LB: loop body
LE: loop exit
PB: predicated region body
PF: predicated region fallthrough
CT: control target
= control target key end

     0   :  { %10 = vsyncpa [#allocation3], 0  ;;  %s1774_s0 = inlined_call_operand.vmem [shape: f32[24,256], index: 0, kind: input, shape index: {}]   ;;  %s1775_s1 = inlined_call_operand.hbm [shape: f32[256,640], index: 1, kind: input, shape index: {}]   ;;  %s1776_s2 = inlined_call_operand.vmem [shape: f32[1,640], index: 2, kind: input, shape index: {}]   ;;  %s1777_s3 = inlined_call_operand.hbm [shape: f32[640,256], index: 3, kind: input, shape index: {}]   ;;  %s1778_s4 = inlined_call_operand.vmem [shape: f32[1,256], index: 4, kind: input, shape index: {}]   ;;  %s1779_s5 = inlined_call_operand.vmem [shape: f32[24,256], index: 5, kind: output, shape index: {}]  }
   0x1   :  { %11 = vsyncpa [#allocation5], 0  ;;  %s1513_s18 = smov 0  }
   0x2 LB: > { %s169_s21 = sshll.u32 %s1775_s1, 4  ;;  %s1334_s22 = sadd.s32 4294967295, %s1475_s18   ;;  %s1475_s18 = sphi %s1513_s18, %s17_s18   ;;  %s170_s21 = int_to_ptr.hbm [resolvable:$true] %s169_s21 }
   0x3   : > { %p1336_p0 = scmp.ge.s32.totalorder %s1475_s18, 1  ;;  %p158_p1 = scmp.lt.s32.totalorder %s1475_s18, 4 }
   0x4   : > { %p1371_p2 = scmp.eq.s32.totalorder %s1334_s22, 0  ;;  %s1477_s24 = smov [#allocation2]  }
   0x5   : > { %p1524_p3 = pnand %p1336_p0, %p158_p1  ;;  %s171_s25 = sshll.u32 %s1477_s24, 4  ;;  %s172_s25 = int_to_ptr.vmem [resolvable:$true] %s171_s25 }
   0x6   : > { %s186_s28 = sshll.u32 %s1777_s3, 4  ;;  %s1478_s29 = smov [#allocation4]   ;;  %s187_s28 = int_to_ptr.hbm [resolvable:$true] %s186_s28 }
   0x7   : > { %p1364_p4 = pneg %p1524_p3  ;;  %s188_s30 = sshll.u32 %s1478_s29, 4  ;;  %s189_s30 = int_to_ptr.vmem [resolvable:$true] %s188_s30 }
   0x8   : > { %s1479_s6 = smov 640   ;;  %s1480_s7 = smov 40  }
   0x9   : > { %p1365_p5 = pnand %p1371_p2, %p1364_p4  ;;  %s1481_s8 = smov 256  }
   0xa   : > { %s1482_s9 = smov 16   ;;  %215 = sbr.rel (%p1524_p3) target bundleno = 653 (0x28d), region = 40 }
   0xb   : > { %1367 = dma.hbm_to_vmem [thread:$0]  (!%p1365_p5), %s170_s21, 20480, %s172_s25, [#allocation3], %s1479_s6, %s1479_s6, %s1480_s7  }
   0xc   : > { %1370 = dma.hbm_to_vmem [thread:$0]  (!%p1365_p5), %s187_s28, 20480, %s189_s30, [#allocation5], %s1481_s8, %s1481_s8, %s1482_s9  }
   0xf   : > { %1466 = dma.done.wait (%p1371_p2), [#allocation3], 20480  }
  0x10   : > { %1468 = vsyncadd (%p1371_p2), [#allocation3], 4294946816 }
  0x11   : > { %1470 = dma.done.wait (%p1371_p2), [#allocation5], 20480  }
  0x12   : > { %1472 = vsyncadd (%p1371_p2), [#allocation5], 4294946816  ;;  %p249_p6 = scmp.lt.s32.totalorder %s1334_s22, 2  ;;  %v372_v3 = vld [vmem:[#allocation2 + $0x258] sm:$0xff]  ;;  %v367_v5 = vld [vmem:[#allocation2 + $0x230] sm:$0xff]  ;;  %v267_v29 = vlaneseq }
  0x13   : > { %v452_v4 = vld [vmem:[#allocation2 + $0x4d8] sm:$0xff]  ;;  %469 = vmatpush.msra.mxu0 %v372_v3  ;;  %v447_v6 = vld [vmem:[#allocation2 + $0x4b0] sm:$0xff]  ;;  %v362_v7 = vld [vmem:[#allocation2 + $0x208] sm:$0xff] }
  0x14   : > { %s1784_s22 = smov (!%p249_p6, %s1334_s22), 2  ;;  %489 = vmatpush.msra.mxu1 %v452_v4  ;;  %v442_v8 = vld [vmem:[#allocation2 + $0x488] sm:$0xff]  ;;  %v373_v9 = vld [vmem:[#allocation2 + $0x260] sm:$0xff]  ;;  %v368_v13 = vld [vmem:[#allocation2 + $0x238] sm:$0xff]  ;;  %v268_v38 = vand.u32 127, %v267_v29 }
  0x15   : > { %s1354_s10 = sshll.u32 %s1784_s22, 4  ;;  %470 = vmatpush.msra.mxu0 %v367_v5  ;;  %v453_v10 = vld [vmem:[#allocation2 + $0x4e0] sm:$0xff]  ;;  %509 = vmatpush.msra.mxu2 %v373_v9  ;;  %v352_v14 = vld [vmem:[#allocation2 + $0x1b8] sm:$0xff]  ;;  %v363_v17 = vld [vmem:[#allocation2 + $0x210] sm:$0xff] }
  0x16   : > { %s253_s13 = scalar_lea.vmem %s1774_s0, %s1354_s10  ;;  %490 = vmatpush.msra.mxu1 %v447_v6  ;;  %v357_v11 = vld [vmem:[#allocation2 + $0x1e0] sm:$0xff]  ;;  %529 = vmatpush.msra.mxu3 %v453_v10  ;;  %v448_v15 = vld [vmem:[#allocation2 + $0x4b8] sm:$0xff]  ;;  %v443_v18 = vld [vmem:[#allocation2 + $0x490] sm:$0xff]  ;;  %v269_v47 = vadd.s32 128, %v268_v38  ;;  %s258_s21 = scalar_lea.vmem %s1779_s5, %s1354_s10 }
  0x17   : > { %v1548_v0 = vld [vmem:[%s253_s13] sm:$0xff]  ;;  %v1550_v1 = vld [vmem:[%s253_s13 + $0x8] sm:$0xff]  ;;  %471 = vmatpush.msra.mxu0 %v362_v7  ;;  %v432_v16 = vld [vmem:[#allocation2 + $0x438] sm:$0xff]  ;;  %510 = vmatpush.msra.mxu2 %v368_v13 }
  0x18   : > { %v261_v2 = vadd.f32 %v1550_v1, %v1548_v0  ;;  %v437_v12 = vld [vmem:[#allocation2 + $0x460] sm:$0xff]  ;;  %491 = vmatpush.msra.mxu1 %v442_v8  ;;  %530 = vmatpush.msra.mxu3 %v448_v15  ;;  %v358_v19 = vld [vmem:[#allocation2 + $0x1e8] sm:$0xff]  ;;  %v347_v21 = vld [vmem:[#allocation2 + $0x190] sm:$0xff]  ;;  %vm271_vm0 = vcmp.lt.s32.totalorder %v269_v47, 144 }
  0x19   : > { %472 = vmatpush.msra.mxu0 %v357_v11  ;;  %v438_v20 = vld [vmem:[#allocation2 + $0x468] sm:$0xff]  ;;  %v427_v22 = vld [vmem:[#allocation2 + $0x410] sm:$0xff]  ;;  %511 = vmatpush.msra.mxu2 %v363_v17  ;;  %v353_v23 = vld [vmem:[#allocation2 + $0x1c0] sm:$0xff] }
  0x1a   : > { %262 = vadd.xlane.f32.xlu0 %v261_v2  ;;  %492 = vmatpush.msra.mxu1 %v437_v12  ;;  %v433_v24 = vld [vmem:[#allocation2 + $0x440] sm:$0xff]  ;;  %v342_v25 = vld [vmem:[#allocation2 + $0x168] sm:$0xff]  ;;  %v348_v27 = vld [vmem:[#allocation2 + $0x198] sm:$0xff] }
  0x1b   : > { %531 = vmatpush.msra.mxu3 %v443_v18  ;;  %473 = vmatpush.msra.mxu0 %v352_v14  ;;  %v422_v26 = vld [vmem:[#allocation2 + $0x3e8] sm:$0xff]  ;;  %v428_v28 = vld [vmem:[#allocation2 + $0x418] sm:$0xff]  ;;  %v337_v30 = vld [vmem:[#allocation2 + $0x140] sm:$0xff] }
  0x1c   : > { %493 = vmatpush.msra.mxu1 %v432_v16  ;;  %512 = vmatpush.msra.mxu2 %v358_v19  ;;  %v417_v31 = vld [vmem:[#allocation2 + $0x3c0] sm:$0xff]  ;;  %v343_v32 = vld [vmem:[#allocation2 + $0x170] sm:$0xff]  ;;  %v332_v34 = vld [vmem:[#allocation2 + $0x118] sm:$0xff] }
  0x1d   : > { %532 = vmatpush.msra.mxu3 %v438_v20  ;;  %474 = vmatpush.msra.mxu0 %v347_v21  ;;  %v423_v33 = vld [vmem:[#allocation2 + $0x3f0] sm:$0xff]  ;;  %v412_v35 = vld [vmem:[#allocation2 + $0x398] sm:$0xff]  ;;  %v338_v36 = vld [vmem:[#allocation2 + $0x148] sm:$0xff] }
  0x1e   : > { %494 = vmatpush.msra.mxu1 %v427_v22  ;;  %513 = vmatpush.msra.mxu2 %v353_v23  ;;  %v418_v37 = vld [vmem:[#allocation2 + $0x3c8] sm:$0xff]  ;;  %v327_v39 = vld [vmem:[#allocation2 + $0xf0] sm:$0xff]  ;;  %v333_v41 = vld [vmem:[#allocation2 + $0x120] sm:$0xff] }
  0x1f   : > { %533 = vmatpush.msra.mxu3 %v433_v24  ;;  %475 = vmatpush.msra.mxu0 %v342_v25  ;;  %v407_v40 = vld [vmem:[#allocation2 + $0x370] sm:$0xff]  ;;  %v413_v42 = vld [vmem:[#allocation2 + $0x3a0] sm:$0xff]  ;;  %v322_v43 = vld [vmem:[#allocation2 + $0xc8] sm:$0xff] }
  0x20   : > { %495 = vmatpush.msra.mxu1 %v422_v26  ;;  %514 = vmatpush.msra.mxu2 %v348_v27  ;;  %v402_v44 = vld [vmem:[#allocation2 + $0x348] sm:$0xff]  ;;  %v328_v45 = vld [vmem:[#allocation2 + $0xf8] sm:$0xff]  ;;  %v317_v48 = vld [vmem:[#allocation2 + $0xa0] sm:$0xff] }
  0x21   : > { %534 = vmatpush.msra.mxu3 %v428_v28  ;;  %476 = vmatpush.msra.mxu0 %v337_v30  ;;  %v408_v46 = vld [vmem:[#allocation2 + $0x378] sm:$0xff]  ;;  %v397_v49 = vld [vmem:[#allocation2 + $0x320] sm:$0xff]  ;;  %v323_v50 = vld [vmem:[#allocation2 + $0xd0] sm:$0xff] }
  0x22   : > { %496 = vmatpush.msra.mxu1 %v417_v31  ;;  %515 = vmatpush.msra.mxu2 %v343_v32  ;;  %v403_v51 = vld [vmem:[#allocation2 + $0x350] sm:$0xff]  ;;  %v312_v53 = vld [vmem:[#allocation2 + $0x78] sm:$0xff]  ;;  %v318_v56 = vld [vmem:[#allocation2 + $0xa8] sm:$0xff] }
  0x23   : > { %535 = vmatpush.msra.mxu3 %v423_v33  ;;  %477 = vmatpush.msra.mxu0 %v332_v34  ;;  %v392_v54 = vld [vmem:[#allocation2 + $0x2f8] sm:$0xff]  ;;  %v398_v57 = vld [vmem:[#allocation2 + $0x328] sm:$0xff]  ;;  %v307_v58 = vld [vmem:[#allocation2 + $0x50] sm:$0xff] }
  0x24   : > { %497 = vmatpush.msra.mxu1 %v412_v35  ;;  %516 = vmatpush.msra.mxu2 %v338_v36  ;;  %v387_v59 = vld [vmem:[#allocation2 + $0x2d0] sm:$0xff]  ;;  %v313_v62 = vld [vmem:[#allocation2 + $0x80] sm:$0xff]  ;;  %v302_v2 = vld [vmem:[#allocation2 + $0x28] sm:$0xff] }
  0x25   : > { %536 = vmatpush.msra.mxu3 %v418_v37  ;;  %478 = vmatpush.msra.mxu0 %v327_v39  ;;  %v393_v63 = vld [vmem:[#allocation2 + $0x300] sm:$0xff]  ;;  %v382_v3 = vld [vmem:[#allocation2 + $0x2a8] sm:$0xff]  ;;  %v308_v6 = vld [vmem:[#allocation2 + $0x58] sm:$0xff] }
  0x26   : > { %498 = vmatpush.msra.mxu1 %v407_v40  ;;  %517 = vmatpush.msra.mxu2 %v333_v41  ;;  %v297_v7 = vld [vmem:[#allocation2] sm:$0xff]  ;;  %v374_v9 = vld [vmem:[#allocation2 + $0x268] sm:$0xff]  ;;  %v303_v12 = vld [vmem:[#allocation2 + $0x30] sm:$0xff] }
  0x27   : > { %537 = vmatpush.msra.mxu3 %v413_v42  ;;  %479 = vmatpush.msra.mxu0 %v322_v43  ;;  %v377_v8 = vld [vmem:[#allocation2 + $0x280] sm:$0xff]  ;;  %v454_v11 = vld [vmem:[#allocation2 + $0x4e8] sm:$0xff]  ;;  %v383_v14 = vld [vmem:[#allocation2 + $0x2b0] sm:$0xff] }
  0x28   : > { %499 = vmatpush.msra.mxu1 %v402_v44  ;;  %518 = vmatpush.msra.mxu2 %v328_v45  ;;  %v369_v13 = vld [vmem:[#allocation2 + $0x240] sm:$0xff]  ;;  %v364_v16 = vld [vmem:[#allocation2 + $0x218] sm:$0xff]  ;;  %v359_v18 = vld [vmem:[#allocation2 + $0x1f0] sm:$0xff] }
  0x29   : > { %538 = vmatpush.msra.mxu3 %v408_v46  ;;  %480 = vmatpush.msra.mxu0 %v317_v48  ;;  %v449_v15 = vld [vmem:[#allocation2 + $0x4c0] sm:$0xff]  ;;  %v444_v17 = vld [vmem:[#allocation2 + $0x498] sm:$0xff]  ;;  %v439_v19 = vld [vmem:[#allocation2 + $0x470] sm:$0xff] }
  0x2a   : > { %500 = vmatpush.msra.mxu1 %v397_v49  ;;  %519 = vmatpush.msra.mxu2 %v323_v50  ;;  %v298_v20 = vld [vmem:[#allocation2 + $0x8] sm:$0xff]  ;;  %v375_v24 = vld [vmem:[#allocation2 + $0x270] sm:$0xff]  ;;  %v349_v26 = vld [vmem:[#allocation2 + $0x1a0] sm:$0xff] }
  0x2b   : > { %539 = vmatpush.msra.mxu3 %v403_v51  ;;  %481 = vmatpush.msra.mxu0 %v312_v53  ;;  %v378_v21 = vld [vmem:[#allocation2 + $0x288] sm:$0xff]  ;;  %v455_v25 = vld [vmem:[#allocation2 + $0x4f0] sm:$0xff]  ;;  %v429_v27 = vld [vmem:[#allocation2 + $0x420] sm:$0xff] }
  0x2c   : > { %501 = vmatpush.msra.mxu1 %v392_v54  ;;  %520 = vmatpush.msra.mxu2 %v318_v56  ;;  %v354_v22 = vld [vmem:[#allocation2 + $0x1c8] sm:$0xff]  ;;  %v344_v30 = vld [vmem:[#allocation2 + $0x178] sm:$0xff]  ;;  %v365_v32 = vld [vmem:[#allocation2 + $0x220] sm:$0xff] }
  0x2d   : > { %540 = vmatpush.msra.mxu3 %v398_v57  ;;  %482 = vmatpush.msra.mxu0 %v307_v58  ;;  %v434_v23 = vld [vmem:[#allocation2 + $0x448] sm:$0xff]  ;;  %v424_v31 = vld [vmem:[#allocation2 + $0x3f8] sm:$0xff]  ;;  %v445_v33 = vld [vmem:[#allocation2 + $0x4a0] sm:$0xff] }
  0x2e   : > { %502 = vmatpush.msra.mxu1 %v387_v59  ;;  %521 = vmatpush.msra.mxu2 %v313_v62  ;;  %v370_v28 = vld [vmem:[#allocation2 + $0x248] sm:$0xff]  ;;  %v339_v34 = vld [vmem:[#allocation2 + $0x150] sm:$0xff]  ;;  %v360_v36 = vld [vmem:[#allocation2 + $0x1f8] sm:$0xff] }
  0x2f   : > { %541 = vmatpush.msra.mxu3 %v393_v63  ;;  %483 = vmatpush.msra.mxu0 %v302_v2  ;;  %v450_v29 = vld [vmem:[#allocation2 + $0x4c8] sm:$0xff]  ;;  %v419_v35 = vld [vmem:[#allocation2 + $0x3d0] sm:$0xff]  ;;  %v440_v37 = vld [vmem:[#allocation2 + $0x478] sm:$0xff] }
  0x30   : > { %503 = vmatpush.msra.mxu1 %v382_v3  ;;  %522 = vmatpush.msra.mxu2 %v308_v6  ;;  %v334_v38 = vld [vmem:[#allocation2 + $0x128] sm:$0xff]  ;;  %v355_v40 = vld [vmem:[#allocation2 + $0x1d0] sm:$0xff]  ;;  %v329_v42 = vld [vmem:[#allocation2 + $0x100] sm:$0xff] }
  0x31   : > { %484 = vmatpush.msra.mxu0 %v297_v7  ;;  %v414_v39 = vld [vmem:[#allocation2 + $0x3a8] sm:$0xff]  ;;  %v435_v41 = vld [vmem:[#allocation2 + $0x450] sm:$0xff]  ;;  %v409_v43 = vld [vmem:[#allocation2 + $0x380] sm:$0xff] }
  0x32   : > { %504 = vmatpush.msra.mxu1 %v377_v8  ;;  %523 = vmatpush.msra.mxu2 %v303_v12  ;;  %v350_v44 = vld [vmem:[#allocation2 + $0x1a8] sm:$0xff]  ;;  %v324_v46 = vld [vmem:[#allocation2 + $0xd8] sm:$0xff]  ;;  %v345_v48 = vld [vmem:[#allocation2 + $0x180] sm:$0xff] }
  0x33   : > { %549 = vmatpush.msrb.mxu0 %v374_v9  ;;  %v430_v45 = vld [vmem:[#allocation2 + $0x428] sm:$0xff]  ;;  %v404_v47 = vld [vmem:[#allocation2 + $0x358] sm:$0xff]  ;;  %v425_v49 = vld [vmem:[#allocation2 + $0x400] sm:$0xff] }
  0x34   : > { %569 = vmatpush.msrb.mxu1 %v454_v11  ;;  %524 = vmatpush.msra.mxu2 %v298_v20  ;;  %v319_v50 = vld [vmem:[#allocation2 + $0xb0] sm:$0xff]  ;;  %v420_v53 = vld [vmem:[#allocation2 + $0x3d8] sm:$0xff]  ;;  %v314_v54 = vld [vmem:[#allocation2 + $0x88] sm:$0xff] }
  0x35   : > { %550 = vmatpush.msrb.mxu0 %v369_v13  ;;  %v399_v51 = vld [vmem:[#allocation2 + $0x330] sm:$0xff]  ;;  %v309_v58 = vld [vmem:[#allocation2 + $0x60] sm:$0xff]  ;;  %v410_v62 = vld [vmem:[#allocation2 + $0x388] sm:$0xff] }
  0x36   : > { %570 = vmatpush.msrb.mxu1 %v449_v15  ;;  %589 = vmatpush.msrb.mxu2 %v375_v24  ;;  %v335_v56 = vld [vmem:[#allocation2 + $0x130] sm:$0xff]  ;;  %v389_v59 = vld [vmem:[#allocation2 + $0x2e0] sm:$0xff]  ;;  %v304_v63 = vld [vmem:[#allocation2 + $0x38] sm:$0xff] }
  0x37   : > { %551 = vmatpush.msrb.mxu0 %v364_v16  ;;  %v415_v57 = vld [vmem:[#allocation2 + $0x3b0] sm:$0xff]  ;;  %v384_v2 = vld [vmem:[#allocation2 + $0x2b8] sm:$0xff]  ;;  %v325_v3 = vld [vmem:[#allocation2 + $0xe0] sm:$0xff] }
  0x38   : > { %571 = vmatpush.msrb.mxu1 %v444_v17  ;;  %590 = vmatpush.msrb.mxu2 %v370_v28  ;;  %v299_v6 = vld [vmem:[#allocation2 + $0x10] sm:$0xff]  ;;  %v400_v7 = vld [vmem:[#allocation2 + $0x338] sm:$0xff]  ;;  %v390_v11 = vld [vmem:[#allocation2 + $0x2e8] sm:$0xff] }
  0x39   : > { %552 = vmatpush.msrb.mxu0 %v359_v18  ;;  %v315_v8 = vld [vmem:[#allocation2 + $0x90] sm:$0xff]  ;;  %v305_v12 = vld [vmem:[#allocation2 + $0x40] sm:$0xff]  ;;  %v300_v16 = vld [vmem:[#allocation2 + $0x18] sm:$0xff] }
  0x3a   : > { %572 = vmatpush.msrb.mxu1 %v439_v19  ;;  %591 = vmatpush.msrb.mxu2 %v365_v32  ;;  %v395_v9 = vld [vmem:[#allocation2 + $0x310] sm:$0xff]  ;;  %v385_v13 = vld [vmem:[#allocation2 + $0x2c0] sm:$0xff]  ;;  %v380_v17 = vld [vmem:[#allocation2 + $0x298] sm:$0xff] }
  0x3b   : > { %553 = vmatpush.msrb.mxu0 %v354_v22  ;;  %v376_v28 = vld [vmem:[#allocation2 + $0x278] sm:$0xff]  ;;  %v366_v32 = vld [vmem:[#allocation2 + $0x228] sm:$0xff] }
  0x3c   : > { %573 = vmatpush.msrb.mxu1 %v434_v23  ;;  %592 = vmatpush.msrb.mxu2 %v360_v36  ;;  %v351_v36 = vld [vmem:[#allocation2 + $0x1b0] sm:$0xff] }
  0x3d   : > { %554 = vmatpush.msrb.mxu0 %v349_v26 }
  0x3e   : > { %574 = vmatpush.msrb.mxu1 %v429_v27  ;;  %593 = vmatpush.msrb.mxu2 %v355_v40  ;;  %v341_v40 = vld [vmem:[#allocation2 + $0x160] sm:$0xff] }
  0x3f   : > { %555 = vmatpush.msrb.mxu0 %v344_v30  ;;  %v371_v30 = vld [vmem:[#allocation2 + $0x250] sm:$0xff] }
  0x40   : > { %575 = vmatpush.msrb.mxu1 %v424_v31  ;;  %594 = vmatpush.msrb.mxu2 %v350_v44  ;;  %v451_v31 = vld [vmem:[#allocation2 + $0x4d0] sm:$0xff] }
  0x41   : > { %556 = vmatpush.msrb.mxu0 %v339_v34  ;;  %v356_v34 = vld [vmem:[#allocation2 + $0x1d8] sm:$0xff]  ;;  %v331_v44 = vld [vmem:[#allocation2 + $0x110] sm:$0xff] }
  0x42   : > { %576 = vmatpush.msrb.mxu1 %v419_v35  ;;  %595 = vmatpush.msrb.mxu2 %v345_v48  ;;  %v436_v35 = vld [vmem:[#allocation2 + $0x458] sm:$0xff]  ;;  %v321_v48 = vld [vmem:[#allocation2 + $0xc0] sm:$0xff] }
  0x43   : > { %557 = vmatpush.msrb.mxu0 %v334_v38  ;;  %v346_v38 = vld [vmem:[#allocation2 + $0x188] sm:$0xff] }
  0x44   : > { %577 = vmatpush.msrb.mxu1 %v414_v39  ;;  %v426_v39 = vld [vmem:[#allocation2 + $0x408] sm:$0xff] }
  0x45   : > { %558 = vmatpush.msrb.mxu0 %v329_v42  ;;  %v336_v42 = vld [vmem:[#allocation2 + $0x138] sm:$0xff] }
  0x46   : > { %578 = vmatpush.msrb.mxu1 %v409_v43  ;;  %v416_v43 = vld [vmem:[#allocation2 + $0x3b8] sm:$0xff] }
  0x47   : > { %559 = vmatpush.msrb.mxu0 %v324_v46  ;;  %v326_v46 = vld [vmem:[#allocation2 + $0xe8] sm:$0xff] }
  0x48   : > { %579 = vmatpush.msrb.mxu1 %v404_v47  ;;  %v406_v47 = vld [vmem:[#allocation2 + $0x368] sm:$0xff] }
  0x49   : > { %560 = vmatpush.msrb.mxu0 %v319_v50  ;;  %v316_v50 = vld [vmem:[#allocation2 + $0x98] sm:$0xff] }
  0x4a   : > { %580 = vmatpush.msrb.mxu1 %v399_v51  ;;  %v396_v51 = vld [vmem:[#allocation2 + $0x318] sm:$0xff] }
  0x4b   : > { %561 = vmatpush.msrb.mxu0 %v314_v54  ;;  %v306_v54 = vld [vmem:[#allocation2 + $0x48] sm:$0xff] }
  0x4d   : > { %562 = vmatpush.msrb.mxu0 %v309_v58  ;;  %v951_v58 = vld [vmem:[#allocation4 + $0x1f0] sm:$0xff] }
  0x4f   : > { %563 = vmatpush.msrb.mxu0 %v304_v63  ;;  %v947_v63 = vld [vmem:[#allocation4 + $0x1d0] sm:$0xff] }
  0x51   : > { %564 = vmatpush.msrb.mxu0 %v299_v6  ;;  %v943_v6 = vld [vmem:[#allocation4 + $0x1b0] sm:$0xff] }
  0x8d   : > { %v263_v52 = vpop.xlane.xlu0 %262 }
  0x8e   : > { %v264_v55 = vmul.f32 0.0069444445, %v263_v52  ;;  %v340_v52 = vld [vmem:[#allocation2 + $0x158] sm:$0xff] }
  0x8f   : > { %596 = vmatpush.msrb.mxu2 %v340_v52  ;;  %v311_v52 = vld [vmem:[#allocation2 + $0x70] sm:$0xff] }
  0x90   : > { %v1555_v60 = vsub.f32 %v1548_v0, %v264_v55  ;;  %v266_v61 = vsub.f32 %v1550_v1, %v264_v55  ;;  %v388_v0 = vld [vmem:[#allocation2 + $0x2d8] sm:$0xff]  ;;  %v394_v55 = vld [vmem:[#allocation2 + $0x308] sm:$0xff] }
  0x91   : > { %542 = vmatpush.msra.mxu3 %v388_v0  ;;  %581 = vmatpush.msrb.mxu1 %v394_v55  ;;  %v379_v0 = vld [vmem:[#allocation2 + $0x290] sm:$0xff]  ;;  %v386_v55 = vld [vmem:[#allocation2 + $0x2c8] sm:$0xff] }
  0x92   : > { %v1558_v4 = vsel %vm271_vm0, %v266_v61, 0.0  ;;  %v278_v5 = vmul.f32 %v1555_v60, %v1555_v60  ;;  %597 = vmatpush.msrb.mxu2 %v335_v56  ;;  %v330_v61 = vld [vmem:[#allocation2 + $0x108] sm:$0xff]  ;;  %v301_v56 = vld [vmem:[#allocation2 + $0x20] sm:$0xff] }
  0x93   : > { %v279_v1 = vmul.f32 %v1558_v4, %v1558_v4  ;;  %543 = vmatpush.msra.mxu3 %v383_v14  ;;  %582 = vmatpush.msrb.mxu1 %v389_v59  ;;  %v919_v59 = vld [vmem:[#allocation4 + $0xf0] sm:$0xff] }
  0x94   : > { %598 = vmatpush.msrb.mxu2 %v330_v61  ;;  %v949_v61 = vld [vmem:[#allocation4 + $0x1e0] sm:$0xff] }
  0x95   : > { %v280_v10 = vadd.f32 %v279_v1, %v278_v5  ;;  %544 = vmatpush.msra.mxu3 %v378_v21  ;;  %583 = vmatpush.msrb.mxu1 %v384_v2  ;;  %v405_v5 = vld [vmem:[#allocation2 + $0x360] sm:$0xff]  ;;  %v320_v1 = vld [vmem:[#allocation2 + $0xb8] sm:$0xff]  ;;  %v915_v2 = vld [vmem:[#allocation4 + $0xd0] sm:$0xff] }
  0x96   : > { %599 = vmatpush.msrb.mxu2 %v325_v3  ;;  %v945_v3 = vld [vmem:[#allocation4 + $0x1c0] sm:$0xff] }
  0x97   : > { %281 = vadd.xlane.f32.xlu0 %v280_v10  ;;  %609 = vmatpush.msrb.mxu3 %v455_v25  ;;  %v310_v10 = vld [vmem:[#allocation2 + $0x68] sm:$0xff] }
  0x98   : > { %584 = vmatpush.msrb.mxu1 %v379_v0  ;;  %600 = vmatpush.msrb.mxu2 %v320_v1  ;;  %v911_v0 = vld [vmem:[#allocation4 + $0xb0] sm:$0xff]  ;;  %v941_v1 = vld [vmem:[#allocation4 + $0x1a0] sm:$0xff] }
  0x99   : > { %610 = vmatpush.msrb.mxu3 %v450_v29  ;;  %v456_v29 = vld [vmem:[#allocation2 + $0x4f8] sm:$0xff] }
  0x9a   : > { %601 = vmatpush.msrb.mxu2 %v315_v8  ;;  %v909_v8 = vld [vmem:[#allocation4 + $0xa0] sm:$0xff] }
  0x9b   : > { %611 = vmatpush.msrb.mxu3 %v445_v33  ;;  %v441_v33 = vld [vmem:[#allocation2 + $0x480] sm:$0xff] }
  0x9c   : > { %602 = vmatpush.msrb.mxu2 %v310_v10  ;;  %v981_v10 = vld [vmem:[#allocation4 + $0x2e0] sm:$0xff] }
  0x9d   : > { %612 = vmatpush.msrb.mxu3 %v440_v37  ;;  %v431_v37 = vld [vmem:[#allocation2 + $0x430] sm:$0xff] }
  0x9e   : > { %603 = vmatpush.msrb.mxu2 %v305_v12  ;;  %v937_v12 = vld [vmem:[#allocation4 + $0x180] sm:$0xff] }
  0x9f   : > { %613 = vmatpush.msrb.mxu3 %v435_v41  ;;  %v421_v41 = vld [vmem:[#allocation2 + $0x3e0] sm:$0xff] }
  0xa0   : > { %604 = vmatpush.msrb.mxu2 %v300_v16  ;;  %v935_v16 = vld [vmem:[#allocation4 + $0x170] sm:$0xff] }
  0xa1   : > { %614 = vmatpush.msrb.mxu3 %v430_v45  ;;  %v411_v45 = vld [vmem:[#allocation2 + $0x390] sm:$0xff] }
  0xa3   : > { %615 = vmatpush.msrb.mxu3 %v425_v49  ;;  %v401_v49 = vld [vmem:[#allocation2 + $0x340] sm:$0xff] }
  0xa5   : > { %616 = vmatpush.msrb.mxu3 %v420_v53  ;;  %v391_v53 = vld [vmem:[#allocation2 + $0x2f0] sm:$0xff] }
  0xa7   : > { %617 = vmatpush.msrb.mxu3 %v415_v57  ;;  %v381_v57 = vld [vmem:[#allocation2 + $0x2a0] sm:$0xff] }
  0xa9   : > { %618 = vmatpush.msrb.mxu3 %v410_v62  ;;  %v917_v62 = vld [vmem:[#allocation4 + $0xe0] sm:$0xff] }
  0xab   : > { %619 = vmatpush.msrb.mxu3 %v405_v5  ;;  %v913_v5 = vld [vmem:[#allocation4 + $0xc0] sm:$0xff] }
  0xad   : > { %620 = vmatpush.msrb.mxu3 %v400_v7  ;;  %v983_v7 = vld [vmem:[#allocation4 + $0x2f0] sm:$0xff] }
  0xaf   : > { %621 = vmatpush.msrb.mxu3 %v395_v9  ;;  %v939_v9 = vld [vmem:[#allocation4 + $0x190] sm:$0xff] }
  0xb1   : > { %622 = vmatpush.msrb.mxu3 %v390_v11  ;;  %v907_v11 = vld [vmem:[#allocation4 + $0x90] sm:$0xff] }
  0xb3   : > { %623 = vmatpush.msrb.mxu3 %v385_v13  ;;  %v979_v13 = vld [vmem:[#allocation4 + $0x2d0] sm:$0xff] }
  0xb5   : > { %624 = vmatpush.msrb.mxu3 %v380_v17  ;;  %v977_v17 = vld [vmem:[#allocation4 + $0x2c0] sm:$0xff] }
 0x10a   : > { %v282_v14 = vpop.xlane.xlu0 %281 }
 0x10b   : > { %v283_v15 = vmul.f32 0.0069444445, %v282_v14  ;;  %v1583_v14 = vld [vmem:[%s1776_s2] sm:$0x1f] }
 0x10d   : > { %v284_v18 = vadd.f32 6.1e-05, %v283_v15  ;;  %v905_v15 = vld [vmem:[#allocation4 + $0x80] sm:$0xff] }
 0x10f   : > { %1389 = vrsqrt.f32 %v284_v18  ;;  %vm291_vm2 = vweird.f32 %v284_v18 }
 0x115   : > { %v1390_v19 = vpop.eup %1389 }
 0x116   : > { %v286_v20 = vmul.f32 %v1390_v19, %v284_v18  ;;  %vm292_vm1 = vweird.f32 %v1390_v19  ;;  %v1015_v18 = vld [vmem:[#allocation4 + $0x3f0] sm:$0xff] }
 0x117   : > { %vm293_vm3 = vmor %vm291_vm2, %vm292_vm1 }
 0x118   : > { %v287_v21 = vmul.f32 %v1390_v19, %v286_v20  ;;  %v933_v20 = vld [vmem:[#allocation4 + $0x160] sm:$0xff] }
 0x11a   : > { %v288_v22 = vmul.f32 0.5, %v287_v21  ;;  %v975_v21 = vld [vmem:[#allocation4 + $0x2b0] sm:$0xff] }
 0x11c   : > { %v289_v23 = vsub.f32 1.5, %v288_v22  ;;  %v459_v22 = vperm.slane %v1583_v14, 0 }
 0x11e   : > { %v290_v24 = vmul.f32 %v1390_v19, %v289_v23  ;;  %v1013_v23 = vld [vmem:[#allocation4 + $0x3e0] sm:$0xff] }
 0x120   : > { %v294_v25 = vsel %vm293_vm3, %v1390_v19, %v290_v24  ;;  %v903_v19 = vld [vmem:[#allocation4 + $0x70] sm:$0xff]  ;;  %v901_v24 = vld [vmem:[#allocation4 + $0x60] sm:$0xff] }
 0x121   : > { %v1565_v26 = vmul.f32 %v294_v25, %v1555_v60  ;;  %v1568_v27 = vmul.f32 %v294_v25, %v1558_v4  ;;  %v446_v60 = vld [vmem:[#allocation2 + $0x4a8] sm:$0xff]  ;;  %v361_v4 = vld [vmem:[#allocation2 + $0x200] sm:$0xff]  ;;  %v931_v25 = vld [vmem:[#allocation4 + $0x150] sm:$0xff] }
 0x123   : > { %485 = vmatmul.f32.vlgmr.msra.gmra.mxu0 %v1565_v26  ;;  %505 = vmatmul.f32.vlgmr.msra.gmra.mxu1 %v1568_v27 }
 0x124   : > { %525 = vmatmul.f32.vlgmr.msra.gmra.mxu2 %v1565_v26  ;;  %545 = vmatmul.f32.vlgmr.msra.gmra.mxu3 %v1568_v27 }
 0x125   : > { %629 = vmatpush.msra.mxu0 %v376_v28  ;;  %649 = vmatpush.msra.mxu1 %v456_v29  ;;  %v899_v29 = vld [vmem:[#allocation4 + $0x50] sm:$0xff] }
 0x126   : > { %1075 = vmatpush.msra.mxu3 %v951_v58  ;;  %1055 = vmatpush.msra.mxu2 %v919_v59  ;;  %v1001_v58 = vld [vmem:[#allocation4 + $0x380] sm:$0xff] }
 0x127   : > { %630 = vmatpush.msra.mxu0 %v371_v30  ;;  %650 = vmatpush.msra.mxu1 %v451_v31  ;;  %v929_v30 = vld [vmem:[#allocation4 + $0x140] sm:$0xff]  ;;  %v971_v31 = vld [vmem:[#allocation4 + $0x290] sm:$0xff] }
 0x128   : > { %1076 = vmatpush.msra.mxu3 %v949_v61  ;;  %1056 = vmatpush.msra.mxu2 %v917_v62  ;;  %v920_v62 = vld [vmem:[#allocation4 + $0xf8] sm:$0xff] }
 0x129   : > { %631 = vmatpush.msra.mxu0 %v366_v32  ;;  %651 = vmatpush.msra.mxu1 %v446_v60 }
 0x12a   : > { %1077 = vmatpush.msra.mxu3 %v947_v63  ;;  %1057 = vmatpush.msra.mxu2 %v915_v2 }
 0x12b   : > { %632 = vmatpush.msra.mxu0 %v361_v4  ;;  %652 = vmatpush.msra.mxu1 %v441_v33  ;;  %v1009_v4 = vld [vmem:[#allocation4 + $0x3c0] sm:$0xff] }
 0x12c   : > { %565 = vmatmul.f32.vlgmr.msrb.gmra.mxu0 %v1565_v26  ;;  %585 = vmatmul.f32.vlgmr.msrb.gmra.mxu1 %v1568_v27  ;;  %v897_v33 = vld [vmem:[#allocation4 + $0x40] sm:$0xff] }
 0x12d   : > { %605 = vmatmul.f32.vlgmr.msrb.gmra.mxu2 %v1565_v26  ;;  %625 = vmatmul.f32.vlgmr.msrb.gmra.mxu3 %v1568_v27 }
 0x12e   : > { %633 = vmatpush.msra.mxu0 %v356_v34  ;;  %653 = vmatpush.msra.mxu1 %v436_v35  ;;  %v927_v34 = vld [vmem:[#allocation4 + $0x130] sm:$0xff]  ;;  %v969_v35 = vld [vmem:[#allocation4 + $0x280] sm:$0xff] }
 0x12f   : > { %1078 = vmatpush.msra.mxu3 %v945_v3  ;;  %1058 = vmatpush.msra.mxu2 %v913_v5  ;;  %v889_v5 = vld [vmem:[#allocation4] sm:$0xff] }
 0x130   : > { %634 = vmatpush.msra.mxu0 %v351_v36  ;;  %654 = vmatpush.msra.mxu1 %v431_v37  ;;  %v1007_v37 = vld [vmem:[#allocation4 + $0x3b0] sm:$0xff] }
 0x131   : > { %1079 = vmatpush.msra.mxu3 %v943_v6  ;;  %1059 = vmatpush.msra.mxu2 %v911_v0  ;;  %v961_v6 = vld [vmem:[#allocation4 + $0x240] sm:$0xff] }
 0x132   : > { %635 = vmatpush.msra.mxu0 %v346_v38  ;;  %655 = vmatpush.msra.mxu1 %v426_v39  ;;  %v460_v38 = vperm.slane %v1583_v14, 1  ;;  %v895_v39 = vld [vmem:[#allocation4 + $0x30] sm:$0xff] }
 0x133   : > { %1080 = vmatpush.msra.mxu3 %v941_v1  ;;  %1060 = vmatpush.msra.mxu2 %v909_v8  ;;  %v999_v8 = vld [vmem:[#allocation4 + $0x370] sm:$0xff] }
 0x134   : > { %636 = vmatpush.msra.mxu0 %v341_v40  ;;  %656 = vmatpush.msra.mxu1 %v421_v41  ;;  %v925_v40 = vld [vmem:[#allocation4 + $0x120] sm:$0xff]  ;;  %v967_v41 = vld [vmem:[#allocation4 + $0x270] sm:$0xff] }
 0x135   : > { %1081 = vmatpush.msra.mxu3 %v939_v9  ;;  %1061 = vmatpush.msra.mxu2 %v907_v11  ;;  %v1047_v9 = vld [vmem:[#allocation4 + $0x4f0] sm:$0xff] }
 0x136   : > { %637 = vmatpush.msra.mxu0 %v336_v42  ;;  %657 = vmatpush.msra.mxu1 %v416_v43  ;;  %v1005_v43 = vld [vmem:[#allocation4 + $0x3a0] sm:$0xff] }
 0x137   : > { %1082 = vmatpush.msra.mxu3 %v937_v12  ;;  %1062 = vmatpush.msra.mxu2 %v905_v15  ;;  %v997_v15 = vld [vmem:[#allocation4 + $0x360] sm:$0xff] }
 0x138   : > { %638 = vmatpush.msra.mxu0 %v331_v44  ;;  %658 = vmatpush.msra.mxu1 %v411_v45  ;;  %v461_v44 = vperm.slane %v1583_v14, 2  ;;  %v893_v45 = vld [vmem:[#allocation4 + $0x20] sm:$0xff] }
 0x139   : > { %1083 = vmatpush.msra.mxu3 %v935_v16  ;;  %1063 = vmatpush.msra.mxu2 %v903_v19  ;;  %v916_v19 = vld [vmem:[#allocation4 + $0xd8] sm:$0xff] }
 0x13a   : > { %639 = vmatpush.msra.mxu0 %v326_v46  ;;  %659 = vmatpush.msra.mxu1 %v406_v47  ;;  %v923_v46 = vld [vmem:[#allocation4 + $0x110] sm:$0xff]  ;;  %v965_v47 = vld [vmem:[#allocation4 + $0x260] sm:$0xff] }
 0x13b   : > { %1084 = vmatpush.msra.mxu3 %v933_v20  ;;  %1064 = vmatpush.msra.mxu2 %v901_v24 }
 0x13c   : > { %640 = vmatpush.msra.mxu0 %v321_v48  ;;  %660 = vmatpush.msra.mxu1 %v401_v49 }
 0x13d   : > { %1085 = vmatpush.msra.mxu3 %v931_v25  ;;  %1065 = vmatpush.msra.mxu2 %v899_v29 }
 0x13e   : > { %641 = vmatpush.msra.mxu0 %v316_v50  ;;  %661 = vmatpush.msra.mxu1 %v396_v51  ;;  %v1003_v50 = vld [vmem:[#allocation4 + $0x390] sm:$0xff] }
 0x13f   : > { %1086 = vmatpush.msra.mxu3 %v929_v30  ;;  %1066 = vmatpush.msra.mxu2 %v897_v33 }
 0x140   : > { %642 = vmatpush.msra.mxu0 %v311_v52  ;;  %662 = vmatpush.msra.mxu1 %v391_v53  ;;  %v891_v53 = vld [vmem:[#allocation4 + $0x10] sm:$0xff] }
 0x141   : > { %1087 = vmatpush.msra.mxu3 %v927_v34  ;;  %1067 = vmatpush.msra.mxu2 %v895_v39 }
 0x142   : > { %643 = vmatpush.msra.mxu0 %v306_v54  ;;  %663 = vmatpush.msra.mxu1 %v386_v55  ;;  %v921_v54 = vld [vmem:[#allocation4 + $0x100] sm:$0xff]  ;;  %v963_v55 = vld [vmem:[#allocation4 + $0x250] sm:$0xff] }
 0x143   : > { %1088 = vmatpush.msra.mxu3 %v925_v40  ;;  %1068 = vmatpush.msra.mxu2 %v893_v45 }
 0x144   : > { %644 = vmatpush.msra.mxu0 %v301_v56  ;;  %664 = vmatpush.msra.mxu1 %v381_v57 }
 0x145   : > { %645 = vmatmul.f32.vlgmr.msra.gmra.mxu0 %v1565_v26  ;;  %665 = vmatmul.f32.vlgmr.msra.gmra.mxu1 %v1568_v27  ;;  %v973_v26 = vld [vmem:[#allocation4 + $0x2a0] sm:$0xff]  ;;  %v1011_v27 = vld [vmem:[#allocation4 + $0x3d0] sm:$0xff] }
 0x146   : > { %1095 = vmatpush.msrb.mxu0 %v983_v7  ;;  %1115 = vmatpush.msrb.mxu1 %v1015_v18  ;;  %v462_v7 = vperm.slane %v1583_v14, 3  ;;  %v1045_v18 = vld [vmem:[#allocation4 + $0x4e0] sm:$0xff] }
 0x147   : > { %1089 = vmatpush.msra.mxu3 %v923_v46  ;;  %1069 = vmatpush.msra.mxu2 %v891_v53 }
 0x148   : > { %1096 = vmatpush.msrb.mxu0 %v981_v10  ;;  %1116 = vmatpush.msrb.mxu1 %v1013_v23  ;;  %v918_v10 = vld [vmem:[#allocation4 + $0xe8] sm:$0xff]  ;;  %v995_v23 = vld [vmem:[#allocation4 + $0x350] sm:$0xff] }
 0x149   : > { %1090 = vmatpush.msra.mxu3 %v921_v54  ;;  %1070 = vmatpush.msra.mxu2 %v889_v5  ;;  %v1039_v54 = vld [vmem:[#allocation4 + $0x4b0] sm:$0xff] }
 0x14a   : > { %1097 = vmatpush.msrb.mxu0 %v979_v13  ;;  %1117 = vmatpush.msrb.mxu1 %v1011_v27  ;;  %v959_v13 = vld [vmem:[#allocation4 + $0x230] sm:$0xff] }
 0x14b   : > { %1155 = vmatpush.msrb.mxu3 %v920_v62  ;;  %1135 = vmatpush.msrb.mxu2 %v1047_v9  ;;  %v1043_v27 = vld [vmem:[#allocation4 + $0x4d0] sm:$0xff] }
 0x14c   : > { %1098 = vmatpush.msrb.mxu0 %v977_v17  ;;  %1118 = vmatpush.msrb.mxu1 %v1009_v4 }
 0x14d   : > { %1156 = vmatpush.msrb.mxu3 %v918_v10  ;;  %1136 = vmatpush.msrb.mxu2 %v1045_v18 }
 0x14e   : > { %1099 = vmatpush.msrb.mxu0 %v975_v21  ;;  %1119 = vmatpush.msrb.mxu1 %v1007_v37  ;;  %v1041_v37 = vld [vmem:[#allocation4 + $0x4c0] sm:$0xff] }
 0x14f   : > { %1157 = vmatpush.msrb.mxu3 %v916_v19  ;;  %1137 = vmatpush.msrb.mxu2 %v1043_v27  ;;  %v1033_v27 = vld [vmem:[#allocation4 + $0x480] sm:$0xff] }
 0x150   : > { %1100 = vmatpush.msrb.mxu0 %v973_v26  ;;  %1120 = vmatpush.msrb.mxu1 %v1005_v43  ;;  %v953_v43 = vld [vmem:[#allocation4 + $0x200] sm:$0xff] }
 0x151   : > { %1138 = vmatpush.msrb.mxu2 %v1041_v37 }
 0x152   : > { %1101 = vmatpush.msrb.mxu0 %v971_v31  ;;  %1121 = vmatpush.msrb.mxu1 %v1003_v50 }
 0x153   : > { %1139 = vmatpush.msrb.mxu2 %v1039_v54 }
 0x154   : > { %1102 = vmatpush.msrb.mxu0 %v969_v35  ;;  %1122 = vmatpush.msrb.mxu1 %v1001_v58 }
 0x156   : > { %1103 = vmatpush.msrb.mxu0 %v967_v41  ;;  %1123 = vmatpush.msrb.mxu1 %v999_v8  ;;  %v912_v41 = vld [vmem:[#allocation4 + $0xb8] sm:$0xff]  ;;  %v950_v8 = vld [vmem:[#allocation4 + $0x1e8] sm:$0xff] }
 0x158   : > { %1104 = vmatpush.msrb.mxu0 %v965_v47  ;;  %1124 = vmatpush.msrb.mxu1 %v997_v15 }
 0x15a   : > { %1105 = vmatpush.msrb.mxu0 %v963_v55  ;;  %1125 = vmatpush.msrb.mxu1 %v995_v23  ;;  %v910_v55 = vld [vmem:[#allocation4 + $0xa8] sm:$0xff] }
 0x15c   : > { %1106 = vmatpush.msrb.mxu0 %v961_v6 }
 0x15e   : > { %1107 = vmatpush.msrb.mxu0 %v959_v13  ;;  %v1035_v13 = vld [vmem:[#allocation4 + $0x490] sm:$0xff] }
 0x1a0   : > { %v486_v28 = vpop.f32.mrf.mxu0  ;;  %v506_v60 = vpop.f32.mrf.mxu1 }
 0x1a1   : > { %v487_v32 = vadd.f32 %v486_v28, %v459_v22  ;;  %v957_v22 = vld [vmem:[#allocation4 + $0x220] sm:$0xff]  ;;  %v914_v28 = vld [vmem:[#allocation4 + $0xc8] sm:$0xff] }
 0x1a2   : > { %1108 = vmatpush.msrb.mxu0 %v957_v22  ;;  %1158 = vmatpush.msrb.mxu3 %v914_v28  ;;  %v985_v22 = vld [vmem:[#allocation4 + $0x300] sm:$0xff]  ;;  %v904_v28 = vld [vmem:[#allocation4 + $0x78] sm:$0xff] }
 0x1a3   : > { %v1586_v36 = vadd.f32 %v506_v60, %v487_v32  ;;  %v955_v32 = vld [vmem:[#allocation4 + $0x210] sm:$0xff]  ;;  %v993_v60 = vld [vmem:[#allocation4 + $0x340] sm:$0xff] }
 0x1a4   : > { %1109 = vmatpush.msrb.mxu0 %v955_v32  ;;  %1126 = vmatpush.msrb.mxu1 %v993_v60  ;;  %v984_v60 = vld [vmem:[#allocation4 + $0x2f8] sm:$0xff] }
 0x1a5   : > { %v1590_v42 = vmul.f32 0.70710677, %v1586_v36  ;;  %1159 = vmatpush.msrb.mxu3 %v912_v41 }
 0x1a6   : > { %1110 = vmatpush.msrb.mxu0 %v953_v43  ;;  %v944_v43 = vld [vmem:[#allocation4 + $0x1b8] sm:$0xff] }
 0x1a7   : > { %v679_v48 = vmul.f32 %v1590_v42, %v1590_v42  ;;  %v526_v49 = vpop.f32.mrf.mxu2  ;;  %v546_v52 = vpop.f32.mrf.mxu3  ;;  %1160 = vmatpush.msrb.mxu3 %v910_v55 }
 0x1a8   : > { %v527_v51 = vadd.f32 %v526_v49, %v460_v38 }
 0x1a9   : > { %v1595_v56 = vmin.f32 %v679_v48, 16.0  ;;  %v566_v57 = vpop.f32.mrf.mxu0  ;;  %v586_v3 = vpop.f32.mrf.mxu1 }
 0x1aa   : > { %v1597_v59 = vadd.f32 %v546_v52, %v527_v51  ;;  %v567_v61 = vadd.f32 %v566_v57, %v461_v44  ;;  %v991_v44 = vld [vmem:[#allocation4 + $0x330] sm:$0xff]  ;;  %v952_v57 = vld [vmem:[#allocation4 + $0x1f8] sm:$0xff] }
 0x1ab   : > { %v681_v63 = vmul.f32 2.1237322e-06, %v1595_v56  ;;  %v692_v2 = vmul.f32 3.8918573e-05, %v1595_v56  ;;  %1127 = vmatpush.msrb.mxu1 %v991_v44  ;;  %1175 = vmatpush.msra.mxu0 %v952_v57  ;;  %v982_v44 = vld [vmem:[#allocation4 + $0x2e8] sm:$0xff]  ;;  %v1027_v57 = vld [vmem:[#allocation4 + $0x450] sm:$0xff] }
 0x1ac   : > { %v1602_v0 = vmul.f32 0.70710677, %v1597_v59  ;;  %v1604_v1 = vadd.f32 %v586_v3, %v567_v61 }
 0x1ad   : > { %v682_v11 = vadd.f32 0.00028619796, %v681_v63  ;;  %v693_v12 = vadd.f32 0.001143296, %v692_v2  ;;  %v989_v63 = vld [vmem:[#allocation4 + $0x320] sm:$0xff]  ;;  %1176 = vmatpush.msra.mxu0 %v950_v8 }
 0x1ae   : > { %v719_v16 = vmul.f32 %v1602_v0, %v1602_v0  ;;  %v1610_v17 = vmul.f32 0.70710677, %v1604_v1  ;;  %v1037_v2 = vld [vmem:[#allocation4 + $0x4a0] sm:$0xff]  ;;  %1128 = vmatpush.msrb.mxu1 %v989_v63  ;;  %v898_v63 = vld [vmem:[#allocation4 + $0x48] sm:$0xff] }
 0x1af   : > { %v683_v20 = vmul.f32 %v682_v11, %v1595_v56  ;;  %v694_v21 = vmul.f32 %v693_v12, %v1595_v56  ;;  %1140 = vmatpush.msrb.mxu2 %v1037_v2  ;;  %v987_v12 = vld [vmem:[#allocation4 + $0x310] sm:$0xff]  ;;  %v940_v2 = vld [vmem:[#allocation4 + $0x198] sm:$0xff]  ;;  %v1025_v8 = vld [vmem:[#allocation4 + $0x440] sm:$0xff] }
 0x1b0   : > { %v1614_v24 = vmin.f32 %v719_v16, 16.0  ;;  %v759_v25 = vmul.f32 %v1610_v17, %v1610_v17  ;;  %v606_v26 = vpop.f32.mrf.mxu2  ;;  %v626_v35 = vpop.f32.mrf.mxu3  ;;  %1129 = vmatpush.msrb.mxu1 %v987_v12 }
 0x1b1   : > { %v684_v29 = vadd.f32 0.0036580483, %v683_v20  ;;  %v695_v30 = vadd.f32 0.014752088, %v694_v21  ;;  %v607_v31 = vadd.f32 %v606_v26, %v462_v7  ;;  %v908_v7 = vld [vmem:[#allocation4 + $0x98] sm:$0xff]  ;;  %v906_v20 = vld [vmem:[#allocation4 + $0x88] sm:$0xff]  ;;  %1141 = vmatpush.msrb.mxu2 %v1035_v13 }
 0x1b2   : > { %v721_v4 = vmul.f32 2.1237322e-06, %v1614_v24  ;;  %v732_v33 = vmul.f32 3.8918573e-05, %v1614_v24  ;;  %v1620_v34 = vmin.f32 %v759_v25, 16.0  ;;  %1161 = vmatpush.msrb.mxu3 %v908_v7  ;;  %v948_v21 = vld [vmem:[#allocation4 + $0x1d8] sm:$0xff]  ;;  %1130 = vmatpush.msrb.mxu1 %v985_v22 }
 0x1b3   : > { %v685_v38 = vmul.f32 %v684_v29, %v1595_v56  ;;  %v696_v39 = vmul.f32 %v695_v30, %v1595_v56  ;;  %v1624_v40 = vadd.f32 %v626_v35, %v607_v31  ;;  %v946_v29 = vld [vmem:[#allocation4 + $0x1c8] sm:$0xff]  ;;  %1177 = vmatpush.msra.mxu0 %v948_v21  ;;  %1142 = vmatpush.msrb.mxu2 %v1033_v27  ;;  %v1023_v13 = vld [vmem:[#allocation4 + $0x430] sm:$0xff]  ;;  %v936_v22 = vld [vmem:[#allocation4 + $0x178] sm:$0xff] }
 0x1b4   : > { %v722_v45 = vadd.f32 0.00028619796, %v721_v4  ;;  %v733_v46 = vadd.f32 0.001143296, %v732_v33  ;;  %v761_v47 = vmul.f32 2.1237322e-06, %v1620_v34  ;;  %1162 = vmatpush.msrb.mxu3 %v906_v20  ;;  %1195 = vmatpush.msra.mxu1 %v984_v60 }
 0x1b5   : > { %v686_v48 = vadd.f32 0.05243302, %v685_v38  ;;  %v697_v49 = vadd.f32 0.112945676, %v696_v39  ;;  %v772_v50 = vmul.f32 3.8918573e-05, %v1620_v34  ;;  %1178 = vmatpush.msra.mxu0 %v946_v29 }
 0x1b6   : > { %v723_v51 = vmul.f32 %v722_v45, %v1614_v24  ;;  %v734_v52 = vmul.f32 %v733_v46, %v1614_v24  ;;  %v762_v53 = vadd.f32 0.00028619796, %v761_v47  ;;  %v1632_v62 = vmul.f32 0.70710677, %v1624_v40  ;;  %v1031_v4 = vld [vmem:[#allocation4 + $0x470] sm:$0xff]  ;;  %1163 = vmatpush.msrb.mxu3 %v904_v28  ;;  %v902_v38 = vld [vmem:[#allocation4 + $0x68] sm:$0xff]  ;;  %1196 = vmatpush.msra.mxu1 %v982_v44 }
 0x1b7   : > { %v698_v58 = vmul.f32 %v697_v49, %v1595_v56  ;;  %v773_v61 = vadd.f32 0.001143296, %v772_v50  ;;  %v687_v15 = vmul.f32 %v686_v48, %v1595_v56  ;;  %v463_v46 = vperm.slane %v1583_v14, 4  ;;  %1143 = vmatpush.msrb.mxu2 %v1031_v4  ;;  %v1029_v47 = vld [vmem:[#allocation4 + $0x460] sm:$0xff]  ;;  %v900_v48 = vld [vmem:[#allocation4 + $0x58] sm:$0xff]  ;;  %v942_v49 = vld [vmem:[#allocation4 + $0x1a8] sm:$0xff]  ;;  %1179 = vmatpush.msra.mxu0 %v944_v43 }
 0x1b8   : > { %v724_v3 = vadd.f32 0.0036580483, %v723_v51  ;;  %v735_v5 = vadd.f32 0.014752088, %v734_v52  ;;  %v763_v6 = vmul.f32 %v762_v53, %v1620_v34  ;;  %v799_v11 = vmul.f32 %v1632_v62, %v1632_v62  ;;  %1164 = vmatpush.msrb.mxu3 %v902_v38  ;;  %v980_v53 = vld [vmem:[#allocation4 + $0x2d8] sm:$0xff]  ;;  %v1021_v29 = vld [vmem:[#allocation4 + $0x420] sm:$0xff] }
 0x1b9   : > { %v699_v9 = vadd.f32 0.4994258, %v698_v58  ;;  %v774_v10 = vmul.f32 %v773_v61, %v1620_v34  ;;  %v688_v39 = vadd.f32 0.18741608, %v687_v15  ;;  %1144 = vmatpush.msrb.mxu2 %v1029_v47  ;;  %1180 = vmatpush.msra.mxu0 %v942_v49  ;;  %v894_v15 = vld [vmem:[#allocation4 + $0x28] sm:$0xff]  ;;  %v1019_v43 = vld [vmem:[#allocation4 + $0x410] sm:$0xff] }
 0x1ba   : > { %v725_v16 = vmul.f32 %v724_v3, %v1614_v24  ;;  %v736_v18 = vmul.f32 %v735_v5, %v1614_v24  ;;  %v764_v19 = vadd.f32 0.0036580483, %v763_v6  ;;  %v1642_v26 = vmin.f32 %v799_v11, 16.0  ;;  %1165 = vmatpush.msrb.mxu3 %v900_v48  ;;  %1197 = vmatpush.msra.mxu1 %v980_v53  ;;  %v978_v3 = vld [vmem:[#allocation4 + $0x2c8] sm:$0xff]  ;;  %v932_v47 = vld [vmem:[#allocation4 + $0x158] sm:$0xff] }
 0x1bb   : > { %v700_v23 = vmul.f32 %v699_v9, %v1595_v56  ;;  %v775_v25 = vadd.f32 0.014752088, %v774_v10  ;;  %v689_v58 = vmul.f32 %v688_v39, %v1595_v56  ;;  %1145 = vmatpush.msrb.mxu2 %v1027_v57  ;;  %v896_v9 = vld [vmem:[#allocation4 + $0x38] sm:$0xff]  ;;  %v938_v10 = vld [vmem:[#allocation4 + $0x188] sm:$0xff]  ;;  %1181 = vmatpush.msra.mxu0 %v940_v2 }
 0x1bc   : > { %v726_v30 = vadd.f32 0.05243302, %v725_v16  ;;  %v737_v31 = vadd.f32 0.112945676, %v736_v18  ;;  %v765_v32 = vmul.f32 %v764_v19, %v1620_v34  ;;  %v801_v37 = vmul.f32 2.1237322e-06, %v1642_v26  ;;  %1166 = vmatpush.msrb.mxu3 %v898_v63  ;;  %1198 = vmatpush.msra.mxu1 %v978_v3 }
 0x1bd   : > { %v1645_v33 = vadd.f32 1.0, %v700_v23  ;;  %v776_v35 = vmul.f32 %v775_v25, %v1620_v34  ;;  %v812_v45 = vmul.f32 3.8918573e-05, %v1642_v26  ;;  %v976_v56 = vld [vmem:[#allocation4 + $0x2b8] sm:$0xff]  ;;  %1146 = vmatpush.msrb.mxu2 %v1025_v8  ;;  %v974_v23 = vld [vmem:[#allocation4 + $0x2a8] sm:$0xff]  ;;  %1182 = vmatpush.msra.mxu0 %v938_v10 }
 0x1be   : > { %v738_v41 = vmul.f32 %v737_v31, %v1614_v24  ;;  %v727_v50 = vmul.f32 %v726_v30, %v1614_v24  ;;  %v766_v52 = vadd.f32 0.05243302, %v765_v32  ;;  %v802_v55 = vadd.f32 0.00028619796, %v801_v37  ;;  %1167 = vmatpush.msrb.mxu3 %v896_v9  ;;  %1199 = vmatpush.msra.mxu1 %v976_v56  ;;  %v892_v30 = vld [vmem:[#allocation4 + $0x18] sm:$0xff]  ;;  %v934_v4 = vld [vmem:[#allocation4 + $0x168] sm:$0xff] }
 0x1bf   : > { %1391 = vrcp.f32 %v1645_v33  ;;  %v777_v54 = vadd.f32 0.112945676, %v776_v35  ;;  %v813_v6 = vadd.f32 0.001143296, %v812_v45  ;;  %v690_v25 = vadd.f32 1.1283791, %v689_v58  ;;  %1147 = vmatpush.msrb.mxu2 %v1023_v13  ;;  %1183 = vmatpush.msra.mxu0 %v936_v22 }
 0x1c0   : > { %v739_v51 = vadd.f32 0.4994258, %v738_v41  ;;  %v728_v11 = vadd.f32 0.18741608, %v727_v50  ;;  %v767_v18 = vmul.f32 %v766_v52, %v1620_v34  ;;  %v803_v20 = vmul.f32 %v802_v55, %v1642_v26  ;;  %1168 = vmatpush.msrb.mxu3 %v894_v15  ;;  %v972_v35 = vld [vmem:[#allocation4 + $0x298] sm:$0xff]  ;;  %1200 = vmatpush.msra.mxu1 %v974_v23  ;;  %v890_v44 = vld [vmem:[#allocation4 + $0x8] sm:$0xff] }
 0x1c1   : > { %v778_v5 = vmul.f32 %v777_v54, %v1620_v34  ;;  %v814_v21 = vmul.f32 %v813_v6, %v1642_v26  ;;  %v711_v31 = vand.u32 2147483647, %v1645_v33  ;;  %v713_v32 = vand.u32 2147483648, %v1645_v33  ;;  %1148 = vmatpush.msrb.mxu2 %v1021_v29  ;;  %v970_v48 = vld [vmem:[#allocation4 + $0x288] sm:$0xff]  ;;  %1184 = vmatpush.msra.mxu0 %v934_v4  ;;  %v968_v57 = vld [vmem:[#allocation4 + $0x278] sm:$0xff] }
 0x1c2   : > { %v740_v14 = vmul.f32 %v739_v51, %v1614_v24  ;;  %v646_v61 = vpop.f32.mrf.mxu0  ;;  %v666_v28 = vpop.f32.mrf.mxu1  ;;  %v729_v38 = vmul.f32 %v728_v11, %v1614_v24  ;;  %v768_v45 = vadd.f32 0.18741608, %v767_v18  ;;  %1169 = vmatpush.msrb.mxu3 %v892_v30  ;;  %1201 = vmatpush.msra.mxu1 %v972_v35  ;;  %v1017_v51 = vld [vmem:[#allocation4 + $0x400] sm:$0xff]  ;;  %v1679_v52 = vmul.f32 0.5, %v1586_v36  ;;  %v930_v55 = vld [vmem:[#allocation4 + $0x148] sm:$0xff]  ;;  %v928_v3 = vld [vmem:[#allocation4 + $0x138] sm:$0xff] }
 0x1c3   : > { %v647_v7 = vadd.f32 %v646_v61, %v463_v46  ;;  %v779_v19 = vadd.f32 0.4994258, %v778_v5  ;;  %v815_v41 = vadd.f32 0.014752088, %v814_v21  ;;  %v804_v46 = vadd.f32 0.0036580483, %v803_v20  ;;  %1149 = vmatpush.msrb.mxu2 %v1019_v43  ;;  %1185 = vmatpush.msra.mxu0 %v932_v47 }
 0x1c4   : > { %v1657_v12 = vadd.f32 1.0, %v740_v14  ;;  %v691_v53 = vmul.f32 %v690_v25, %v1590_v42  ;;  %1170 = vmatpush.msrb.mxu3 %v890_v44  ;;  %vm707_vm5 = vweird.f32 %v1645_v33  ;;  %v730_v61 = vadd.f32 1.1283791, %v729_v38  ;;  %1202 = vmatpush.msra.mxu1 %v970_v48  ;;  %v966_v5 = vld [vmem:[#allocation4 + $0x268] sm:$0xff]  ;;  %v964_v56 = vld [vmem:[#allocation4 + $0x258] sm:$0xff] }
 0x1c5   : > { %v1659_v16 = vpop.eup %1391  ;;  %v1669_v60 = vadd.f32 %v666_v28, %v647_v7  ;;  %v780_v39 = vmul.f32 %v779_v19, %v1620_v34  ;;  %v816_v24 = vmul.f32 %v815_v41, %v1642_v26  ;;  %v714_v36 = vor.u32 1.1754944e-38, %v713_v32  ;;  %1150 = vmatpush.msrb.mxu2 %v1017_v51  ;;  %1186 = vmatpush.msra.mxu0 %v930_v55  ;;  %v926_v11 = vld [vmem:[#allocation4 + $0x128] sm:$0xff]  ;;  %v924_v22 = vld [vmem:[#allocation4 + $0x118] sm:$0xff] }
 0x1c6   : > { %v703_v27 = vmul.f32 %v1659_v16, %v1645_v33  ;;  %1393 = vrcp.f32 %v1657_v12  ;;  %vm708_vm4 = vweird.f32 %v1659_v16  ;;  %v769_v63 = vmul.f32 %v768_v45, %v1620_v34  ;;  %1203 = vmatpush.msra.mxu1 %v968_v57  ;;  %v962_v23 = vld [vmem:[#allocation4 + $0x248] sm:$0xff]  ;;  %v960_v35 = vld [vmem:[#allocation4 + $0x238] sm:$0xff] }
 0x1c7   : > { %v1675_v50 = vadd.f32 1.0, %v780_v39  ;;  %v1683_v54 = vmul.f32 0.70710677, %v1669_v60  ;;  %vm709_vm6 = vmor %vm707_vm5, %vm708_vm4  ;;  %v805_v2 = vmul.f32 %v804_v46, %v1642_v26  ;;  %vm712_vm7 = vcmp.eq.f32.partialorder %v711_v31, 8.507059e+37  ;;  %1187 = vmatpush.msra.mxu0 %v928_v3  ;;  %v922_v4 = vld [vmem:[#allocation4 + $0x108] sm:$0xff]  ;;  %v1016_v51 = vld [vmem:[#allocation4 + $0x3f8] sm:$0xff] }
 0x1c8   : > { %v704_v37 = vsub.f32 1.0, %v703_v27  ;;  %v817_v6 = vadd.f32 0.112945676, %v816_v24  ;;  %v751_v10 = vand.u32 2147483647, %v1657_v12  ;;  %v753_v34 = vand.u32 2147483648, %v1657_v12  ;;  %1204 = vmatpush.msra.mxu1 %v966_v5 }
 0x1c9   : > { %1395 = vrcp.f32 %v1675_v50  ;;  %v839_v7 = vmul.f32 %v1683_v54, %v1683_v54  ;;  %v731_v15 = vmul.f32 %v730_v61, %v1602_v0  ;;  %v770_v20 = vadd.f32 1.1283791, %v769_v63  ;;  %1188 = vmatpush.msra.mxu0 %v926_v11  ;;  %v958_v46 = vld [vmem:[#allocation4 + $0x228] sm:$0xff] }
 0x1ca   : > { %v705_v49 = vmul.f32 %v1659_v16, %v704_v37  ;;  %v806_v21 = vadd.f32 0.05243302, %v805_v2  ;;  %vm747_vm9 = vweird.f32 %v1657_v12  ;;  %1205 = vmatpush.msra.mxu1 %v964_v56  ;;  %vm1710_vm10 = vcmp.eq.f32.partialorder %v751_v10, 8.507059e+37  ;;  %v954_v63 = vld [vmem:[#allocation4 + $0x208] sm:$0xff]  ;;  %v1048_v56 = vld [vmem:[#allocation4 + $0x4f8] sm:$0xff] }
 0x1cb   : > { %v1703_v18 = vmin.f32 %v839_v7, 16.0  ;;  %v754_v31 = vor.u32 1.1754944e-38, %v753_v34  ;;  %1189 = vmatpush.msra.mxu0 %v924_v22  ;;  %v793_v44 = vand.u32 2147483648, %v1675_v50  ;;  %vm787_vm13 = vweird.f32 %v1675_v50  ;;  %v1010_v10 = vld [vmem:[#allocation4 + $0x3c8] sm:$0xff] }
 0x1cc   : > { %v1685_v58 = vpop.eup %1393  ;;  %v706_v14 = vadd.f32 %v1659_v16, %v705_v49  ;;  %1206 = vmatpush.msra.mxu1 %v962_v23  ;;  %v807_v49 = vmul.f32 %v806_v21, %v1642_v26  ;;  %v670_v2 = vmul.f32 0.5, %v1597_v59  ;;  %v771_v3 = vmul.f32 %v770_v20, %v1610_v17  ;;  %v1046_v21 = vld [vmem:[#allocation4 + $0x4e8] sm:$0xff] }
 0x1cd   : > { %v743_v42 = vmul.f32 %v1685_v58, %v1657_v12  ;;  %vm748_vm8 = vweird.f32 %v1685_v58  ;;  %v841_v0 = vmul.f32 2.1237322e-06, %v1703_v18  ;;  %v791_v12 = vand.u32 2147483647, %v1675_v50  ;;  %1190 = vmatpush.msra.mxu0 %v922_v4  ;;  %v1006_v23 = vld [vmem:[#allocation4 + $0x3a8] sm:$0xff] }
 0x1ce   : > { %v710_v33 = vsel %vm709_vm6, %v1659_v16, %v706_v14  ;;  %v818_v16 = vmul.f32 %v817_v6, %v1642_v26  ;;  %vm749_vm11 = vmor %vm747_vm9, %vm748_vm8  ;;  %v852_v39 = vmul.f32 3.8918573e-05, %v1703_v18  ;;  %1207 = vmatpush.msra.mxu1 %v960_v35  ;;  %v808_v5 = vadd.f32 0.18741608, %v807_v49 }
 0x1cf   : > { %v715_v8 = vsel %vm712_vm7, %v714_v36, %v710_v33  ;;  %v744_v9 = vsub.f32 1.0, %v743_v42  ;;  %v1396_v25 = vpop.eup %1395  ;;  %v842_v45 = vadd.f32 0.00028619796, %v841_v0  ;;  %v1012_v33 = vld [vmem:[#allocation4 + $0x3d8] sm:$0xff]  ;;  %vm792_vm15 = vcmp.eq.f32.partialorder %v791_v12, 8.507059e+37 }
 0x1d0   : > { %v716_v13 = vmul.f32 %v715_v8, %v691_v53  ;;  %v819_v28 = vadd.f32 0.4994258, %v818_v16  ;;  %v783_v32 = vmul.f32 %v1396_v25, %v1675_v50  ;;  %vm788_vm12 = vweird.f32 %v1396_v25  ;;  %1208 = vmatpush.msra.mxu1 %v958_v46  ;;  %v1008_v16 = vld [vmem:[#allocation4 + $0x3b8] sm:$0xff] }
 0x1d1   : > { %v745_v19 = vmul.f32 %v1685_v58, %v744_v9  ;;  %v853_v57 = vadd.f32 0.001143296, %v852_v39  ;;  %v843_v36 = vmul.f32 %v842_v45, %v1703_v18  ;;  %vm789_vm14 = vmor %vm787_vm13, %vm788_vm12  ;;  %v794_v50 = vor.u32 1.1754944e-38, %v793_v44  ;;  %v1000_v46 = vld [vmem:[#allocation4 + $0x378] sm:$0xff] }
 0x1d2   : > { %v1347_v27 = vclamps-f32 %v716_v13, 1.0  ;;  %v820_v38 = vmul.f32 %v819_v28, %v1642_v26  ;;  %v784_v43 = vsub.f32 1.0, %v783_v32  ;;  %v1004_v32 = vld [vmem:[#allocation4 + $0x398] sm:$0xff] }
 0x1d3   : > { %v746_v29 = vadd.f32 %v1685_v58, %v745_v19  ;;  %v854_v42 = vmul.f32 %v853_v57, %v1703_v18  ;;  %v844_v59 = vadd.f32 0.0036580483, %v843_v36  ;;  %v994_v36 = vld [vmem:[#allocation4 + $0x348] sm:$0xff] }
 0x1d4   : > { %v879_v37 = vadd.f32 1.0, %v1347_v27  ;;  %v1728_v24 = vadd.f32 1.0, %v820_v38  ;;  %v785_v55 = vmul.f32 %v1396_v25, %v784_v43  ;;  %v1002_v38 = vld [vmem:[#allocation4 + $0x388] sm:$0xff]  ;;  %v1040_v43 = vld [vmem:[#allocation4 + $0x4b8] sm:$0xff] }
 0x1d5   : > { %v750_v41 = vsel %vm749_vm11, %v1685_v58, %v746_v29  ;;  %v956_v58 = vld [vmem:[#allocation4 + $0x218] sm:$0xff]  ;;  %v855_v8 = vadd.f32 0.014752088, %v854_v42  ;;  %v845_v0 = vmul.f32 %v844_v59, %v1703_v18  ;;  %v986_v59 = vld [vmem:[#allocation4 + $0x308] sm:$0xff] }
 0x1d6   : > { %v1723_v47 = vmul.f32 %v879_v37, %v1679_v52  ;;  %v755_v48 = vsel %vm1710_vm10, %v754_v31, %v750_v41  ;;  %1397 = vrcp.f32 %v1728_v24  ;;  %v1014_v52 = vld [vmem:[#allocation4 + $0x3e8] sm:$0xff]  ;;  %v786_v61 = vadd.f32 %v1396_v25, %v785_v55  ;;  %1209 = vmatpush.msra.mxu1 %v956_v58  ;;  %v1044_v29 = vld [vmem:[#allocation4 + $0x4d8] sm:$0xff] }
 0x1d7   : > { %v756_v53 = vmul.f32 %v755_v48, %v731_v15  ;;  %v856_v17 = vmul.f32 %v855_v8, %v1703_v18  ;;  %v809_v15 = vmul.f32 %v808_v5, %v1642_v26  ;;  %v833_v30 = vand.u32 2147483648, %v1728_v24  ;;  %v998_v55 = vld [vmem:[#allocation4 + $0x368] sm:$0xff] }
 0x1d8   : > { %1071 = vmatmul.f32.vlgmr.msra.gmra.mxu2 %v1723_v47  ;;  %v790_v7 = vsel %vm789_vm14, %v1396_v25, %v786_v61  ;;  %1210 = vmatpush.msra.mxu1 %v954_v63  ;;  %v671_v25 = vmul.f32 0.5, %v1604_v1  ;;  %v831_v37 = vand.u32 2147483647, %v1728_v24  ;;  %v1042_v1 = vld [vmem:[#allocation4 + $0x4c8] sm:$0xff]  ;;  %vm827_vm1 = vweird.f32 %v1728_v24 }
 0x1d9   : > { %v1348_v14 = vclamps-f32 %v756_v53, 1.0  ;;  %1215 = vmatpush.msra.mxu2 %v1016_v51  ;;  %v795_v9 = vsel %vm792_vm15, %v794_v50, %v790_v7  ;;  %v857_v22 = vadd.f32 0.112945676, %v856_v17  ;;  %v810_v26 = vadd.f32 1.1283791, %v809_v15  ;;  %v1038_v51 = vld [vmem:[#allocation4 + $0x4a8] sm:$0xff] }
 0x1da   : > { %v796_v11 = vmul.f32 %v795_v9, %v771_v3  ;;  %v846_v41 = vadd.f32 0.05243302, %v845_v0  ;;  %v834_v44 = vor.u32 1.1754944e-38, %v833_v30  ;;  %vm832_vm3 = vcmp.eq.f32.partialorder %v831_v37, 8.507059e+37  ;;  %v992_v3 = vld [vmem:[#allocation4 + $0x338] sm:$0xff]  ;;  %v1030_v5 = vld [vmem:[#allocation4 + $0x468] sm:$0xff] }
 0x1db   : > { %v880_v6 = vadd.f32 1.0, %v1348_v14  ;;  %1216 = vmatpush.msra.mxu2 %v1014_v52  ;;  %v858_v31 = vmul.f32 %v857_v22, %v1703_v18  ;;  %v811_v48 = vmul.f32 %v810_v26, %v1632_v62  ;;  %v1036_v52 = vld [vmem:[#allocation4 + $0x498] sm:$0xff]  ;;  %v1034_v62 = vld [vmem:[#allocation4 + $0x488] sm:$0xff]  ;;  %v673_v0 = vmul.f32 0.5, %v1669_v60 }
 0x1dc   : > { %v1398_v13 = vpop.eup %1397  ;;  %v1349_v19 = vclamps-f32 %v796_v11, 1.0  ;;  %v847_v58 = vmul.f32 %v846_v41, %v1703_v18  ;;  %v996_v14 = vld [vmem:[#allocation4 + $0x358] sm:$0xff] }
 0x1dd   : > { %v1738_v34 = vmul.f32 %v880_v6, %v670_v2  ;;  %1217 = vmatpush.msra.mxu2 %v1012_v33  ;;  %v823_v20 = vmul.f32 %v1398_v13, %v1728_v24  ;;  %vm828_vm0 = vweird.f32 %v1398_v13  ;;  %v859_v12 = vadd.f32 0.4994258, %v858_v31  ;;  %v1032_v2 = vld [vmem:[#allocation4 + $0x478] sm:$0xff]  ;;  %v990_v6 = vld [vmem:[#allocation4 + $0x328] sm:$0xff] }
 0x1de   : > { %v881_v27 = vadd.f32 1.0, %v1349_v19  ;;  %vm829_vm2 = vmor %vm827_vm1, %vm828_vm0  ;;  %v848_v63 = vadd.f32 0.18741608, %v847_v58  ;;  %v1028_v9 = vld [vmem:[#allocation4 + $0x458] sm:$0xff] }
 0x1df   : > { %1091 = vmatmul.f32.vlgmr.msra.gmra.mxu3 %v1738_v34  ;;  %1218 = vmatpush.msra.mxu2 %v1010_v10  ;;  %v824_v28 = vsub.f32 1.0, %v823_v20  ;;  %v860_v45 = vmul.f32 %v859_v12, %v1703_v18  ;;  %v1024_v15 = vld [vmem:[#allocation4 + $0x438] sm:$0xff] }
 0x1e0   : > { %1235 = vmatpush.msra.mxu3 %v1048_v56  ;;  %v1748_v4 = vmul.f32 %v881_v27, %v671_v25  ;;  %v849_v7 = vmul.f32 %v848_v63, %v1703_v18  ;;  %v1020_v22 = vld [vmem:[#allocation4 + $0x418] sm:$0xff]  ;;  %v1018_v27 = vld [vmem:[#allocation4 + $0x408] sm:$0xff] }
 0x1e1   : > { %1219 = vmatpush.msra.mxu2 %v1008_v16  ;;  %v825_v35 = vmul.f32 %v1398_v13, %v824_v28  ;;  %v861_v53 = vadd.f32 1.0, %v860_v45  ;;  %v1022_v16 = vld [vmem:[#allocation4 + $0x428] sm:$0xff] }
 0x1e2   : > { %1236 = vmatpush.msra.mxu3 %v1046_v21  ;;  %1111 = vmatmul.f32.vlgmr.msrb.gmra.mxu0 %v1748_v4  ;;  %v850_v17 = vadd.f32 1.1283791, %v849_v7 }
 0x1e3   : > { %1220 = vmatpush.msra.mxu2 %v1006_v23  ;;  %v826_v39 = vadd.f32 %v1398_v13, %v825_v35  ;;  %1399 = vrcp.f32 %v861_v53  ;;  %v873_v11 = vand.u32 2147483648, %v861_v53  ;;  %vm867_vm5 = vweird.f32 %v861_v53 }
 0x1e4   : > { %1237 = vmatpush.msra.mxu3 %v1044_v29  ;;  %v851_v20 = vmul.f32 %v850_v17, %v1683_v54  ;;  %v1049_v54 = vld [vmem:[%s1778_s4] sm:$0x3] }
 0x1e5   : > { %1221 = vmatpush.msra.mxu2 %v1004_v32  ;;  %v830_v49 = vsel %vm829_vm2, %v1398_v13, %v826_v39  ;;  %v871_v13 = vand.u32 2147483647, %v861_v53  ;;  %v874_v19 = vor.u32 1.1754944e-38, %v873_v11  ;;  %v1051_v30 = vperm.slane %v1049_v54, 0 }
 0x1e6   : > { %1238 = vmatpush.msra.mxu3 %v1042_v1  ;;  %v835_v24 = vsel %vm832_vm3, %v834_v44, %v830_v49  ;;  %v1052_v12 = vperm.slane %v1049_v54, 1 }
 0x1e7   : > { %1171 = vmatmul.f32.vlgmr.msrb.gmra.mxu3 %v1723_v47  ;;  %1222 = vmatpush.msra.mxu2 %v1002_v38  ;;  %v836_v57 = vmul.f32 %v835_v24, %v811_v48  ;;  %v672_v47 = vmul.f32 0.5, %v1624_v40  ;;  %v988_v40 = vld [vmem:[#allocation4 + $0x318] sm:$0xff]  ;;  %vm872_vm7 = vcmp.eq.f32.partialorder %v871_v13, 8.507059e+37 }
 0x1e8   : > { %1239 = vmatpush.msra.mxu3 %v1040_v43 }
 0x1e9   : > { %1223 = vmatpush.msra.mxu2 %v1000_v46  ;;  %v1350_v61 = vclamps-f32 %v836_v57, 1.0  ;;  %v1400_v33 = vpop.eup %1399 }
 0x1ea   : > { %1240 = vmatpush.msra.mxu3 %v1038_v51  ;;  %1191 = vmatmul.f32.vlgmr.msra.gmra.mxu0 %v1738_v34  ;;  %v863_v8 = vmul.f32 %v1400_v33, %v861_v53  ;;  %v1026_v34 = vld [vmem:[#allocation4 + $0x448] sm:$0xff]  ;;  %vm868_vm4 = vweird.f32 %v1400_v33 }
 0x1eb   : > { %1224 = vmatpush.msra.mxu2 %v998_v55  ;;  %v882_v42 = vadd.f32 1.0, %v1350_v61  ;;  %vm869_vm6 = vmor %vm867_vm5, %vm868_vm4 }
 0x1ec   : > { %1241 = vmatpush.msra.mxu3 %v1036_v52  ;;  %v864_v10 = vsub.f32 1.0, %v863_v8 }
 0x1ed   : > { %1225 = vmatpush.msra.mxu2 %v996_v14  ;;  %v887_v50 = vmul.f32 %v882_v42, %v672_v47 }
 0x1ee   : > { %1242 = vmatpush.msra.mxu3 %v1034_v62  ;;  %v865_v56 = vmul.f32 %v1400_v33, %v864_v10 }
 0x1ef   : > { %1226 = vmatpush.msra.mxu2 %v994_v36  ;;  %1131 = vmatmul.f32.vlgmr.msrb.gmra.mxu1 %v887_v50 }
 0x1f0   : > { %1243 = vmatpush.msra.mxu3 %v1032_v2  ;;  %v866_v18 = vadd.f32 %v1400_v33, %v865_v56 }
 0x1f1   : > { %1227 = vmatpush.msra.mxu2 %v992_v3 }
 0x1f2   : > { %1244 = vmatpush.msra.mxu3 %v1030_v5  ;;  %v870_v21 = vsel %vm869_vm6, %v1400_v33, %v866_v18 }
 0x1f3   : > { %1228 = vmatpush.msra.mxu2 %v990_v6  ;;  %v875_v23 = vsel %vm872_vm7, %v874_v19, %v870_v21 }
 0x1f4   : > { %1245 = vmatpush.msra.mxu3 %v1028_v9  ;;  %v876_v25 = vmul.f32 %v875_v23, %v851_v20 }
 0x1f5   : > { %1229 = vmatpush.msra.mxu2 %v988_v40 }
 0x1f6   : > { %1246 = vmatpush.msra.mxu3 %v1026_v34  ;;  %v1351_v28 = vclamps-f32 %v876_v25, 1.0 }
 0x1f7   : > { %1230 = vmatpush.msra.mxu2 %v986_v59  ;;  %1211 = vmatmul.f32.vlgmr.msra.gmra.mxu1 %v1748_v4 }
 0x1f8   : > { %1247 = vmatpush.msra.mxu3 %v1024_v15  ;;  %v883_v29 = vadd.f32 1.0, %v1351_v28 }
 0x1fa   : > { %1248 = vmatpush.msra.mxu3 %v1022_v16  ;;  %v888_v26 = vmul.f32 %v883_v29, %v673_v0 }
 0x1fc   : > { %1249 = vmatpush.msra.mxu3 %v1020_v22  ;;  %1151 = vmatmul.f32.vlgmr.msrb.gmra.mxu2 %v888_v26 }
 0x1fe   : > { %1250 = vmatpush.msra.mxu3 %v1018_v27 }
 0x1ff   : > { %1251 = vmatmul.f32.vlgmr.msra.gmra.mxu3 %v888_v26 }
 0x204   : > { %1231 = vmatmul.f32.vlgmr.msra.gmra.mxu2 %v887_v50 }
 0x25b   : > { %v1072_v31 = vpop.f32.mrf.mxu2 }
 0x25c   : > { %v1073_v4 = vadd.f32 %v1072_v31, %v1051_v30 }
 0x25f   : > { %v1112_v37 = vpop.f32.mrf.mxu0 }
 0x262   : > { %v1092_v32 = vpop.f32.mrf.mxu3 }
 0x263   : > { %v1093_v35 = vadd.f32 %v1092_v32, %v1073_v4 }
 0x265   : > { %v1113_v1 = vadd.f32 %v1112_v37, %v1093_v35 }
 0x267   : > { %v1192_v45 = vpop.f32.mrf.mxu0 }
 0x26a   : > { %v1172_v60 = vpop.f32.mrf.mxu3 }
 0x26b   : > { %v1173_v41 = vadd.f32 %v1172_v60, %v1052_v12 }
 0x26c   : > { %v1132_v38 = vpop.f32.mrf.mxu1 }
 0x26d   : > { %v1133_v39 = vadd.f32 %v1132_v38, %v1113_v1  ;;  %v1193_v46 = vadd.f32 %v1192_v45, %v1173_v41 }
 0x274   : > { %v1212_v48 = vpop.f32.mrf.mxu1 }
 0x275   : > { %v1213_v49 = vadd.f32 %v1212_v48, %v1193_v46 }
 0x27f   : > { %v1152_v43 = vpop.f32.mrf.mxu2 }
 0x280   : > { %v1153_v44 = vadd.f32 %v1152_v43, %v1133_v39 }
 0x282   : > { %1255 = vst [vmem:[%s258_s21] sm:$0xff] %v1153_v44  ;;  %v1252_v53 = vpop.f32.mrf.mxu3 }
 0x287   : > { %v1232_v51 = vpop.f32.mrf.mxu2 }
 0x288   : > { %v1233_v24 = vadd.f32 %v1232_v51, %v1213_v49 }
 0x28a   : > { %v1253_v55 = vadd.f32 %v1252_v53, %v1233_v24 }
 0x28c   : > { %1256 = vst [vmem:[%s258_s21 + $0x8] sm:$0xff] %v1253_v55 }
 0x28d PF: > { %s17_s18 = sadd.s32 1, %s1475_s18  }
 0x28e   : > { %p14_p7 = scmp.ge.s32.totalorder %s17_s18, 5  }
 0x290   :  { %16 = sbr.rel (!%p14_p7) target bundleno = 2 (0x2), region = 79 }
 0x295   :  { %1278 = vsyncpa [#allocation3], 1 }
 0x296   :  { %1280 = vsyncpa [#allocation3 + $0x1], 1 }
 0x297   :  { %1281 = vsyncpa [#allocation5], 1 }

</bundles_post_ra>
